<compile_context>
chip_gen: v7x
topology: tpu7x:2x2x1
jax: 0.10.0
libtpu: 0.0.40
codegen_flags: <defaults>
</compile_context>

<pallas_src>
import functools

import jax
import jax.numpy as jnp
from jax.experimental import pallas as pl
from jax.experimental.pallas import tpu as pltpu


_VMEM = pl.BlockSpec(memory_space=pltpu.MemorySpace.VMEM)


# ----------------------------------------------------------------------------
# Fused Pallas kernel
# ----------------------------------------------------------------------------
def _fused_gru_fc_kernel(*refs, seq_len, batch, hidden, num_layers):
    """Fused bidirectional multi-layer GRU + linear head.

    Input refs (in order):
      x2d  : (T*B, D)      input, rows ordered (t, b) t-major, matmul dtype
      per layer l:
        w_ih : (D_l, 6H)   [r_f,z_f,n_f | r_b,z_b,n_b] columns, matmul dtype
        w_hh : (2H, 6H)    block-diag, gate-interleaved [r_f,r_b,z_f,z_b,n_f,n_b]
        b_g  : (1, 6H)     b_ih + (r,z part of b_hh) folded, f32, plain layout
        b_hn : (1, 2H)     hidden-side bias of the n gate [n_f | n_b], f32
      w_fc : (2H, C)       matmul dtype
      b_fc : (1, C)        f32
    Output ref: (B, C) f32
    Scratch:
      gi_sc : (T*B, 6H) f32   per-step input gates, interleaved layout,
                              rows in loop-step order for both directions
      y_sc  : (T*B, 2H) f32   layer output slab [h_fwd(t) | h_bwd(t)],
                              rows in original time order
    """
    T, B, H = seq_len, batch, hidden
    x_ref = refs[0]
    wfc_ref = refs[1 + 4 * num_layers]
    bfc_ref = refs[2 + 4 * num_layers]
    out_ref = refs[3 + 4 * num_layers]
    gi_sc = refs[4 + 4 * num_layers]
    y_sc = refs[5 + 4 * num_layers]
    mm_dtype = wfc_ref.dtype

    h_cat = None      # (B, 2H) = [h_fwd | h_bwd] carried through the loop
    hb_first = None   # bwd hidden state at original time T-1 (loop step 0)

    x_op = x_ref[...]                                     # (T*B, D_in)
    for l in range(num_layers):
        wih_ref, whh_ref, bg_ref, bhn_ref = refs[1 + 4 * l: 5 + 4 * l]
        whh = whh_ref[...]                                # (2H, 6H)

        # ---- input projection: ONE big matmul per layer, biases folded in.
        # Entirely off the serial recurrence chain.
        g = jnp.dot(x_op, wih_ref[...],
                    preferred_element_type=jnp.float32) + bg_ref[...]

        # ---- scatter into gi_sc with gate-interleaved columns
        # [r_f, r_b, z_f, z_b, n_f, n_b]; forward rows keep original time
        # order, backward rows are reversed into loop-step order.
        gi_sc[:, 0 * H:1 * H] = g[:, 0 * H:1 * H]         # r_f
        gi_sc[:, 2 * H:3 * H] = g[:, 1 * H:2 * H]         # z_f
        gi_sc[:, 4 * H:5 * H] = g[:, 2 * H:3 * H]         # n_f
        for t in range(T):
            rb = g[(T - 1 - t) * B:(T - t) * B, :]
            gi_sc[t * B:(t + 1) * B, 1 * H:2 * H] = rb[:, 3 * H:4 * H]  # r_b
            gi_sc[t * B:(t + 1) * B, 3 * H:4 * H] = rb[:, 4 * H:5 * H]  # z_b
            gi_sc[t * B:(t + 1) * B, 5 * H:6 * H] = rb[:, 5 * H:6 * H]  # n_b

        # Hoisted bias broadcast (JAX does not CSE broadcast_in_dim).
        bhn = jnp.broadcast_to(bhn_ref[...], (B, 2 * H))

        # ---- recurrence: per step ONE block-diag matmul, ONE sigmoid (4H),
        # ONE tanh (2H), one fused blend on (B, 2H).
        h_cat = jnp.zeros((B, 2 * H), jnp.float32)
        last = (l == num_layers - 1)
        for t in range(T):                                # fully unrolled
            git = gi_sc[t * B:(t + 1) * B, :]             # (B, 6H)
            gh = jnp.dot(h_cat.astype(mm_dtype), whh,
                         preferred_element_type=jnp.float32)
            rz = jax.nn.sigmoid(git[:, 0:4 * H] + gh[:, 0:4 * H])
            r = rz[:, 0:2 * H]
            z = rz[:, 2 * H:4 * H]
            n = jnp.tanh(git[:, 4 * H:6 * H] + r * (gh[:, 4 * H:6 * H] + bhn))
            h_cat = n + z * (h_cat - n)                   # (1-z)*n + z*h_prev

            if not last:
                # Layer output slab in original time order: fwd half goes to
                # row block t, bwd half to row block T-1-t. Off the chain.
                y_sc[t * B:(t + 1) * B, 0:H] = h_cat[:, 0:H]
                y_sc[(T - 1 - t) * B:(T - t) * B, H:2 * H] = h_cat[:, H:2 * H]
            elif t == 0:
                hb_first = h_cat[:, H:2 * H]              # h_bwd at time T-1

        if not last:
            x_op = y_sc[...].astype(mm_dtype)             # next layer's input

    # ---- FC head on output[:, -1, :] = [h_fwd[T-1] | h_bwd[T-1]]: one matmul.
    fc_in = jnp.concatenate([h_cat[:, 0:H], hb_first], axis=-1)   # (B, 2H)
    out_ref[...] = jnp.dot(fc_in.astype(mm_dtype), wfc_ref[...],
                           preferred_element_type=jnp.float32) + bfc_ref[...]


# ----------------------------------------------------------------------------
# One-time parameter layout prep (done outside the per-call forward)
# ----------------------------------------------------------------------------
def prepare_params(params, mm_dtype=jnp.bfloat16):
    """Transpose / stack / fold weights once. mm_dtype = matmul operand dtype
    (bf16 recommended on v5e/v6e/v7x); gate math stays f32 in the kernel."""
    H = params["gru"][0][0]["w_hh"].shape[1]
    layers = []
    for layer in params["gru"]:
        f, b = layer                                     # fwd / bwd direction

        # (D_in, 6H), plain per-direction column stack [r,z,n]_f | [r,z,n]_b
        wih = jnp.concatenate([f["w_ih"].T, b["w_ih"].T], axis=1)

        # block-diagonal, gate-interleaved W_hh: columns [r_f,r_b,z_f,z_b,n_f,n_b]
        whh = jnp.zeros((2 * H, 6 * H), jnp.float32)
        wf, wb = f["w_hh"].T, b["w_hh"].T                # (H, 3H), cols [r,z,n]
        for g in range(3):
            whh = whh.at[0:H, (2 * g) * H:(2 * g + 1) * H].set(
                wf[:, g * H:(g + 1) * H])
            whh = whh.at[H:2 * H, (2 * g + 1) * H:(2 * g + 2) * H].set(
                wb[:, g * H:(g + 1) * H])

        # fold b_ih (all gates) + b_hh (r,z only) into the input-gate slab;
        # b_hn must stay inside the r*(.) term per PyTorch GRU semantics.
        def fold(p):
            bi, bh = p["b_ih"], p["b_hh"]
            return jnp.concatenate([bi[0:2 * H] + bh[0:2 * H], bi[2 * H:3 * H]])

        bg = jnp.concatenate([fold(f), fold(b)]).reshape(1, 6 * H)
        bhn = jnp.concatenate([f["b_hh"][2 * H:], b["b_hh"][2 * H:]]
                              ).reshape(1, 2 * H)

        layers.append(dict(
            w_ih=wih.astype(mm_dtype),
            w_hh=whh.astype(mm_dtype),
            b_g=bg.astype(jnp.float32),
            b_hn=bhn.astype(jnp.float32),
        ))
    return dict(layers=layers,
                w_fc=params["fc_w"].T.astype(mm_dtype),          # (2H, C)
                b_fc=params["fc_b"].reshape(1, -1).astype(jnp.float32))


@jax.jit
def seq_classifier_forward(prep, x_btd):
    """Equivalent of SeqClassifier.forward.  x_btd: (B, T, D) batch-first."""
    layers = prep["layers"]
    num_layers = len(layers)
    H = layers[0]["w_hh"].shape[0] // 2
    C = prep["w_fc"].shape[1]
    mm_dtype = prep["w_fc"].dtype

    B, T, D = x_btd.shape
    x2d = jnp.transpose(x_btd, (1, 0, 2)).reshape(T * B, D).astype(mm_dtype)

    operands = [x2d]
    for lyr in layers:
        operands += [lyr["w_ih"], lyr["w_hh"], lyr["b_g"], lyr["b_hn"]]
    operands += [prep["w_fc"], prep["b_fc"]]

    kernel = functools.partial(_fused_gru_fc_kernel, seq_len=T, batch=B,
                               hidden=H, num_layers=num_layers)
    # TODO(synk): add a batch-parallel grid axis (dimension_semantics=
    # ("parallel",)) for v7x megacore + T-chunked Buffered streaming when
    # B/T/H grow beyond toy sizes.
    return pl.pallas_call(
        kernel,
        out_shape=jax.ShapeDtypeStruct((B, C), jnp.float32),
        in_specs=[_VMEM] * len(operands),
        out_specs=_VMEM,
        scratch_shapes=[pltpu.VMEM((T * B, 6 * H), jnp.float32),
                        pltpu.VMEM((T * B, 2 * H), jnp.float32)],
    )(*operands)


# ----------------------------------------------------------------------------
# Deterministic parameter init (shapes match nn.GRU / nn.Linear)
# ----------------------------------------------------------------------------
def init_params(key, input_size, hidden_size, num_layers, num_classes,
                bidirectional=True):
    num_dirs = 2 if bidirectional else 1
    bound = 1.0 / jnp.sqrt(hidden_size)
    layers = []
    for l in range(num_layers):
        d_in = input_size if l == 0 else hidden_size * num_dirs
        dirs = []
        for _ in range(num_dirs):
            key, k1, k2, k3, k4 = jax.random.split(key, 5)
            dirs.append(dict(
                w_ih=jax.random.uniform(k1, (3 * hidden_size, d_in),
                                        jnp.float32, -bound, bound),
                w_hh=jax.random.uniform(k2, (3 * hidden_size, hidden_size),
                                        jnp.float32, -bound, bound),
                b_ih=jax.random.uniform(k3, (3 * hidden_size,),
                                        jnp.float32, -bound, bound),
                b_hh=jax.random.uniform(k4, (3 * hidden_size,),
                                        jnp.float32, -bound, bound),
            ))
        layers.append(dirs)
    key, kw, kb = jax.random.split(key, 3)
    fc_in = hidden_size * num_dirs
    fc_bound = 1.0 / jnp.sqrt(fc_in)
    return dict(
        gru=layers,
        fc_w=jax.random.uniform(kw, (num_classes, fc_in),
                                jnp.float32, -fc_bound, fc_bound),
        fc_b=jax.random.uniform(kb, (num_classes,),
                                jnp.float32, -fc_bound, fc_bound),
    )


# ----------------------------------------------------------------------------
# Pure-JAX reference (mirrors PyTorch nn.GRU math) for correctness checks
# ----------------------------------------------------------------------------
def _gru_dir_ref(x_tbd, w_ih, w_hh, b_ih, b_hh, reverse):
    T, B, _ = x_tbd.shape
    H = w_hh.shape[1]
    h = jnp.zeros((B, H), jnp.float32)
    outs = [None] * T
    order = range(T - 1, -1, -1) if reverse else range(T)
    for t in order:
        gi = x_tbd[t] @ w_ih.T + b_ih
        gh = h @ w_hh.T + b_hh
        r = jax.nn.sigmoid(gi[:, :H] + gh[:, :H])
        z = jax.nn.sigmoid(gi[:, H:2 * H] + gh[:, H:2 * H])
        n = jnp.tanh(gi[:, 2 * H:] + r * gh[:, 2 * H:])
        h = (1.0 - z) * n + z * h
        outs[t] = h
    return jnp.stack(outs, axis=0)


def _forward_ref(params, x_btd):
    x = jnp.transpose(x_btd, (1, 0, 2)).astype(jnp.float32)
    for layer in params["gru"]:
        outs = [
            _gru_dir_ref(x, p["w_ih"], p["w_hh"], p["b_ih"], p["b_hh"], rev)
            for p, rev in zip(layer, (False, True))
        ]
        x = jnp.concatenate(outs, axis=-1)
    return x[-1] @ params["fc_w"].T + params["fc_b"]


# ----------------------------------------------------------------------------
if __name__ == "__main__":
    # Small shapes consistent with the module's forward (B, T, input_size).
    B, T, D_IN, H, LAYERS, CLASSES = 2, 8, 32, 32, 2, 16

    key = jax.random.PRNGKey(0)
    key, kx, kp = jax.random.split(key, 3)
    x = jax.random.normal(kx, (B, T, D_IN), jnp.float32)
    params = init_params(kp, D_IN, H, LAYERS, CLASSES, bidirectional=True)

    ref = jax.block_until_ready(_forward_ref(params, x))

    # Exact-math check (f32 matmul operands) — validates the bookkeeping.
    prep32 = prepare_params(params, mm_dtype=jnp.float32)
    out32 = jax.block_until_ready(seq_classifier_forward(prep32, x))
    assert out32.shape == (B, CLASSES), out32.shape
    assert jnp.allclose(out32, ref, atol=2e-3, rtol=2e-3), (
        float(jnp.max(jnp.abs(out32 - ref))))

    # Production config: bf16 matmul operands, f32 accumulation + gate math.
    prep16 = prepare_params(params, mm_dtype=jnp.bfloat16)
    out16 = jax.block_until_ready(seq_classifier_forward(prep16, x))
    assert out16.shape == (B, CLASSES), out16.shape
    assert jnp.allclose(out16, ref, atol=8e-2, rtol=8e-2), (
        float(jnp.max(jnp.abs(out16 - ref))))

    print("KERNEL_OK")
</pallas_src>

<mosaic_0001>
module attributes {stable_mosaic.version = 11 : i64} {
  func.func @_fused_gru_fc_kernel(%arg0: memref<16x32xf32, #tpu.memory_space<vmem>>, %arg1: memref<32x192xf32, #tpu.memory_space<vmem>>, %arg2: memref<64x192xf32, #tpu.memory_space<vmem>>, %arg3: memref<1x192xf32, #tpu.memory_space<vmem>>, %arg4: memref<1x64xf32, #tpu.memory_space<vmem>>, %arg5: memref<64x192xf32, #tpu.memory_space<vmem>>, %arg6: memref<64x192xf32, #tpu.memory_space<vmem>>, %arg7: memref<1x192xf32, #tpu.memory_space<vmem>>, %arg8: memref<1x64xf32, #tpu.memory_space<vmem>>, %arg9: memref<64x16xf32, #tpu.memory_space<vmem>>, %arg10: memref<1x16xf32, #tpu.memory_space<vmem>>, %arg11: memref<2x16xf32, #tpu.memory_space<vmem>>, %arg12: memref<16x192xf32, #tpu.memory_space<vmem>>, %arg13: memref<16x64xf32, #tpu.memory_space<vmem>>) attributes {dimension_semantics = [], scalar_prefetch = 0 : i64, scratch_operands = 2 : i64, tpu.core_type = #tpu.core_type<tc>} {
    %c0 = arith.constant 0 : index
    %c0_0 = arith.constant 0 : index
    %0 = vector.load %arg0[%c0, %c0_0] : memref<16x32xf32, #tpu.memory_space<vmem>>, vector<16x32xf32>
    %c0_1 = arith.constant 0 : index
    %c0_2 = arith.constant 0 : index
    %1 = vector.load %arg2[%c0_1, %c0_2] : memref<64x192xf32, #tpu.memory_space<vmem>>, vector<64x192xf32>
    %c0_3 = arith.constant 0 : index
    %c0_4 = arith.constant 0 : index
    %2 = vector.load %arg1[%c0_3, %c0_4] : memref<32x192xf32, #tpu.memory_space<vmem>>, vector<32x192xf32>
    %cst = arith.constant dense<0.000000e+00> : vector<16x192xf32>
    %3 = tpu.matmul %0, %2, %cst {dimension_numbers = #tpu.dot_dimension_numbers<[1], [0], [0], [1], [0, 0, 1, 1], [], []>} : vector<16x32xf32>, vector<32x192xf32>, vector<16x192xf32> -> vector<16x192xf32>
    %c0_5 = arith.constant 0 : index
    %c0_6 = arith.constant 0 : index
    %4 = vector.load %arg3[%c0_5, %c0_6] : memref<1x192xf32, #tpu.memory_space<vmem>>, vector<1x192xf32>
    %5 = vector.broadcast %4 : vector<1x192xf32> to vector<16x192xf32>
    %6 = arith.addf %3, %5 : vector<16x192xf32>
    %7 = vector.extract_strided_slice %6 {offsets = [0, 0], sizes = [16, 32], strides = [1, 1]} : vector<16x192xf32> to vector<16x32xf32>
    %c0_7 = arith.constant 0 : index
    %c0_8 = arith.constant 0 : index
    %8 = vector.load %arg12[%c0_7, %c0_8] : memref<16x192xf32, #tpu.memory_space<vmem>>, vector<16x32xf32>
    tpu.vector_store %arg12[%c0_7, %c0_8], %7 {strides = array<i32>} : memref<16x192xf32, #tpu.memory_space<vmem>>, vector<16x32xf32>,
    %9 = vector.extract_strided_slice %6 {offsets = [0, 32], sizes = [16, 32], strides = [1, 1]} : vector<16x192xf32> to vector<16x32xf32>
    %c0_9 = arith.constant 0 : index
    %c64 = arith.constant 64 : index
    %10 = vector.load %arg12[%c0_9, %c64] : memref<16x192xf32, #tpu.memory_space<vmem>>, vector<16x32xf32>
    tpu.vector_store %arg12[%c0_9, %c64], %9 {strides = array<i32>} : memref<16x192xf32, #tpu.memory_space<vmem>>, vector<16x32xf32>,
    %11 = vector.extract_strided_slice %6 {offsets = [0, 64], sizes = [16, 32], strides = [1, 1]} : vector<16x192xf32> to vector<16x32xf32>
    %c0_10 = arith.constant 0 : index
    %c128 = arith.constant 128 : index
    %12 = vector.load %arg12[%c0_10, %c128] : memref<16x192xf32, #tpu.memory_space<vmem>>, vector<16x32xf32>
    tpu.vector_store %arg12[%c0_10, %c128], %11 {strides = array<i32>} : memref<16x192xf32, #tpu.memory_space<vmem>>, vector<16x32xf32>,
    %13 = vector.extract_strided_slice %6 {offsets = [14, 0], sizes = [2, 192], strides = [1, 1]} : vector<16x192xf32> to vector<2x192xf32>
    %14 = vector.extract_strided_slice %13 {offsets = [0, 96], sizes = [2, 32], strides = [1, 1]} : vector<2x192xf32> to vector<2x32xf32>
    %c0_11 = arith.constant 0 : index
    %c32 = arith.constant 32 : index
    %15 = vector.load %arg12[%c0_11, %c32] : memref<16x192xf32, #tpu.memory_space<vmem>>, vector<2x32xf32>
    tpu.vector_store %arg12[%c0_11, %c32], %14 {strides = array<i32>} : memref<16x192xf32, #tpu.memory_space<vmem>>, vector<2x32xf32>,
    %16 = vector.extract_strided_slice %13 {offsets = [0, 128], sizes = [2, 32], strides = [1, 1]} : vector<2x192xf32> to vector<2x32xf32>
    %c0_12 = arith.constant 0 : index
    %c96 = arith.constant 96 : index
    %17 = vector.load %arg12[%c0_12, %c96] : memref<16x192xf32, #tpu.memory_space<vmem>>, vector<2x32xf32>
    tpu.vector_store %arg12[%c0_12, %c96], %16 {strides = array<i32>} : memref<16x192xf32, #tpu.memory_space<vmem>>, vector<2x32xf32>,
    %18 = vector.extract_strided_slice %13 {offsets = [0, 160], sizes = [2, 32], strides = [1, 1]} : vector<2x192xf32> to vector<2x32xf32>
    %c0_13 = arith.constant 0 : index
    %c160 = arith.constant 160 : index
    %19 = vector.load %arg12[%c0_13, %c160] : memref<16x192xf32, #tpu.memory_space<vmem>>, vector<2x32xf32>
    tpu.vector_store %arg12[%c0_13, %c160], %18 {strides = array<i32>} : memref<16x192xf32, #tpu.memory_space<vmem>>, vector<2x32xf32>,
    %20 = vector.extract_strided_slice %6 {offsets = [12, 0], sizes = [2, 192], strides = [1, 1]} : vector<16x192xf32> to vector<2x192xf32>
    %21 = vector.extract_strided_slice %20 {offsets = [0, 96], sizes = [2, 32], strides = [1, 1]} : vector<2x192xf32> to vector<2x32xf32>
    %c2 = arith.constant 2 : index
    %c32_14 = arith.constant 32 : index
    %22 = vector.load %arg12[%c2, %c32_14] : memref<16x192xf32, #tpu.memory_space<vmem>>, vector<2x32xf32>
    tpu.vector_store %arg12[%c2, %c32_14], %21 {strides = array<i32>} : memref<16x192xf32, #tpu.memory_space<vmem>>, vector<2x32xf32>,
    %23 = vector.extract_strided_slice %20 {offsets = [0, 128], sizes = [2, 32], strides = [1, 1]} : vector<2x192xf32> to vector<2x32xf32>
    %c2_15 = arith.constant 2 : index
    %c96_16 = arith.constant 96 : index
    %24 = vector.load %arg12[%c2_15, %c96_16] : memref<16x192xf32, #tpu.memory_space<vmem>>, vector<2x32xf32>
    tpu.vector_store %arg12[%c2_15, %c96_16], %23 {strides = array<i32>} : memref<16x192xf32, #tpu.memory_space<vmem>>, vector<2x32xf32>,
    %25 = vector.extract_strided_slice %20 {offsets = [0, 160], sizes = [2, 32], strides = [1, 1]} : vector<2x192xf32> to vector<2x32xf32>
    %c2_17 = arith.constant 2 : index
    %c160_18 = arith.constant 160 : index
    %26 = vector.load %arg12[%c2_17, %c160_18] : memref<16x192xf32, #tpu.memory_space<vmem>>, vector<2x32xf32>
    tpu.vector_store %arg12[%c2_17, %c160_18], %25 {strides = array<i32>} : memref<16x192xf32, #tpu.memory_space<vmem>>, vector<2x32xf32>,
    %27 = vector.extract_strided_slice %6 {offsets = [10, 0], sizes = [2, 192], strides = [1, 1]} : vector<16x192xf32> to vector<2x192xf32>
    %28 = vector.extract_strided_slice %27 {offsets = [0, 96], sizes = [2, 32], strides = [1, 1]} : vector<2x192xf32> to vector<2x32xf32>
    %c4 = arith.constant 4 : index
    %c32_19 = arith.constant 32 : index
    %29 = vector.load %arg12[%c4, %c32_19] : memref<16x192xf32, #tpu.memory_space<vmem>>, vector<2x32xf32>
    tpu.vector_store %arg12[%c4, %c32_19], %28 {strides = array<i32>} : memref<16x192xf32, #tpu.memory_space<vmem>>, vector<2x32xf32>,
    %30 = vector.extract_strided_slice %27 {offsets = [0, 128], sizes = [2, 32], strides = [1, 1]} : vector<2x192xf32> to vector<2x32xf32>
    %c4_20 = arith.constant 4 : index
    %c96_21 = arith.constant 96 : index
    %31 = vector.load %arg12[%c4_20, %c96_21] : memref<16x192xf32, #tpu.memory_space<vmem>>, vector<2x32xf32>
    tpu.vector_store %arg12[%c4_20, %c96_21], %30 {strides = array<i32>} : memref<16x192xf32, #tpu.memory_space<vmem>>, vector<2x32xf32>,
    %32 = vector.extract_strided_slice %27 {offsets = [0, 160], sizes = [2, 32], strides = [1, 1]} : vector<2x192xf32> to vector<2x32xf32>
    %c4_22 = arith.constant 4 : index
    %c160_23 = arith.constant 160 : index
    %33 = vector.load %arg12[%c4_22, %c160_23] : memref<16x192xf32, #tpu.memory_space<vmem>>, vector<2x32xf32>
    tpu.vector_store %arg12[%c4_22, %c160_23], %32 {strides = array<i32>} : memref<16x192xf32, #tpu.memory_space<vmem>>, vector<2x32xf32>,
    %34 = vector.extract_strided_slice %6 {offsets = [8, 0], sizes = [2, 192], strides = [1, 1]} : vector<16x192xf32> to vector<2x192xf32>
    %35 = vector.extract_strided_slice %34 {offsets = [0, 96], sizes = [2, 32], strides = [1, 1]} : vector<2x192xf32> to vector<2x32xf32>
    %c6 = arith.constant 6 : index
    %c32_24 = arith.constant 32 : index
    %36 = vector.load %arg12[%c6, %c32_24] : memref<16x192xf32, #tpu.memory_space<vmem>>, vector<2x32xf32>
    tpu.vector_store %arg12[%c6, %c32_24], %35 {strides = array<i32>} : memref<16x192xf32, #tpu.memory_space<vmem>>, vector<2x32xf32>,
    %37 = vector.extract_strided_slice %34 {offsets = [0, 128], sizes = [2, 32], strides = [1, 1]} : vector<2x192xf32> to vector<2x32xf32>
    %c6_25 = arith.constant 6 : index
    %c96_26 = arith.constant 96 : index
    %38 = vector.load %arg12[%c6_25, %c96_26] : memref<16x192xf32, #tpu.memory_space<vmem>>, vector<2x32xf32>
    tpu.vector_store %arg12[%c6_25, %c96_26], %37 {strides = array<i32>} : memref<16x192xf32, #tpu.memory_space<vmem>>, vector<2x32xf32>,
    %39 = vector.extract_strided_slice %34 {offsets = [0, 160], sizes = [2, 32], strides = [1, 1]} : vector<2x192xf32> to vector<2x32xf32>
    %c6_27 = arith.constant 6 : index
    %c160_28 = arith.constant 160 : index
    %40 = vector.load %arg12[%c6_27, %c160_28] : memref<16x192xf32, #tpu.memory_space<vmem>>, vector<2x32xf32>
    tpu.vector_store %arg12[%c6_27, %c160_28], %39 {strides = array<i32>} : memref<16x192xf32, #tpu.memory_space<vmem>>, vector<2x32xf32>,
    %41 = vector.extract_strided_slice %6 {offsets = [6, 0], sizes = [2, 192], strides = [1, 1]} : vector<16x192xf32> to vector<2x192xf32>
    %42 = vector.extract_strided_slice %41 {offsets = [0, 96], sizes = [2, 32], strides = [1, 1]} : vector<2x192xf32> to vector<2x32xf32>
    %c8 = arith.constant 8 : index
    %c32_29 = arith.constant 32 : index
    %43 = vector.load %arg12[%c8, %c32_29] : memref<16x192xf32, #tpu.memory_space<vmem>>, vector<2x32xf32>
    tpu.vector_store %arg12[%c8, %c32_29], %42 {strides = array<i32>} : memref<16x192xf32, #tpu.memory_space<vmem>>, vector<2x32xf32>,
    %44 = vector.extract_strided_slice %41 {offsets = [0, 128], sizes = [2, 32], strides = [1, 1]} : vector<2x192xf32> to vector<2x32xf32>
    %c8_30 = arith.constant 8 : index
    %c96_31 = arith.constant 96 : index
    %45 = vector.load %arg12[%c8_30, %c96_31] : memref<16x192xf32, #tpu.memory_space<vmem>>, vector<2x32xf32>
    tpu.vector_store %arg12[%c8_30, %c96_31], %44 {strides = array<i32>} : memref<16x192xf32, #tpu.memory_space<vmem>>, vector<2x32xf32>,
    %46 = vector.extract_strided_slice %41 {offsets = [0, 160], sizes = [2, 32], strides = [1, 1]} : vector<2x192xf32> to vector<2x32xf32>
    %c8_32 = arith.constant 8 : index
    %c160_33 = arith.constant 160 : index
    %47 = vector.load %arg12[%c8_32, %c160_33] : memref<16x192xf32, #tpu.memory_space<vmem>>, vector<2x32xf32>
    tpu.vector_store %arg12[%c8_32, %c160_33], %46 {strides = array<i32>} : memref<16x192xf32, #tpu.memory_space<vmem>>, vector<2x32xf32>,
    %48 = vector.extract_strided_slice %6 {offsets = [4, 0], sizes = [2, 192], strides = [1, 1]} : vector<16x192xf32> to vector<2x192xf32>
    %49 = vector.extract_strided_slice %48 {offsets = [0, 96], sizes = [2, 32], strides = [1, 1]} : vector<2x192xf32> to vector<2x32xf32>
    %c10 = arith.constant 10 : index
    %c32_34 = arith.constant 32 : index
    %50 = vector.load %arg12[%c10, %c32_34] : memref<16x192xf32, #tpu.memory_space<vmem>>, vector<2x32xf32>
    tpu.vector_store %arg12[%c10, %c32_34], %49 {strides = array<i32>} : memref<16x192xf32, #tpu.memory_space<vmem>>, vector<2x32xf32>,
    %51 = vector.extract_strided_slice %48 {offsets = [0, 128], sizes = [2, 32], strides = [1, 1]} : vector<2x192xf32> to vector<2x32xf32>
    %c10_35 = arith.constant 10 : index
    %c96_36 = arith.constant 96 : index
    %52 = vector.load %arg12[%c10_35, %c96_36] : memref<16x192xf32, #tpu.memory_space<vmem>>, vector<2x32xf32>
    tpu.vector_store %arg12[%c10_35, %c96_36], %51 {strides = array<i32>} : memref<16x192xf32, #tpu.memory_space<vmem>>, vector<2x32xf32>,
    %53 = vector.extract_strided_slice %48 {offsets = [0, 160], sizes = [2, 32], strides = [1, 1]} : vector<2x192xf32> to vector<2x32xf32>
    %c10_37 = arith.constant 10 : index
    %c160_38 = arith.constant 160 : index
    %54 = vector.load %arg12[%c10_37, %c160_38] : memref<16x192xf32, #tpu.memory_space<vmem>>, vector<2x32xf32>
    tpu.vector_store %arg12[%c10_37, %c160_38], %53 {strides = array<i32>} : memref<16x192xf32, #tpu.memory_space<vmem>>, vector<2x32xf32>,
    %55 = vector.extract_strided_slice %6 {offsets = [2, 0], sizes = [2, 192], strides = [1, 1]} : vector<16x192xf32> to vector<2x192xf32>
    %56 = vector.extract_strided_slice %55 {offsets = [0, 96], sizes = [2, 32], strides = [1, 1]} : vector<2x192xf32> to vector<2x32xf32>
    %c12 = arith.constant 12 : index
    %c32_39 = arith.constant 32 : index
    %57 = vector.load %arg12[%c12, %c32_39] : memref<16x192xf32, #tpu.memory_space<vmem>>, vector<2x32xf32>
    tpu.vector_store %arg12[%c12, %c32_39], %56 {strides = array<i32>} : memref<16x192xf32, #tpu.memory_space<vmem>>, vector<2x32xf32>,
    %58 = vector.extract_strided_slice %55 {offsets = [0, 128], sizes = [2, 32], strides = [1, 1]} : vector<2x192xf32> to vector<2x32xf32>
    %c12_40 = arith.constant 12 : index
    %c96_41 = arith.constant 96 : index
    %59 = vector.load %arg12[%c12_40, %c96_41] : memref<16x192xf32, #tpu.memory_space<vmem>>, vector<2x32xf32>
    tpu.vector_store %arg12[%c12_40, %c96_41], %58 {strides = array<i32>} : memref<16x192xf32, #tpu.memory_space<vmem>>, vector<2x32xf32>,
    %60 = vector.extract_strided_slice %55 {offsets = [0, 160], sizes = [2, 32], strides = [1, 1]} : vector<2x192xf32> to vector<2x32xf32>
    %c12_42 = arith.constant 12 : index
    %c160_43 = arith.constant 160 : index
    %61 = vector.load %arg12[%c12_42, %c160_43] : memref<16x192xf32, #tpu.memory_space<vmem>>, vector<2x32xf32>
    tpu.vector_store %arg12[%c12_42, %c160_43], %60 {strides = array<i32>} : memref<16x192xf32, #tpu.memory_space<vmem>>, vector<2x32xf32>,
    %62 = vector.extract_strided_slice %6 {offsets = [0, 0], sizes = [2, 192], strides = [1, 1]} : vector<16x192xf32> to vector<2x192xf32>
    %63 = vector.extract_strided_slice %62 {offsets = [0, 96], sizes = [2, 32], strides = [1, 1]} : vector<2x192xf32> to vector<2x32xf32>
    %c14 = arith.constant 14 : index
    %c32_44 = arith.constant 32 : index
    %64 = vector.load %arg12[%c14, %c32_44] : memref<16x192xf32, #tpu.memory_space<vmem>>, vector<2x32xf32>
    tpu.vector_store %arg12[%c14, %c32_44], %63 {strides = array<i32>} : memref<16x192xf32, #tpu.memory_space<vmem>>, vector<2x32xf32>,
    %65 = vector.extract_strided_slice %62 {offsets = [0, 128], sizes = [2, 32], strides = [1, 1]} : vector<2x192xf32> to vector<2x32xf32>
    %c14_45 = arith.constant 14 : index
    %c96_46 = arith.constant 96 : index
    %66 = vector.load %arg12[%c14_45, %c96_46] : memref<16x192xf32, #tpu.memory_space<vmem>>, vector<2x32xf32>
    tpu.vector_store %arg12[%c14_45, %c96_46], %65 {strides = array<i32>} : memref<16x192xf32, #tpu.memory_space<vmem>>, vector<2x32xf32>,
    %67 = vector.extract_strided_slice %62 {offsets = [0, 160], sizes = [2, 32], strides = [1, 1]} : vector<2x192xf32> to vector<2x32xf32>
    %c14_47 = arith.constant 14 : index
    %c160_48 = arith.constant 160 : index
    %68 = vector.load %arg12[%c14_47, %c160_48] : memref<16x192xf32, #tpu.memory_space<vmem>>, vector<2x32xf32>
    tpu.vector_store %arg12[%c14_47, %c160_48], %67 {strides = array<i32>} : memref<16x192xf32, #tpu.memory_space<vmem>>, vector<2x32xf32>,
    %c0_49 = arith.constant 0 : index
    %c0_50 = arith.constant 0 : index
    %69 = vector.load %arg4[%c0_49, %c0_50] : memref<1x64xf32, #tpu.memory_space<vmem>>, vector<1x64xf32>
    %70 = vector.shape_cast %69 : vector<1x64xf32> to vector<1x64xf32>
    %71 = vector.broadcast %70 : vector<1x64xf32> to vector<2x64xf32>
    %cst_51 = arith.constant 0.000000e+00 : f32
    %72 = vector.broadcast %cst_51 : f32 to vector<2x64xf32>
    %c0_52 = arith.constant 0 : index
    %c0_53 = arith.constant 0 : index
    %73 = vector.load %arg12[%c0_52, %c0_53] : memref<16x192xf32, #tpu.memory_space<vmem>>, vector<2x192xf32>
    %cst_54 = arith.constant dense<0.000000e+00> : vector<2x192xf32>
    %74 = tpu.matmul %72, %1, %cst_54 {dimension_numbers = #tpu.dot_dimension_numbers<[1], [0], [0], [1], [0, 0, 1, 1], [], []>} : vector<2x64xf32>, vector<64x192xf32>, vector<2x192xf32> -> vector<2x192xf32>
    %75 = vector.extract_strided_slice %73 {offsets = [0, 0], sizes = [2, 128], strides = [1, 1]} : vector<2x192xf32> to vector<2x128xf32>
    %76 = vector.extract_strided_slice %74 {offsets = [0, 0], sizes = [2, 128], strides = [1, 1]} : vector<2x192xf32> to vector<2x128xf32>
    %77 = arith.addf %75, %76 : vector<2x128xf32>
    %78 = arith.negf %77 : vector<2x128xf32>
    %79 = math.exp %78 : vector<2x128xf32>
    %cst_55 = arith.constant 1.000000e+00 : f32
    %80 = vector.broadcast %cst_55 : f32 to vector<2x128xf32>
    %81 = arith.addf %80, %79 : vector<2x128xf32>
    %82 = arith.divf %80, %81 : vector<2x128xf32>
    %83 = vector.extract_strided_slice %82 {offsets = [0, 0], sizes = [2, 64], strides = [1, 1]} : vector<2x128xf32> to vector<2x64xf32>
    %84 = vector.extract_strided_slice %82 {offsets = [0, 64], sizes = [2, 64], strides = [1, 1]} : vector<2x128xf32> to vector<2x64xf32>
    %85 = vector.extract_strided_slice %73 {offsets = [0, 128], sizes = [2, 64], strides = [1, 1]} : vector<2x192xf32> to vector<2x64xf32>
    %86 = vector.extract_strided_slice %74 {offsets = [0, 128], sizes = [2, 64], strides = [1, 1]} : vector<2x192xf32> to vector<2x64xf32>
    %87 = arith.addf %86, %71 : vector<2x64xf32>
    %88 = arith.mulf %83, %87 : vector<2x64xf32>
    %89 = arith.addf %85, %88 : vector<2x64xf32>
    %90 = math.tanh %89 : vector<2x64xf32>
    %91 = arith.subf %72, %90 : vector<2x64xf32>
    %92 = arith.mulf %84, %91 : vector<2x64xf32>
    %93 = arith.addf %90, %92 : vector<2x64xf32>
    %94 = vector.extract_strided_slice %93 {offsets = [0, 0], sizes = [2, 32], strides = [1, 1]} : vector<2x64xf32> to vector<2x32xf32>
    %c0_56 = arith.constant 0 : index
    %c0_57 = arith.constant 0 : index
    %95 = vector.load %arg13[%c0_56, %c0_57] : memref<16x64xf32, #tpu.memory_space<vmem>>, vector<2x32xf32>
    tpu.vector_store %arg13[%c0_56, %c0_57], %94 {strides = array<i32>} : memref<16x64xf32, #tpu.memory_space<vmem>>, vector<2x32xf32>,
    %96 = vector.extract_strided_slice %93 {offsets = [0, 32], sizes = [2, 32], strides = [1, 1]} : vector<2x64xf32> to vector<2x32xf32>
    %c14_58 = arith.constant 14 : index
    %c32_59 = arith.constant 32 : index
    %97 = vector.load %arg13[%c14_58, %c32_59] : memref<16x64xf32, #tpu.memory_space<vmem>>, vector<2x32xf32>
    tpu.vector_store %arg13[%c14_58, %c32_59], %96 {strides = array<i32>} : memref<16x64xf32, #tpu.memory_space<vmem>>, vector<2x32xf32>,
    %c2_60 = arith.constant 2 : index
    %c0_61 = arith.constant 0 : index
    %98 = vector.load %arg12[%c2_60, %c0_61] : memref<16x192xf32, #tpu.memory_space<vmem>>, vector<2x192xf32>
    %cst_62 = arith.constant dense<0.000000e+00> : vector<2x192xf32>
    %99 = tpu.matmul %93, %1, %cst_62 {dimension_numbers = #tpu.dot_dimension_numbers<[1], [0], [0], [1], [0, 0, 1, 1], [], []>} : vector<2x64xf32>, vector<64x192xf32>, vector<2x192xf32> -> vector<2x192xf32>
    %100 = vector.extract_strided_slice %98 {offsets = [0, 0], sizes = [2, 128], strides = [1, 1]} : vector<2x192xf32> to vector<2x128xf32>
    %101 = vector.extract_strided_slice %99 {offsets = [0, 0], sizes = [2, 128], strides = [1, 1]} : vector<2x192xf32> to vector<2x128xf32>
    %102 = arith.addf %100, %101 : vector<2x128xf32>
    %103 = arith.negf %102 : vector<2x128xf32>
    %104 = math.exp %103 : vector<2x128xf32>
    %cst_63 = arith.constant 1.000000e+00 : f32
    %105 = vector.broadcast %cst_63 : f32 to vector<2x128xf32>
    %106 = arith.addf %105, %104 : vector<2x128xf32>
    %107 = arith.divf %105, %106 : vector<2x128xf32>
    %108 = vector.extract_strided_slice %107 {offsets = [0, 0], sizes = [2, 64], strides = [1, 1]} : vector<2x128xf32> to vector<2x64xf32>
    %109 = vector.extract_strided_slice %107 {offsets = [0, 64], sizes = [2, 64], strides = [1, 1]} : vector<2x128xf32> to vector<2x64xf32>
    %110 = vector.extract_strided_slice %98 {offsets = [0, 128], sizes = [2, 64], strides = [1, 1]} : vector<2x192xf32> to vector<2x64xf32>
    %111 = vector.extract_strided_slice %99 {offsets = [0, 128], sizes = [2, 64], strides = [1, 1]} : vector<2x192xf32> to vector<2x64xf32>
    %112 = arith.addf %111, %71 : vector<2x64xf32>
    %113 = arith.mulf %108, %112 : vector<2x64xf32>
    %114 = arith.addf %110, %113 : vector<2x64xf32>
    %115 = math.tanh %114 : vector<2x64xf32>
    %116 = arith.subf %93, %115 : vector<2x64xf32>
    %117 = arith.mulf %109, %116 : vector<2x64xf32>
    %118 = arith.addf %115, %117 : vector<2x64xf32>
    %119 = vector.extract_strided_slice %118 {offsets = [0, 0], sizes = [2, 32], strides = [1, 1]} : vector<2x64xf32> to vector<2x32xf32>
    %c2_64 = arith.constant 2 : index
    %c0_65 = arith.constant 0 : index
    %120 = vector.load %arg13[%c2_64, %c0_65] : memref<16x64xf32, #tpu.memory_space<vmem>>, vector<2x32xf32>
    tpu.vector_store %arg13[%c2_64, %c0_65], %119 {strides = array<i32>} : memref<16x64xf32, #tpu.memory_space<vmem>>, vector<2x32xf32>,
    %121 = vector.extract_strided_slice %118 {offsets = [0, 32], sizes = [2, 32], strides = [1, 1]} : vector<2x64xf32> to vector<2x32xf32>
    %c12_66 = arith.constant 12 : index
    %c32_67 = arith.constant 32 : index
    %122 = vector.load %arg13[%c12_66, %c32_67] : memref<16x64xf32, #tpu.memory_space<vmem>>, vector<2x32xf32>
    tpu.vector_store %arg13[%c12_66, %c32_67], %121 {strides = array<i32>} : memref<16x64xf32, #tpu.memory_space<vmem>>, vector<2x32xf32>,
    %c4_68 = arith.constant 4 : index
    %c0_69 = arith.constant 0 : index
    %123 = vector.load %arg12[%c4_68, %c0_69] : memref<16x192xf32, #tpu.memory_space<vmem>>, vector<2x192xf32>
    %cst_70 = arith.constant dense<0.000000e+00> : vector<2x192xf32>
    %124 = tpu.matmul %118, %1, %cst_70 {dimension_numbers = #tpu.dot_dimension_numbers<[1], [0], [0], [1], [0, 0, 1, 1], [], []>} : vector<2x64xf32>, vector<64x192xf32>, vector<2x192xf32> -> vector<2x192xf32>
    %125 = vector.extract_strided_slice %123 {offsets = [0, 0], sizes = [2, 128], strides = [1, 1]} : vector<2x192xf32> to vector<2x128xf32>
    %126 = vector.extract_strided_slice %124 {offsets = [0, 0], sizes = [2, 128], strides = [1, 1]} : vector<2x192xf32> to vector<2x128xf32>
    %127 = arith.addf %125, %126 : vector<2x128xf32>
    %128 = arith.negf %127 : vector<2x128xf32>
    %129 = math.exp %128 : vector<2x128xf32>
    %cst_71 = arith.constant 1.000000e+00 : f32
    %130 = vector.broadcast %cst_71 : f32 to vector<2x128xf32>
    %131 = arith.addf %130, %129 : vector<2x128xf32>
    %132 = arith.divf %130, %131 : vector<2x128xf32>
    %133 = vector.extract_strided_slice %132 {offsets = [0, 0], sizes = [2, 64], strides = [1, 1]} : vector<2x128xf32> to vector<2x64xf32>
    %134 = vector.extract_strided_slice %132 {offsets = [0, 64], sizes = [2, 64], strides = [1, 1]} : vector<2x128xf32> to vector<2x64xf32>
    %135 = vector.extract_strided_slice %123 {offsets = [0, 128], sizes = [2, 64], strides = [1, 1]} : vector<2x192xf32> to vector<2x64xf32>
    %136 = vector.extract_strided_slice %124 {offsets = [0, 128], sizes = [2, 64], strides = [1, 1]} : vector<2x192xf32> to vector<2x64xf32>
    %137 = arith.addf %136, %71 : vector<2x64xf32>
    %138 = arith.mulf %133, %137 : vector<2x64xf32>
    %139 = arith.addf %135, %138 : vector<2x64xf32>
    %140 = math.tanh %139 : vector<2x64xf32>
    %141 = arith.subf %118, %140 : vector<2x64xf32>
    %142 = arith.mulf %134, %141 : vector<2x64xf32>
    %143 = arith.addf %140, %142 : vector<2x64xf32>
    %144 = vector.extract_strided_slice %143 {offsets = [0, 0], sizes = [2, 32], strides = [1, 1]} : vector<2x64xf32> to vector<2x32xf32>
    %c4_72 = arith.constant 4 : index
    %c0_73 = arith.constant 0 : index
    %145 = vector.load %arg13[%c4_72, %c0_73] : memref<16x64xf32, #tpu.memory_space<vmem>>, vector<2x32xf32>
    tpu.vector_store %arg13[%c4_72, %c0_73], %144 {strides = array<i32>} : memref<16x64xf32, #tpu.memory_space<vmem>>, vector<2x32xf32>,
    %146 = vector.extract_strided_slice %143 {offsets = [0, 32], sizes = [2, 32], strides = [1, 1]} : vector<2x64xf32> to vector<2x32xf32>
    %c10_74 = arith.constant 10 : index
    %c32_75 = arith.constant 32 : index
    %147 = vector.load %arg13[%c10_74, %c32_75] : memref<16x64xf32, #tpu.memory_space<vmem>>, vector<2x32xf32>
    tpu.vector_store %arg13[%c10_74, %c32_75], %146 {strides = array<i32>} : memref<16x64xf32, #tpu.memory_space<vmem>>, vector<2x32xf32>,
    %c6_76 = arith.constant 6 : index
    %c0_77 = arith.constant 0 : index
    %148 = vector.load %arg12[%c6_76, %c0_77] : memref<16x192xf32, #tpu.memory_space<vmem>>, vector<2x192xf32>
    %cst_78 = arith.constant dense<0.000000e+00> : vector<2x192xf32>
    %149 = tpu.matmul %143, %1, %cst_78 {dimension_numbers = #tpu.dot_dimension_numbers<[1], [0], [0], [1], [0, 0, 1, 1], [], []>} : vector<2x64xf32>, vector<64x192xf32>, vector<2x192xf32> -> vector<2x192xf32>
    %150 = vector.extract_strided_slice %148 {offsets = [0, 0], sizes = [2, 128], strides = [1, 1]} : vector<2x192xf32> to vector<2x128xf32>
    %151 = vector.extract_strided_slice %149 {offsets = [0, 0], sizes = [2, 128], strides = [1, 1]} : vector<2x192xf32> to vector<2x128xf32>
    %152 = arith.addf %150, %151 : vector<2x128xf32>
    %153 = arith.negf %152 : vector<2x128xf32>
    %154 = math.exp %153 : vector<2x128xf32>
    %cst_79 = arith.constant 1.000000e+00 : f32
    %155 = vector.broadcast %cst_79 : f32 to vector<2x128xf32>
    %156 = arith.addf %155, %154 : vector<2x128xf32>
    %157 = arith.divf %155, %156 : vector<2x128xf32>
    %158 = vector.extract_strided_slice %157 {offsets = [0, 0], sizes = [2, 64], strides = [1, 1]} : vector<2x128xf32> to vector<2x64xf32>
    %159 = vector.extract_strided_slice %157 {offsets = [0, 64], sizes = [2, 64], strides = [1, 1]} : vector<2x128xf32> to vector<2x64xf32>
    %160 = vector.extract_strided_slice %148 {offsets = [0, 128], sizes = [2, 64], strides = [1, 1]} : vector<2x192xf32> to vector<2x64xf32>
    %161 = vector.extract_strided_slice %149 {offsets = [0, 128], sizes = [2, 64], strides = [1, 1]} : vector<2x192xf32> to vector<2x64xf32>
    %162 = arith.addf %161, %71 : vector<2x64xf32>
    %163 = arith.mulf %158, %162 : vector<2x64xf32>
    %164 = arith.addf %160, %163 : vector<2x64xf32>
    %165 = math.tanh %164 : vector<2x64xf32>
    %166 = arith.subf %143, %165 : vector<2x64xf32>
    %167 = arith.mulf %159, %166 : vector<2x64xf32>
    %168 = arith.addf %165, %167 : vector<2x64xf32>
    %169 = vector.extract_strided_slice %168 {offsets = [0, 0], sizes = [2, 32], strides = [1, 1]} : vector<2x64xf32> to vector<2x32xf32>
    %c6_80 = arith.constant 6 : index
    %c0_81 = arith.constant 0 : index
    %170 = vector.load %arg13[%c6_80, %c0_81] : memref<16x64xf32, #tpu.memory_space<vmem>>, vector<2x32xf32>
    tpu.vector_store %arg13[%c6_80, %c0_81], %169 {strides = array<i32>} : memref<16x64xf32, #tpu.memory_space<vmem>>, vector<2x32xf32>,
    %171 = vector.extract_strided_slice %168 {offsets = [0, 32], sizes = [2, 32], strides = [1, 1]} : vector<2x64xf32> to vector<2x32xf32>
    %c8_82 = arith.constant 8 : index
    %c32_83 = arith.constant 32 : index
    %172 = vector.load %arg13[%c8_82, %c32_83] : memref<16x64xf32, #tpu.memory_space<vmem>>, vector<2x32xf32>
    tpu.vector_store %arg13[%c8_82, %c32_83], %171 {strides = array<i32>} : memref<16x64xf32, #tpu.memory_space<vmem>>, vector<2x32xf32>,
    %c8_84 = arith.constant 8 : index
    %c0_85 = arith.constant 0 : index
    %173 = vector.load %arg12[%c8_84, %c0_85] : memref<16x192xf32, #tpu.memory_space<vmem>>, vector<2x192xf32>
    %cst_86 = arith.constant dense<0.000000e+00> : vector<2x192xf32>
    %174 = tpu.matmul %168, %1, %cst_86 {dimension_numbers = #tpu.dot_dimension_numbers<[1], [0], [0], [1], [0, 0, 1, 1], [], []>} : vector<2x64xf32>, vector<64x192xf32>, vector<2x192xf32> -> vector<2x192xf32>
    %175 = vector.extract_strided_slice %173 {offsets = [0, 0], sizes = [2, 128], strides = [1, 1]} : vector<2x192xf32> to vector<2x128xf32>
    %176 = vector.extract_strided_slice %174 {offsets = [0, 0], sizes = [2, 128], strides = [1, 1]} : vector<2x192xf32> to vector<2x128xf32>
    %177 = arith.addf %175, %176 : vector<2x128xf32>
    %178 = arith.negf %177 : vector<2x128xf32>
    %179 = math.exp %178 : vector<2x128xf32>
    %cst_87 = arith.constant 1.000000e+00 : f32
    %180 = vector.broadcast %cst_87 : f32 to vector<2x128xf32>
    %181 = arith.addf %180, %179 : vector<2x128xf32>
    %182 = arith.divf %180, %181 : vector<2x128xf32>
    %183 = vector.extract_strided_slice %182 {offsets = [0, 0], sizes = [2, 64], strides = [1, 1]} : vector<2x128xf32> to vector<2x64xf32>
    %184 = vector.extract_strided_slice %182 {offsets = [0, 64], sizes = [2, 64], strides = [1, 1]} : vector<2x128xf32> to vector<2x64xf32>
    %185 = vector.extract_strided_slice %173 {offsets = [0, 128], sizes = [2, 64], strides = [1, 1]} : vector<2x192xf32> to vector<2x64xf32>
    %186 = vector.extract_strided_slice %174 {offsets = [0, 128], sizes = [2, 64], strides = [1, 1]} : vector<2x192xf32> to vector<2x64xf32>
    %187 = arith.addf %186, %71 : vector<2x64xf32>
    %188 = arith.mulf %183, %187 : vector<2x64xf32>
    %189 = arith.addf %185, %188 : vector<2x64xf32>
    %190 = math.tanh %189 : vector<2x64xf32>
    %191 = arith.subf %168, %190 : vector<2x64xf32>
    %192 = arith.mulf %184, %191 : vector<2x64xf32>
    %193 = arith.addf %190, %192 : vector<2x64xf32>
    %194 = vector.extract_strided_slice %193 {offsets = [0, 0], sizes = [2, 32], strides = [1, 1]} : vector<2x64xf32> to vector<2x32xf32>
    %c8_88 = arith.constant 8 : index
    %c0_89 = arith.constant 0 : index
    %195 = vector.load %arg13[%c8_88, %c0_89] : memref<16x64xf32, #tpu.memory_space<vmem>>, vector<2x32xf32>
    tpu.vector_store %arg13[%c8_88, %c0_89], %194 {strides = array<i32>} : memref<16x64xf32, #tpu.memory_space<vmem>>, vector<2x32xf32>,
    %196 = vector.extract_strided_slice %193 {offsets = [0, 32], sizes = [2, 32], strides = [1, 1]} : vector<2x64xf32> to vector<2x32xf32>
    %c6_90 = arith.constant 6 : index
    %c32_91 = arith.constant 32 : index
    %197 = vector.load %arg13[%c6_90, %c32_91] : memref<16x64xf32, #tpu.memory_space<vmem>>, vector<2x32xf32>
    tpu.vector_store %arg13[%c6_90, %c32_91], %196 {strides = array<i32>} : memref<16x64xf32, #tpu.memory_space<vmem>>, vector<2x32xf32>,
    %c10_92 = arith.constant 10 : index
    %c0_93 = arith.constant 0 : index
    %198 = vector.load %arg12[%c10_92, %c0_93] : memref<16x192xf32, #tpu.memory_space<vmem>>, vector<2x192xf32>
    %cst_94 = arith.constant dense<0.000000e+00> : vector<2x192xf32>
    %199 = tpu.matmul %193, %1, %cst_94 {dimension_numbers = #tpu.dot_dimension_numbers<[1], [0], [0], [1], [0, 0, 1, 1], [], []>} : vector<2x64xf32>, vector<64x192xf32>, vector<2x192xf32> -> vector<2x192xf32>
    %200 = vector.extract_strided_slice %198 {offsets = [0, 0], sizes = [2, 128], strides = [1, 1]} : vector<2x192xf32> to vector<2x128xf32>
    %201 = vector.extract_strided_slice %199 {offsets = [0, 0], sizes = [2, 128], strides = [1, 1]} : vector<2x192xf32> to vector<2x128xf32>
    %202 = arith.addf %200, %201 : vector<2x128xf32>
    %203 = arith.negf %202 : vector<2x128xf32>
    %204 = math.exp %203 : vector<2x128xf32>
    %cst_95 = arith.constant 1.000000e+00 : f32
    %205 = vector.broadcast %cst_95 : f32 to vector<2x128xf32>
    %206 = arith.addf %205, %204 : vector<2x128xf32>
    %207 = arith.divf %205, %206 : vector<2x128xf32>
    %208 = vector.extract_strided_slice %207 {offsets = [0, 0], sizes = [2, 64], strides = [1, 1]} : vector<2x128xf32> to vector<2x64xf32>
    %209 = vector.extract_strided_slice %207 {offsets = [0, 64], sizes = [2, 64], strides = [1, 1]} : vector<2x128xf32> to vector<2x64xf32>
    %210 = vector.extract_strided_slice %198 {offsets = [0, 128], sizes = [2, 64], strides = [1, 1]} : vector<2x192xf32> to vector<2x64xf32>
    %211 = vector.extract_strided_slice %199 {offsets = [0, 128], sizes = [2, 64], strides = [1, 1]} : vector<2x192xf32> to vector<2x64xf32>
    %212 = arith.addf %211, %71 : vector<2x64xf32>
    %213 = arith.mulf %208, %212 : vector<2x64xf32>
    %214 = arith.addf %210, %213 : vector<2x64xf32>
    %215 = math.tanh %214 : vector<2x64xf32>
    %216 = arith.subf %193, %215 : vector<2x64xf32>
    %217 = arith.mulf %209, %216 : vector<2x64xf32>
    %218 = arith.addf %215, %217 : vector<2x64xf32>
    %219 = vector.extract_strided_slice %218 {offsets = [0, 0], sizes = [2, 32], strides = [1, 1]} : vector<2x64xf32> to vector<2x32xf32>
    %c10_96 = arith.constant 10 : index
    %c0_97 = arith.constant 0 : index
    %220 = vector.load %arg13[%c10_96, %c0_97] : memref<16x64xf32, #tpu.memory_space<vmem>>, vector<2x32xf32>
    tpu.vector_store %arg13[%c10_96, %c0_97], %219 {strides = array<i32>} : memref<16x64xf32, #tpu.memory_space<vmem>>, vector<2x32xf32>,
    %221 = vector.extract_strided_slice %218 {offsets = [0, 32], sizes = [2, 32], strides = [1, 1]} : vector<2x64xf32> to vector<2x32xf32>
    %c4_98 = arith.constant 4 : index
    %c32_99 = arith.constant 32 : index
    %222 = vector.load %arg13[%c4_98, %c32_99] : memref<16x64xf32, #tpu.memory_space<vmem>>, vector<2x32xf32>
    tpu.vector_store %arg13[%c4_98, %c32_99], %221 {strides = array<i32>} : memref<16x64xf32, #tpu.memory_space<vmem>>, vector<2x32xf32>,
    %c12_100 = arith.constant 12 : index
    %c0_101 = arith.constant 0 : index
    %223 = vector.load %arg12[%c12_100, %c0_101] : memref<16x192xf32, #tpu.memory_space<vmem>>, vector<2x192xf32>
    %cst_102 = arith.constant dense<0.000000e+00> : vector<2x192xf32>
    %224 = tpu.matmul %218, %1, %cst_102 {dimension_numbers = #tpu.dot_dimension_numbers<[1], [0], [0], [1], [0, 0, 1, 1], [], []>} : vector<2x64xf32>, vector<64x192xf32>, vector<2x192xf32> -> vector<2x192xf32>
    %225 = vector.extract_strided_slice %223 {offsets = [0, 0], sizes = [2, 128], strides = [1, 1]} : vector<2x192xf32> to vector<2x128xf32>
    %226 = vector.extract_strided_slice %224 {offsets = [0, 0], sizes = [2, 128], strides = [1, 1]} : vector<2x192xf32> to vector<2x128xf32>
    %227 = arith.addf %225, %226 : vector<2x128xf32>
    %228 = arith.negf %227 : vector<2x128xf32>
    %229 = math.exp %228 : vector<2x128xf32>
    %cst_103 = arith.constant 1.000000e+00 : f32
    %230 = vector.broadcast %cst_103 : f32 to vector<2x128xf32>
    %231 = arith.addf %230, %229 : vector<2x128xf32>
    %232 = arith.divf %230, %231 : vector<2x128xf32>
    %233 = vector.extract_strided_slice %232 {offsets = [0, 0], sizes = [2, 64], strides = [1, 1]} : vector<2x128xf32> to vector<2x64xf32>
    %234 = vector.extract_strided_slice %232 {offsets = [0, 64], sizes = [2, 64], strides = [1, 1]} : vector<2x128xf32> to vector<2x64xf32>
    %235 = vector.extract_strided_slice %223 {offsets = [0, 128], sizes = [2, 64], strides = [1, 1]} : vector<2x192xf32> to vector<2x64xf32>
    %236 = vector.extract_strided_slice %224 {offsets = [0, 128], sizes = [2, 64], strides = [1, 1]} : vector<2x192xf32> to vector<2x64xf32>
    %237 = arith.addf %236, %71 : vector<2x64xf32>
    %238 = arith.mulf %233, %237 : vector<2x64xf32>
    %239 = arith.addf %235, %238 : vector<2x64xf32>
    %240 = math.tanh %239 : vector<2x64xf32>
    %241 = arith.subf %218, %240 : vector<2x64xf32>
    %242 = arith.mulf %234, %241 : vector<2x64xf32>
    %243 = arith.addf %240, %242 : vector<2x64xf32>
    %244 = vector.extract_strided_slice %243 {offsets = [0, 0], sizes = [2, 32], strides = [1, 1]} : vector<2x64xf32> to vector<2x32xf32>
    %c12_104 = arith.constant 12 : index
    %c0_105 = arith.constant 0 : index
    %245 = vector.load %arg13[%c12_104, %c0_105] : memref<16x64xf32, #tpu.memory_space<vmem>>, vector<2x32xf32>
    tpu.vector_store %arg13[%c12_104, %c0_105], %244 {strides = array<i32>} : memref<16x64xf32, #tpu.memory_space<vmem>>, vector<2x32xf32>,
    %246 = vector.extract_strided_slice %243 {offsets = [0, 32], sizes = [2, 32], strides = [1, 1]} : vector<2x64xf32> to vector<2x32xf32>
    %c2_106 = arith.constant 2 : index
    %c32_107 = arith.constant 32 : index
    %247 = vector.load %arg13[%c2_106, %c32_107] : memref<16x64xf32, #tpu.memory_space<vmem>>, vector<2x32xf32>
    tpu.vector_store %arg13[%c2_106, %c32_107], %246 {strides = array<i32>} : memref<16x64xf32, #tpu.memory_space<vmem>>, vector<2x32xf32>,
    %c14_108 = arith.constant 14 : index
    %c0_109 = arith.constant 0 : index
    %248 = vector.load %arg12[%c14_108, %c0_109] : memref<16x192xf32, #tpu.memory_space<vmem>>, vector<2x192xf32>
    %cst_110 = arith.constant dense<0.000000e+00> : vector<2x192xf32>
    %249 = tpu.matmul %243, %1, %cst_110 {dimension_numbers = #tpu.dot_dimension_numbers<[1], [0], [0], [1], [0, 0, 1, 1], [], []>} : vector<2x64xf32>, vector<64x192xf32>, vector<2x192xf32> -> vector<2x192xf32>
    %250 = vector.extract_strided_slice %248 {offsets = [0, 0], sizes = [2, 128], strides = [1, 1]} : vector<2x192xf32> to vector<2x128xf32>
    %251 = vector.extract_strided_slice %249 {offsets = [0, 0], sizes = [2, 128], strides = [1, 1]} : vector<2x192xf32> to vector<2x128xf32>
    %252 = arith.addf %250, %251 : vector<2x128xf32>
    %253 = arith.negf %252 : vector<2x128xf32>
    %254 = math.exp %253 : vector<2x128xf32>
    %cst_111 = arith.constant 1.000000e+00 : f32
    %255 = vector.broadcast %cst_111 : f32 to vector<2x128xf32>
    %256 = arith.addf %255, %254 : vector<2x128xf32>
    %257 = arith.divf %255, %256 : vector<2x128xf32>
    %258 = vector.extract_strided_slice %257 {offsets = [0, 0], sizes = [2, 64], strides = [1, 1]} : vector<2x128xf32> to vector<2x64xf32>
    %259 = vector.extract_strided_slice %257 {offsets = [0, 64], sizes = [2, 64], strides = [1, 1]} : vector<2x128xf32> to vector<2x64xf32>
    %260 = vector.extract_strided_slice %248 {offsets = [0, 128], sizes = [2, 64], strides = [1, 1]} : vector<2x192xf32> to vector<2x64xf32>
    %261 = vector.extract_strided_slice %249 {offsets = [0, 128], sizes = [2, 64], strides = [1, 1]} : vector<2x192xf32> to vector<2x64xf32>
    %262 = arith.addf %261, %71 : vector<2x64xf32>
    %263 = arith.mulf %258, %262 : vector<2x64xf32>
    %264 = arith.addf %260, %263 : vector<2x64xf32>
    %265 = math.tanh %264 : vector<2x64xf32>
    %266 = arith.subf %243, %265 : vector<2x64xf32>
    %267 = arith.mulf %259, %266 : vector<2x64xf32>
    %268 = arith.addf %265, %267 : vector<2x64xf32>
    %269 = vector.extract_strided_slice %268 {offsets = [0, 0], sizes = [2, 32], strides = [1, 1]} : vector<2x64xf32> to vector<2x32xf32>
    %c14_112 = arith.constant 14 : index
    %c0_113 = arith.constant 0 : index
    %270 = vector.load %arg13[%c14_112, %c0_113] : memref<16x64xf32, #tpu.memory_space<vmem>>, vector<2x32xf32>
    tpu.vector_store %arg13[%c14_112, %c0_113], %269 {strides = array<i32>} : memref<16x64xf32, #tpu.memory_space<vmem>>, vector<2x32xf32>,
    %271 = vector.extract_strided_slice %268 {offsets = [0, 32], sizes = [2, 32], strides = [1, 1]} : vector<2x64xf32> to vector<2x32xf32>
    %c0_114 = arith.constant 0 : index
    %c32_115 = arith.constant 32 : index
    %272 = vector.load %arg13[%c0_114, %c32_115] : memref<16x64xf32, #tpu.memory_space<vmem>>, vector<2x32xf32>
    tpu.vector_store %arg13[%c0_114, %c32_115], %271 {strides = array<i32>} : memref<16x64xf32, #tpu.memory_space<vmem>>, vector<2x32xf32>,
    %c0_116 = arith.constant 0 : index
    %c0_117 = arith.constant 0 : index
    %273 = vector.load %arg13[%c0_116, %c0_117] : memref<16x64xf32, #tpu.memory_space<vmem>>, vector<16x64xf32>
    %c0_118 = arith.constant 0 : index
    %c0_119 = arith.constant 0 : index
    %274 = vector.load %arg6[%c0_118, %c0_119] : memref<64x192xf32, #tpu.memory_space<vmem>>, vector<64x192xf32>
    %c0_120 = arith.constant 0 : index
    %c0_121 = arith.constant 0 : index
    %275 = vector.load %arg5[%c0_120, %c0_121] : memref<64x192xf32, #tpu.memory_space<vmem>>, vector<64x192xf32>
    %cst_122 = arith.constant dense<0.000000e+00> : vector<16x192xf32>
    %276 = tpu.matmul %273, %275, %cst_122 {dimension_numbers = #tpu.dot_dimension_numbers<[1], [0], [0], [1], [0, 0, 1, 1], [], []>} : vector<16x64xf32>, vector<64x192xf32>, vector<16x192xf32> -> vector<16x192xf32>
    %c0_123 = arith.constant 0 : index
    %c0_124 = arith.constant 0 : index
    %277 = vector.load %arg7[%c0_123, %c0_124] : memref<1x192xf32, #tpu.memory_space<vmem>>, vector<1x192xf32>
    %278 = vector.broadcast %277 : vector<1x192xf32> to vector<16x192xf32>
    %279 = arith.addf %276, %278 : vector<16x192xf32>
    %280 = vector.extract_strided_slice %279 {offsets = [0, 0], sizes = [16, 32], strides = [1, 1]} : vector<16x192xf32> to vector<16x32xf32>
    %c0_125 = arith.constant 0 : index
    %c0_126 = arith.constant 0 : index
    %281 = vector.load %arg12[%c0_125, %c0_126] : memref<16x192xf32, #tpu.memory_space<vmem>>, vector<16x32xf32>
    tpu.vector_store %arg12[%c0_125, %c0_126], %280 {strides = array<i32>} : memref<16x192xf32, #tpu.memory_space<vmem>>, vector<16x32xf32>,
    %282 = vector.extract_strided_slice %279 {offsets = [0, 32], sizes = [16, 32], strides = [1, 1]} : vector<16x192xf32> to vector<16x32xf32>
    %c0_127 = arith.constant 0 : index
    %c64_128 = arith.constant 64 : index
    %283 = vector.load %arg12[%c0_127, %c64_128] : memref<16x192xf32, #tpu.memory_space<vmem>>, vector<16x32xf32>
    tpu.vector_store %arg12[%c0_127, %c64_128], %282 {strides = array<i32>} : memref<16x192xf32, #tpu.memory_space<vmem>>, vector<16x32xf32>,
    %284 = vector.extract_strided_slice %279 {offsets = [0, 64], sizes = [16, 32], strides = [1, 1]} : vector<16x192xf32> to vector<16x32xf32>
    %c0_129 = arith.constant 0 : index
    %c128_130 = arith.constant 128 : index
    %285 = vector.load %arg12[%c0_129, %c128_130] : memref<16x192xf32, #tpu.memory_space<vmem>>, vector<16x32xf32>
    tpu.vector_store %arg12[%c0_129, %c128_130], %284 {strides = array<i32>} : memref<16x192xf32, #tpu.memory_space<vmem>>, vector<16x32xf32>,
    %286 = vector.extract_strided_slice %279 {offsets = [14, 0], sizes = [2, 192], strides = [1, 1]} : vector<16x192xf32> to vector<2x192xf32>
    %287 = vector.extract_strided_slice %286 {offsets = [0, 96], sizes = [2, 32], strides = [1, 1]} : vector<2x192xf32> to vector<2x32xf32>
    %c0_131 = arith.constant 0 : index
    %c32_132 = arith.constant 32 : index
    %288 = vector.load %arg12[%c0_131, %c32_132] : memref<16x192xf32, #tpu.memory_space<vmem>>, vector<2x32xf32>
    tpu.vector_store %arg12[%c0_131, %c32_132], %287 {strides = array<i32>} : memref<16x192xf32, #tpu.memory_space<vmem>>, vector<2x32xf32>,
    %289 = vector.extract_strided_slice %286 {offsets = [0, 128], sizes = [2, 32], strides = [1, 1]} : vector<2x192xf32> to vector<2x32xf32>
    %c0_133 = arith.constant 0 : index
    %c96_134 = arith.constant 96 : index
    %290 = vector.load %arg12[%c0_133, %c96_134] : memref<16x192xf32, #tpu.memory_space<vmem>>, vector<2x32xf32>
    tpu.vector_store %arg12[%c0_133, %c96_134], %289 {strides = array<i32>} : memref<16x192xf32, #tpu.memory_space<vmem>>, vector<2x32xf32>,
    %291 = vector.extract_strided_slice %286 {offsets = [0, 160], sizes = [2, 32], strides = [1, 1]} : vector<2x192xf32> to vector<2x32xf32>
    %c0_135 = arith.constant 0 : index
    %c160_136 = arith.constant 160 : index
    %292 = vector.load %arg12[%c0_135, %c160_136] : memref<16x192xf32, #tpu.memory_space<vmem>>, vector<2x32xf32>
    tpu.vector_store %arg12[%c0_135, %c160_136], %291 {strides = array<i32>} : memref<16x192xf32, #tpu.memory_space<vmem>>, vector<2x32xf32>,
    %293 = vector.extract_strided_slice %279 {offsets = [12, 0], sizes = [2, 192], strides = [1, 1]} : vector<16x192xf32> to vector<2x192xf32>
    %294 = vector.extract_strided_slice %293 {offsets = [0, 96], sizes = [2, 32], strides = [1, 1]} : vector<2x192xf32> to vector<2x32xf32>
    %c2_137 = arith.constant 2 : index
    %c32_138 = arith.constant 32 : index
    %295 = vector.load %arg12[%c2_137, %c32_138] : memref<16x192xf32, #tpu.memory_space<vmem>>, vector<2x32xf32>
    tpu.vector_store %arg12[%c2_137, %c32_138], %294 {strides = array<i32>} : memref<16x192xf32, #tpu.memory_space<vmem>>, vector<2x32xf32>,
    %296 = vector.extract_strided_slice %293 {offsets = [0, 128], sizes = [2, 32], strides = [1, 1]} : vector<2x192xf32> to vector<2x32xf32>
    %c2_139 = arith.constant 2 : index
    %c96_140 = arith.constant 96 : index
    %297 = vector.load %arg12[%c2_139, %c96_140] : memref<16x192xf32, #tpu.memory_space<vmem>>, vector<2x32xf32>
    tpu.vector_store %arg12[%c2_139, %c96_140], %296 {strides = array<i32>} : memref<16x192xf32, #tpu.memory_space<vmem>>, vector<2x32xf32>,
    %298 = vector.extract_strided_slice %293 {offsets = [0, 160], sizes = [2, 32], strides = [1, 1]} : vector<2x192xf32> to vector<2x32xf32>
    %c2_141 = arith.constant 2 : index
    %c160_142 = arith.constant 160 : index
    %299 = vector.load %arg12[%c2_141, %c160_142] : memref<16x192xf32, #tpu.memory_space<vmem>>, vector<2x32xf32>
    tpu.vector_store %arg12[%c2_141, %c160_142], %298 {strides = array<i32>} : memref<16x192xf32, #tpu.memory_space<vmem>>, vector<2x32xf32>,
    %300 = vector.extract_strided_slice %279 {offsets = [10, 0], sizes = [2, 192], strides = [1, 1]} : vector<16x192xf32> to vector<2x192xf32>
    %301 = vector.extract_strided_slice %300 {offsets = [0, 96], sizes = [2, 32], strides = [1, 1]} : vector<2x192xf32> to vector<2x32xf32>
    %c4_143 = arith.constant 4 : index
    %c32_144 = arith.constant 32 : index
    %302 = vector.load %arg12[%c4_143, %c32_144] : memref<16x192xf32, #tpu.memory_space<vmem>>, vector<2x32xf32>
    tpu.vector_store %arg12[%c4_143, %c32_144], %301 {strides = array<i32>} : memref<16x192xf32, #tpu.memory_space<vmem>>, vector<2x32xf32>,
    %303 = vector.extract_strided_slice %300 {offsets = [0, 128], sizes = [2, 32], strides = [1, 1]} : vector<2x192xf32> to vector<2x32xf32>
    %c4_145 = arith.constant 4 : index
    %c96_146 = arith.constant 96 : index
    %304 = vector.load %arg12[%c4_145, %c96_146] : memref<16x192xf32, #tpu.memory_space<vmem>>, vector<2x32xf32>
    tpu.vector_store %arg12[%c4_145, %c96_146], %303 {strides = array<i32>} : memref<16x192xf32, #tpu.memory_space<vmem>>, vector<2x32xf32>,
    %305 = vector.extract_strided_slice %300 {offsets = [0, 160], sizes = [2, 32], strides = [1, 1]} : vector<2x192xf32> to vector<2x32xf32>
    %c4_147 = arith.constant 4 : index
    %c160_148 = arith.constant 160 : index
    %306 = vector.load %arg12[%c4_147, %c160_148] : memref<16x192xf32, #tpu.memory_space<vmem>>, vector<2x32xf32>
    tpu.vector_store %arg12[%c4_147, %c160_148], %305 {strides = array<i32>} : memref<16x192xf32, #tpu.memory_space<vmem>>, vector<2x32xf32>,
    %307 = vector.extract_strided_slice %279 {offsets = [8, 0], sizes = [2, 192], strides = [1, 1]} : vector<16x192xf32> to vector<2x192xf32>
    %308 = vector.extract_strided_slice %307 {offsets = [0, 96], sizes = [2, 32], strides = [1, 1]} : vector<2x192xf32> to vector<2x32xf32>
    %c6_149 = arith.constant 6 : index
    %c32_150 = arith.constant 32 : index
    %309 = vector.load %arg12[%c6_149, %c32_150] : memref<16x192xf32, #tpu.memory_space<vmem>>, vector<2x32xf32>
    tpu.vector_store %arg12[%c6_149, %c32_150], %308 {strides = array<i32>} : memref<16x192xf32, #tpu.memory_space<vmem>>, vector<2x32xf32>,
    %310 = vector.extract_strided_slice %307 {offsets = [0, 128], sizes = [2, 32], strides = [1, 1]} : vector<2x192xf32> to vector<2x32xf32>
    %c6_151 = arith.constant 6 : index
    %c96_152 = arith.constant 96 : index
    %311 = vector.load %arg12[%c6_151, %c96_152] : memref<16x192xf32, #tpu.memory_space<vmem>>, vector<2x32xf32>
    tpu.vector_store %arg12[%c6_151, %c96_152], %310 {strides = array<i32>} : memref<16x192xf32, #tpu.memory_space<vmem>>, vector<2x32xf32>,
    %312 = vector.extract_strided_slice %307 {offsets = [0, 160], sizes = [2, 32], strides = [1, 1]} : vector<2x192xf32> to vector<2x32xf32>
    %c6_153 = arith.constant 6 : index
    %c160_154 = arith.constant 160 : index
    %313 = vector.load %arg12[%c6_153, %c160_154] : memref<16x192xf32, #tpu.memory_space<vmem>>, vector<2x32xf32>
    tpu.vector_store %arg12[%c6_153, %c160_154], %312 {strides = array<i32>} : memref<16x192xf32, #tpu.memory_space<vmem>>, vector<2x32xf32>,
    %314 = vector.extract_strided_slice %279 {offsets = [6, 0], sizes = [2, 192], strides = [1, 1]} : vector<16x192xf32> to vector<2x192xf32>
    %315 = vector.extract_strided_slice %314 {offsets = [0, 96], sizes = [2, 32], strides = [1, 1]} : vector<2x192xf32> to vector<2x32xf32>
    %c8_155 = arith.constant 8 : index
    %c32_156 = arith.constant 32 : index
    %316 = vector.load %arg12[%c8_155, %c32_156] : memref<16x192xf32, #tpu.memory_space<vmem>>, vector<2x32xf32>
    tpu.vector_store %arg12[%c8_155, %c32_156], %315 {strides = array<i32>} : memref<16x192xf32, #tpu.memory_space<vmem>>, vector<2x32xf32>,
    %317 = vector.extract_strided_slice %314 {offsets = [0, 128], sizes = [2, 32], strides = [1, 1]} : vector<2x192xf32> to vector<2x32xf32>
    %c8_157 = arith.constant 8 : index
    %c96_158 = arith.constant 96 : index
    %318 = vector.load %arg12[%c8_157, %c96_158] : memref<16x192xf32, #tpu.memory_space<vmem>>, vector<2x32xf32>
    tpu.vector_store %arg12[%c8_157, %c96_158], %317 {strides = array<i32>} : memref<16x192xf32, #tpu.memory_space<vmem>>, vector<2x32xf32>,
    %319 = vector.extract_strided_slice %314 {offsets = [0, 160], sizes = [2, 32], strides = [1, 1]} : vector<2x192xf32> to vector<2x32xf32>
    %c8_159 = arith.constant 8 : index
    %c160_160 = arith.constant 160 : index
    %320 = vector.load %arg12[%c8_159, %c160_160] : memref<16x192xf32, #tpu.memory_space<vmem>>, vector<2x32xf32>
    tpu.vector_store %arg12[%c8_159, %c160_160], %319 {strides = array<i32>} : memref<16x192xf32, #tpu.memory_space<vmem>>, vector<2x32xf32>,
    %321 = vector.extract_strided_slice %279 {offsets = [4, 0], sizes = [2, 192], strides = [1, 1]} : vector<16x192xf32> to vector<2x192xf32>
    %322 = vector.extract_strided_slice %321 {offsets = [0, 96], sizes = [2, 32], strides = [1, 1]} : vector<2x192xf32> to vector<2x32xf32>
    %c10_161 = arith.constant 10 : index
    %c32_162 = arith.constant 32 : index
    %323 = vector.load %arg12[%c10_161, %c32_162] : memref<16x192xf32, #tpu.memory_space<vmem>>, vector<2x32xf32>
    tpu.vector_store %arg12[%c10_161, %c32_162], %322 {strides = array<i32>} : memref<16x192xf32, #tpu.memory_space<vmem>>, vector<2x32xf32>,
    %324 = vector.extract_strided_slice %321 {offsets = [0, 128], sizes = [2, 32], strides = [1, 1]} : vector<2x192xf32> to vector<2x32xf32>
    %c10_163 = arith.constant 10 : index
    %c96_164 = arith.constant 96 : index
    %325 = vector.load %arg12[%c10_163, %c96_164] : memref<16x192xf32, #tpu.memory_space<vmem>>, vector<2x32xf32>
    tpu.vector_store %arg12[%c10_163, %c96_164], %324 {strides = array<i32>} : memref<16x192xf32, #tpu.memory_space<vmem>>, vector<2x32xf32>,
    %326 = vector.extract_strided_slice %321 {offsets = [0, 160], sizes = [2, 32], strides = [1, 1]} : vector<2x192xf32> to vector<2x32xf32>
    %c10_165 = arith.constant 10 : index
    %c160_166 = arith.constant 160 : index
    %327 = vector.load %arg12[%c10_165, %c160_166] : memref<16x192xf32, #tpu.memory_space<vmem>>, vector<2x32xf32>
    tpu.vector_store %arg12[%c10_165, %c160_166], %326 {strides = array<i32>} : memref<16x192xf32, #tpu.memory_space<vmem>>, vector<2x32xf32>,
    %328 = vector.extract_strided_slice %279 {offsets = [2, 0], sizes = [2, 192], strides = [1, 1]} : vector<16x192xf32> to vector<2x192xf32>
    %329 = vector.extract_strided_slice %328 {offsets = [0, 96], sizes = [2, 32], strides = [1, 1]} : vector<2x192xf32> to vector<2x32xf32>
    %c12_167 = arith.constant 12 : index
    %c32_168 = arith.constant 32 : index
    %330 = vector.load %arg12[%c12_167, %c32_168] : memref<16x192xf32, #tpu.memory_space<vmem>>, vector<2x32xf32>
    tpu.vector_store %arg12[%c12_167, %c32_168], %329 {strides = array<i32>} : memref<16x192xf32, #tpu.memory_space<vmem>>, vector<2x32xf32>,
    %331 = vector.extract_strided_slice %328 {offsets = [0, 128], sizes = [2, 32], strides = [1, 1]} : vector<2x192xf32> to vector<2x32xf32>
    %c12_169 = arith.constant 12 : index
    %c96_170 = arith.constant 96 : index
    %332 = vector.load %arg12[%c12_169, %c96_170] : memref<16x192xf32, #tpu.memory_space<vmem>>, vector<2x32xf32>
    tpu.vector_store %arg12[%c12_169, %c96_170], %331 {strides = array<i32>} : memref<16x192xf32, #tpu.memory_space<vmem>>, vector<2x32xf32>,
    %333 = vector.extract_strided_slice %328 {offsets = [0, 160], sizes = [2, 32], strides = [1, 1]} : vector<2x192xf32> to vector<2x32xf32>
    %c12_171 = arith.constant 12 : index
    %c160_172 = arith.constant 160 : index
    %334 = vector.load %arg12[%c12_171, %c160_172] : memref<16x192xf32, #tpu.memory_space<vmem>>, vector<2x32xf32>
    tpu.vector_store %arg12[%c12_171, %c160_172], %333 {strides = array<i32>} : memref<16x192xf32, #tpu.memory_space<vmem>>, vector<2x32xf32>,
    %335 = vector.extract_strided_slice %279 {offsets = [0, 0], sizes = [2, 192], strides = [1, 1]} : vector<16x192xf32> to vector<2x192xf32>
    %336 = vector.extract_strided_slice %335 {offsets = [0, 96], sizes = [2, 32], strides = [1, 1]} : vector<2x192xf32> to vector<2x32xf32>
    %c14_173 = arith.constant 14 : index
    %c32_174 = arith.constant 32 : index
    %337 = vector.load %arg12[%c14_173, %c32_174] : memref<16x192xf32, #tpu.memory_space<vmem>>, vector<2x32xf32>
    tpu.vector_store %arg12[%c14_173, %c32_174], %336 {strides = array<i32>} : memref<16x192xf32, #tpu.memory_space<vmem>>, vector<2x32xf32>,
    %338 = vector.extract_strided_slice %335 {offsets = [0, 128], sizes = [2, 32], strides = [1, 1]} : vector<2x192xf32> to vector<2x32xf32>
    %c14_175 = arith.constant 14 : index
    %c96_176 = arith.constant 96 : index
    %339 = vector.load %arg12[%c14_175, %c96_176] : memref<16x192xf32, #tpu.memory_space<vmem>>, vector<2x32xf32>
    tpu.vector_store %arg12[%c14_175, %c96_176], %338 {strides = array<i32>} : memref<16x192xf32, #tpu.memory_space<vmem>>, vector<2x32xf32>,
    %340 = vector.extract_strided_slice %335 {offsets = [0, 160], sizes = [2, 32], strides = [1, 1]} : vector<2x192xf32> to vector<2x32xf32>
    %c14_177 = arith.constant 14 : index
    %c160_178 = arith.constant 160 : index
    %341 = vector.load %arg12[%c14_177, %c160_178] : memref<16x192xf32, #tpu.memory_space<vmem>>, vector<2x32xf32>
    tpu.vector_store %arg12[%c14_177, %c160_178], %340 {strides = array<i32>} : memref<16x192xf32, #tpu.memory_space<vmem>>, vector<2x32xf32>,
    %c0_179 = arith.constant 0 : index
    %c0_180 = arith.constant 0 : index
    %342 = vector.load %arg8[%c0_179, %c0_180] : memref<1x64xf32, #tpu.memory_space<vmem>>, vector<1x64xf32>
    %343 = vector.shape_cast %342 : vector<1x64xf32> to vector<1x64xf32>
    %344 = vector.broadcast %343 : vector<1x64xf32> to vector<2x64xf32>
    %cst_181 = arith.constant 0.000000e+00 : f32
    %345 = vector.broadcast %cst_181 : f32 to vector<2x64xf32>
    %c0_182 = arith.constant 0 : index
    %c0_183 = arith.constant 0 : index
    %346 = vector.load %arg12[%c0_182, %c0_183] : memref<16x192xf32, #tpu.memory_space<vmem>>, vector<2x192xf32>
    %cst_184 = arith.constant dense<0.000000e+00> : vector<2x192xf32>
    %347 = tpu.matmul %345, %274, %cst_184 {dimension_numbers = #tpu.dot_dimension_numbers<[1], [0], [0], [1], [0, 0, 1, 1], [], []>} : vector<2x64xf32>, vector<64x192xf32>, vector<2x192xf32> -> vector<2x192xf32>
    %348 = vector.extract_strided_slice %346 {offsets = [0, 0], sizes = [2, 128], strides = [1, 1]} : vector<2x192xf32> to vector<2x128xf32>
    %349 = vector.extract_strided_slice %347 {offsets = [0, 0], sizes = [2, 128], strides = [1, 1]} : vector<2x192xf32> to vector<2x128xf32>
    %350 = arith.addf %348, %349 : vector<2x128xf32>
    %351 = arith.negf %350 : vector<2x128xf32>
    %352 = math.exp %351 : vector<2x128xf32>
    %cst_185 = arith.constant 1.000000e+00 : f32
    %353 = vector.broadcast %cst_185 : f32 to vector<2x128xf32>
    %354 = arith.addf %353, %352 : vector<2x128xf32>
    %355 = arith.divf %353, %354 : vector<2x128xf32>
    %356 = vector.extract_strided_slice %355 {offsets = [0, 0], sizes = [2, 64], strides = [1, 1]} : vector<2x128xf32> to vector<2x64xf32>
    %357 = vector.extract_strided_slice %355 {offsets = [0, 64], sizes = [2, 64], strides = [1, 1]} : vector<2x128xf32> to vector<2x64xf32>
    %358 = vector.extract_strided_slice %346 {offsets = [0, 128], sizes = [2, 64], strides = [1, 1]} : vector<2x192xf32> to vector<2x64xf32>
    %359 = vector.extract_strided_slice %347 {offsets = [0, 128], sizes = [2, 64], strides = [1, 1]} : vector<2x192xf32> to vector<2x64xf32>
    %360 = arith.addf %359, %344 : vector<2x64xf32>
    %361 = arith.mulf %356, %360 : vector<2x64xf32>
    %362 = arith.addf %358, %361 : vector<2x64xf32>
    %363 = math.tanh %362 : vector<2x64xf32>
    %364 = arith.subf %345, %363 : vector<2x64xf32>
    %365 = arith.mulf %357, %364 : vector<2x64xf32>
    %366 = arith.addf %363, %365 : vector<2x64xf32>
    %367 = vector.extract_strided_slice %366 {offsets = [0, 32], sizes = [2, 32], strides = [1, 1]} : vector<2x64xf32> to vector<2x32xf32>
    %c2_186 = arith.constant 2 : index
    %c0_187 = arith.constant 0 : index
    %368 = vector.load %arg12[%c2_186, %c0_187] : memref<16x192xf32, #tpu.memory_space<vmem>>, vector<2x192xf32>
    %cst_188 = arith.constant dense<0.000000e+00> : vector<2x192xf32>
    %369 = tpu.matmul %366, %274, %cst_188 {dimension_numbers = #tpu.dot_dimension_numbers<[1], [0], [0], [1], [0, 0, 1, 1], [], []>} : vector<2x64xf32>, vector<64x192xf32>, vector<2x192xf32> -> vector<2x192xf32>
    %370 = vector.extract_strided_slice %368 {offsets = [0, 0], sizes = [2, 128], strides = [1, 1]} : vector<2x192xf32> to vector<2x128xf32>
    %371 = vector.extract_strided_slice %369 {offsets = [0, 0], sizes = [2, 128], strides = [1, 1]} : vector<2x192xf32> to vector<2x128xf32>
    %372 = arith.addf %370, %371 : vector<2x128xf32>
    %373 = arith.negf %372 : vector<2x128xf32>
    %374 = math.exp %373 : vector<2x128xf32>
    %cst_189 = arith.constant 1.000000e+00 : f32
    %375 = vector.broadcast %cst_189 : f32 to vector<2x128xf32>
    %376 = arith.addf %375, %374 : vector<2x128xf32>
    %377 = arith.divf %375, %376 : vector<2x128xf32>
    %378 = vector.extract_strided_slice %377 {offsets = [0, 0], sizes = [2, 64], strides = [1, 1]} : vector<2x128xf32> to vector<2x64xf32>
    %379 = vector.extract_strided_slice %377 {offsets = [0, 64], sizes = [2, 64], strides = [1, 1]} : vector<2x128xf32> to vector<2x64xf32>
    %380 = vector.extract_strided_slice %368 {offsets = [0, 128], sizes = [2, 64], strides = [1, 1]} : vector<2x192xf32> to vector<2x64xf32>
    %381 = vector.extract_strided_slice %369 {offsets = [0, 128], sizes = [2, 64], strides = [1, 1]} : vector<2x192xf32> to vector<2x64xf32>
    %382 = arith.addf %381, %344 : vector<2x64xf32>
    %383 = arith.mulf %378, %382 : vector<2x64xf32>
    %384 = arith.addf %380, %383 : vector<2x64xf32>
    %385 = math.tanh %384 : vector<2x64xf32>
    %386 = arith.subf %366, %385 : vector<2x64xf32>
    %387 = arith.mulf %379, %386 : vector<2x64xf32>
    %388 = arith.addf %385, %387 : vector<2x64xf32>
    %c4_190 = arith.constant 4 : index
    %c0_191 = arith.constant 0 : index
    %389 = vector.load %arg12[%c4_190, %c0_191] : memref<16x192xf32, #tpu.memory_space<vmem>>, vector<2x192xf32>
    %cst_192 = arith.constant dense<0.000000e+00> : vector<2x192xf32>
    %390 = tpu.matmul %388, %274, %cst_192 {dimension_numbers = #tpu.dot_dimension_numbers<[1], [0], [0], [1], [0, 0, 1, 1], [], []>} : vector<2x64xf32>, vector<64x192xf32>, vector<2x192xf32> -> vector<2x192xf32>
    %391 = vector.extract_strided_slice %389 {offsets = [0, 0], sizes = [2, 128], strides = [1, 1]} : vector<2x192xf32> to vector<2x128xf32>
    %392 = vector.extract_strided_slice %390 {offsets = [0, 0], sizes = [2, 128], strides = [1, 1]} : vector<2x192xf32> to vector<2x128xf32>
    %393 = arith.addf %391, %392 : vector<2x128xf32>
    %394 = arith.negf %393 : vector<2x128xf32>
    %395 = math.exp %394 : vector<2x128xf32>
    %cst_193 = arith.constant 1.000000e+00 : f32
    %396 = vector.broadcast %cst_193 : f32 to vector<2x128xf32>
    %397 = arith.addf %396, %395 : vector<2x128xf32>
    %398 = arith.divf %396, %397 : vector<2x128xf32>
    %399 = vector.extract_strided_slice %398 {offsets = [0, 0], sizes = [2, 64], strides = [1, 1]} : vector<2x128xf32> to vector<2x64xf32>
    %400 = vector.extract_strided_slice %398 {offsets = [0, 64], sizes = [2, 64], strides = [1, 1]} : vector<2x128xf32> to vector<2x64xf32>
    %401 = vector.extract_strided_slice %389 {offsets = [0, 128], sizes = [2, 64], strides = [1, 1]} : vector<2x192xf32> to vector<2x64xf32>
    %402 = vector.extract_strided_slice %390 {offsets = [0, 128], sizes = [2, 64], strides = [1, 1]} : vector<2x192xf32> to vector<2x64xf32>
    %403 = arith.addf %402, %344 : vector<2x64xf32>
    %404 = arith.mulf %399, %403 : vector<2x64xf32>
    %405 = arith.addf %401, %404 : vector<2x64xf32>
    %406 = math.tanh %405 : vector<2x64xf32>
    %407 = arith.subf %388, %406 : vector<2x64xf32>
    %408 = arith.mulf %400, %407 : vector<2x64xf32>
    %409 = arith.addf %406, %408 : vector<2x64xf32>
    %c6_194 = arith.constant 6 : index
    %c0_195 = arith.constant 0 : index
    %410 = vector.load %arg12[%c6_194, %c0_195] : memref<16x192xf32, #tpu.memory_space<vmem>>, vector<2x192xf32>
    %cst_196 = arith.constant dense<0.000000e+00> : vector<2x192xf32>
    %411 = tpu.matmul %409, %274, %cst_196 {dimension_numbers = #tpu.dot_dimension_numbers<[1], [0], [0], [1], [0, 0, 1, 1], [], []>} : vector<2x64xf32>, vector<64x192xf32>, vector<2x192xf32> -> vector<2x192xf32>
    %412 = vector.extract_strided_slice %410 {offsets = [0, 0], sizes = [2, 128], strides = [1, 1]} : vector<2x192xf32> to vector<2x128xf32>
    %413 = vector.extract_strided_slice %411 {offsets = [0, 0], sizes = [2, 128], strides = [1, 1]} : vector<2x192xf32> to vector<2x128xf32>
    %414 = arith.addf %412, %413 : vector<2x128xf32>
    %415 = arith.negf %414 : vector<2x128xf32>
    %416 = math.exp %415 : vector<2x128xf32>
    %cst_197 = arith.constant 1.000000e+00 : f32
    %417 = vector.broadcast %cst_197 : f32 to vector<2x128xf32>
    %418 = arith.addf %417, %416 : vector<2x128xf32>
    %419 = arith.divf %417, %418 : vector<2x128xf32>
    %420 = vector.extract_strided_slice %419 {offsets = [0, 0], sizes = [2, 64], strides = [1, 1]} : vector<2x128xf32> to vector<2x64xf32>
    %421 = vector.extract_strided_slice %419 {offsets = [0, 64], sizes = [2, 64], strides = [1, 1]} : vector<2x128xf32> to vector<2x64xf32>
    %422 = vector.extract_strided_slice %410 {offsets = [0, 128], sizes = [2, 64], strides = [1, 1]} : vector<2x192xf32> to vector<2x64xf32>
    %423 = vector.extract_strided_slice %411 {offsets = [0, 128], sizes = [2, 64], strides = [1, 1]} : vector<2x192xf32> to vector<2x64xf32>
    %424 = arith.addf %423, %344 : vector<2x64xf32>
    %425 = arith.mulf %420, %424 : vector<2x64xf32>
    %426 = arith.addf %422, %425 : vector<2x64xf32>
    %427 = math.tanh %426 : vector<2x64xf32>
    %428 = arith.subf %409, %427 : vector<2x64xf32>
    %429 = arith.mulf %421, %428 : vector<2x64xf32>
    %430 = arith.addf %427, %429 : vector<2x64xf32>
    %c8_198 = arith.constant 8 : index
    %c0_199 = arith.constant 0 : index
    %431 = vector.load %arg12[%c8_198, %c0_199] : memref<16x192xf32, #tpu.memory_space<vmem>>, vector<2x192xf32>
    %cst_200 = arith.constant dense<0.000000e+00> : vector<2x192xf32>
    %432 = tpu.matmul %430, %274, %cst_200 {dimension_numbers = #tpu.dot_dimension_numbers<[1], [0], [0], [1], [0, 0, 1, 1], [], []>} : vector<2x64xf32>, vector<64x192xf32>, vector<2x192xf32> -> vector<2x192xf32>
    %433 = vector.extract_strided_slice %431 {offsets = [0, 0], sizes = [2, 128], strides = [1, 1]} : vector<2x192xf32> to vector<2x128xf32>
    %434 = vector.extract_strided_slice %432 {offsets = [0, 0], sizes = [2, 128], strides = [1, 1]} : vector<2x192xf32> to vector<2x128xf32>
    %435 = arith.addf %433, %434 : vector<2x128xf32>
    %436 = arith.negf %435 : vector<2x128xf32>
    %437 = math.exp %436 : vector<2x128xf32>
    %cst_201 = arith.constant 1.000000e+00 : f32
    %438 = vector.broadcast %cst_201 : f32 to vector<2x128xf32>
    %439 = arith.addf %438, %437 : vector<2x128xf32>
    %440 = arith.divf %438, %439 : vector<2x128xf32>
    %441 = vector.extract_strided_slice %440 {offsets = [0, 0], sizes = [2, 64], strides = [1, 1]} : vector<2x128xf32> to vector<2x64xf32>
    %442 = vector.extract_strided_slice %440 {offsets = [0, 64], sizes = [2, 64], strides = [1, 1]} : vector<2x128xf32> to vector<2x64xf32>
    %443 = vector.extract_strided_slice %431 {offsets = [0, 128], sizes = [2, 64], strides = [1, 1]} : vector<2x192xf32> to vector<2x64xf32>
    %444 = vector.extract_strided_slice %432 {offsets = [0, 128], sizes = [2, 64], strides = [1, 1]} : vector<2x192xf32> to vector<2x64xf32>
    %445 = arith.addf %444, %344 : vector<2x64xf32>
    %446 = arith.mulf %441, %445 : vector<2x64xf32>
    %447 = arith.addf %443, %446 : vector<2x64xf32>
    %448 = math.tanh %447 : vector<2x64xf32>
    %449 = arith.subf %430, %448 : vector<2x64xf32>
    %450 = arith.mulf %442, %449 : vector<2x64xf32>
    %451 = arith.addf %448, %450 : vector<2x64xf32>
    %c10_202 = arith.constant 10 : index
    %c0_203 = arith.constant 0 : index
    %452 = vector.load %arg12[%c10_202, %c0_203] : memref<16x192xf32, #tpu.memory_space<vmem>>, vector<2x192xf32>
    %cst_204 = arith.constant dense<0.000000e+00> : vector<2x192xf32>
    %453 = tpu.matmul %451, %274, %cst_204 {dimension_numbers = #tpu.dot_dimension_numbers<[1], [0], [0], [1], [0, 0, 1, 1], [], []>} : vector<2x64xf32>, vector<64x192xf32>, vector<2x192xf32> -> vector<2x192xf32>
    %454 = vector.extract_strided_slice %452 {offsets = [0, 0], sizes = [2, 128], strides = [1, 1]} : vector<2x192xf32> to vector<2x128xf32>
    %455 = vector.extract_strided_slice %453 {offsets = [0, 0], sizes = [2, 128], strides = [1, 1]} : vector<2x192xf32> to vector<2x128xf32>
    %456 = arith.addf %454, %455 : vector<2x128xf32>
    %457 = arith.negf %456 : vector<2x128xf32>
    %458 = math.exp %457 : vector<2x128xf32>
    %cst_205 = arith.constant 1.000000e+00 : f32
    %459 = vector.broadcast %cst_205 : f32 to vector<2x128xf32>
    %460 = arith.addf %459, %458 : vector<2x128xf32>
    %461 = arith.divf %459, %460 : vector<2x128xf32>
    %462 = vector.extract_strided_slice %461 {offsets = [0, 0], sizes = [2, 64], strides = [1, 1]} : vector<2x128xf32> to vector<2x64xf32>
    %463 = vector.extract_strided_slice %461 {offsets = [0, 64], sizes = [2, 64], strides = [1, 1]} : vector<2x128xf32> to vector<2x64xf32>
    %464 = vector.extract_strided_slice %452 {offsets = [0, 128], sizes = [2, 64], strides = [1, 1]} : vector<2x192xf32> to vector<2x64xf32>
    %465 = vector.extract_strided_slice %453 {offsets = [0, 128], sizes = [2, 64], strides = [1, 1]} : vector<2x192xf32> to vector<2x64xf32>
    %466 = arith.addf %465, %344 : vector<2x64xf32>
    %467 = arith.mulf %462, %466 : vector<2x64xf32>
    %468 = arith.addf %464, %467 : vector<2x64xf32>
    %469 = math.tanh %468 : vector<2x64xf32>
    %470 = arith.subf %451, %469 : vector<2x64xf32>
    %471 = arith.mulf %463, %470 : vector<2x64xf32>
    %472 = arith.addf %469, %471 : vector<2x64xf32>
    %c12_206 = arith.constant 12 : index
    %c0_207 = arith.constant 0 : index
    %473 = vector.load %arg12[%c12_206, %c0_207] : memref<16x192xf32, #tpu.memory_space<vmem>>, vector<2x192xf32>
    %cst_208 = arith.constant dense<0.000000e+00> : vector<2x192xf32>
    %474 = tpu.matmul %472, %274, %cst_208 {dimension_numbers = #tpu.dot_dimension_numbers<[1], [0], [0], [1], [0, 0, 1, 1], [], []>} : vector<2x64xf32>, vector<64x192xf32>, vector<2x192xf32> -> vector<2x192xf32>
    %475 = vector.extract_strided_slice %473 {offsets = [0, 0], sizes = [2, 128], strides = [1, 1]} : vector<2x192xf32> to vector<2x128xf32>
    %476 = vector.extract_strided_slice %474 {offsets = [0, 0], sizes = [2, 128], strides = [1, 1]} : vector<2x192xf32> to vector<2x128xf32>
    %477 = arith.addf %475, %476 : vector<2x128xf32>
    %478 = arith.negf %477 : vector<2x128xf32>
    %479 = math.exp %478 : vector<2x128xf32>
    %cst_209 = arith.constant 1.000000e+00 : f32
    %480 = vector.broadcast %cst_209 : f32 to vector<2x128xf32>
    %481 = arith.addf %480, %479 : vector<2x128xf32>
    %482 = arith.divf %480, %481 : vector<2x128xf32>
    %483 = vector.extract_strided_slice %482 {offsets = [0, 0], sizes = [2, 64], strides = [1, 1]} : vector<2x128xf32> to vector<2x64xf32>
    %484 = vector.extract_strided_slice %482 {offsets = [0, 64], sizes = [2, 64], strides = [1, 1]} : vector<2x128xf32> to vector<2x64xf32>
    %485 = vector.extract_strided_slice %473 {offsets = [0, 128], sizes = [2, 64], strides = [1, 1]} : vector<2x192xf32> to vector<2x64xf32>
    %486 = vector.extract_strided_slice %474 {offsets = [0, 128], sizes = [2, 64], strides = [1, 1]} : vector<2x192xf32> to vector<2x64xf32>
    %487 = arith.addf %486, %344 : vector<2x64xf32>
    %488 = arith.mulf %483, %487 : vector<2x64xf32>
    %489 = arith.addf %485, %488 : vector<2x64xf32>
    %490 = math.tanh %489 : vector<2x64xf32>
    %491 = arith.subf %472, %490 : vector<2x64xf32>
    %492 = arith.mulf %484, %491 : vector<2x64xf32>
    %493 = arith.addf %490, %492 : vector<2x64xf32>
    %c14_210 = arith.constant 14 : index
    %c0_211 = arith.constant 0 : index
    %494 = vector.load %arg12[%c14_210, %c0_211] : memref<16x192xf32, #tpu.memory_space<vmem>>, vector<2x192xf32>
    %cst_212 = arith.constant dense<0.000000e+00> : vector<2x192xf32>
    %495 = tpu.matmul %493, %274, %cst_212 {dimension_numbers = #tpu.dot_dimension_numbers<[1], [0], [0], [1], [0, 0, 1, 1], [], []>} : vector<2x64xf32>, vector<64x192xf32>, vector<2x192xf32> -> vector<2x192xf32>
    %496 = vector.extract_strided_slice %494 {offsets = [0, 0], sizes = [2, 128], strides = [1, 1]} : vector<2x192xf32> to vector<2x128xf32>
    %497 = vector.extract_strided_slice %495 {offsets = [0, 0], sizes = [2, 128], strides = [1, 1]} : vector<2x192xf32> to vector<2x128xf32>
    %498 = arith.addf %496, %497 : vector<2x128xf32>
    %499 = arith.negf %498 : vector<2x128xf32>
    %500 = math.exp %499 : vector<2x128xf32>
    %cst_213 = arith.constant 1.000000e+00 : f32
    %501 = vector.broadcast %cst_213 : f32 to vector<2x128xf32>
    %502 = arith.addf %501, %500 : vector<2x128xf32>
    %503 = arith.divf %501, %502 : vector<2x128xf32>
    %504 = vector.extract_strided_slice %503 {offsets = [0, 0], sizes = [2, 64], strides = [1, 1]} : vector<2x128xf32> to vector<2x64xf32>
    %505 = vector.extract_strided_slice %503 {offsets = [0, 64], sizes = [2, 64], strides = [1, 1]} : vector<2x128xf32> to vector<2x64xf32>
    %506 = vector.extract_strided_slice %494 {offsets = [0, 128], sizes = [2, 64], strides = [1, 1]} : vector<2x192xf32> to vector<2x64xf32>
    %507 = vector.extract_strided_slice %495 {offsets = [0, 128], sizes = [2, 64], strides = [1, 1]} : vector<2x192xf32> to vector<2x64xf32>
    %508 = arith.addf %507, %344 : vector<2x64xf32>
    %509 = arith.mulf %504, %508 : vector<2x64xf32>
    %510 = arith.addf %506, %509 : vector<2x64xf32>
    %511 = math.tanh %510 : vector<2x64xf32>
    %512 = arith.subf %493, %511 : vector<2x64xf32>
    %513 = arith.mulf %505, %512 : vector<2x64xf32>
    %514 = arith.addf %511, %513 : vector<2x64xf32>
    %515 = vector.extract_strided_slice %514 {offsets = [0, 0], sizes = [2, 32], strides = [1, 1]} : vector<2x64xf32> to vector<2x32xf32>
    %516 = tpu.concatenate %515, %367 in 1 : vector<2x32xf32>, vector<2x32xf32> -> vector<2x64xf32>
    %c0_214 = arith.constant 0 : index
    %c0_215 = arith.constant 0 : index
    %517 = vector.load %arg9[%c0_214, %c0_215] : memref<64x16xf32, #tpu.memory_space<vmem>>, vector<64x16xf32>
    %cst_216 = arith.constant dense<0.000000e+00> : vector<2x16xf32>
    %518 = tpu.matmul %516, %517, %cst_216 {dimension_numbers = #tpu.dot_dimension_numbers<[1], [0], [0], [1], [0, 0, 1, 1], [], []>} : vector<2x64xf32>, vector<64x16xf32>, vector<2x16xf32> -> vector<2x16xf32>
    %c0_217 = arith.constant 0 : index
    %c0_218 = arith.constant 0 : index
    %519 = vector.load %arg10[%c0_217, %c0_218] : memref<1x16xf32, #tpu.memory_space<vmem>>, vector<1x16xf32>
    %520 = vector.broadcast %519 : vector<1x16xf32> to vector<2x16xf32>
    %521 = arith.addf %518, %520 : vector<2x16xf32>
    %c0_219 = arith.constant 0 : index
    %c0_220 = arith.constant 0 : index
    %522 = vector.load %arg11[%c0_219, %c0_220] : memref<2x16xf32, #tpu.memory_space<vmem>>, vector<2x16xf32>
    tpu.vector_store %arg11[%c0_219, %c0_220], %521 {strides = array<i32>} : memref<2x16xf32, #tpu.memory_space<vmem>>, vector<2x16xf32>,
    return
  }
}

</mosaic_0001>

<bundles_post_ra>
// kernel: seq_classifier_forward.1
= control target key start
LH: loop header
LB: loop body
LE: loop exit
PB: predicated region body
PF: predicated region fallthrough
CT: control target
= control target key end

     0   :  { %16 = vsyncpa [#allocation5], 0  ;;  %s3730_s0 = inlined_call_operand.vmem [shape: f32[16,32], index: 0, kind: input, shape index: {}]   ;;  %s3731_s1 = inlined_call_operand.hbm [shape: f32[32,192], index: 1, kind: input, shape index: {}]   ;;  %s3732_s2 = inlined_call_operand.vmem [shape: f32[64,192], index: 2, kind: input, shape index: {}]   ;;  %s3733_s3 = inlined_call_operand.vmem [shape: f32[1,192], index: 3, kind: input, shape index: {}]   ;;  %s3734_s4 = inlined_call_operand.hbm [shape: f32[1,64], index: 4, kind: input, shape index: {}]   ;;  %s3735_s5 = inlined_call_operand.hbm [shape: f32[64,192], index: 5, kind: input, shape index: {}]   ;;  %s3736_s6 = inlined_call_operand.hbm [shape: f32[64,192], index: 6, kind: input, shape index: {}]   ;;  %s3737_s7 = inlined_call_operand.hbm [shape: f32[1,192], index: 7, kind: input, shape index: {}]   ;;  %s3738_s8 = inlined_call_operand.hbm [shape: f32[1,64], index: 8, kind: input, shape index: {}]   ;;  %s3739_s9 = inlined_call_operand.vmem [shape: f32[64,16], index: 9, kind: input, shape index: {}]   ;;  %s3740_s10 = inlined_call_operand.hbm [shape: f32[1,16], index: 10, kind: input, shape index: {}]   ;;  %s3741_s11 = inlined_call_operand.hbm [shape: f32[2,16], index: 11, kind: output, shape index: {}]  }
   0x1   :  { %17 = vsyncpa [#allocation8], 0 }
   0x2   :  { %18 = vsyncpa [#allocation11], 0 }
   0x3   :  { %19 = vsyncpa [#allocation14], 0 }
   0x4   :  { %20 = vsyncpa [#allocation6], 0  ;;  %s3056_s17 = smov [#allocation7]   ;;  %s2870_s21 = scalar_lea.hbm %s3734_s4, 16 }
   0x5   :  { %s45_s18 = sshll.u32 %s3056_s17, 4  ;;  %p2871_p0 = scmp.ne.s32.totalorder %s3734_s4, %s2870_s21  ;;  %s46_s18 = int_to_ptr.vmem [resolvable:$true] %s45_s18 }
   0x6   :  { %p2874_p1 = scmp.lt.u32.totalorder %s2870_s21, %s3734_s4 }
   0x8   :  { %p2876_p2 = pnand %p2874_p1, %p2871_p0 }
   0xa   :  { %2879 = shalt.err (!%p2876_p2)
}
   0xb   :  { %s2880_s26 = scalar_lea.vmem %s46_s18, 16  ;;  %s2884_s27 = scalar_lea.vmem %s46_s18, 32 }
   0xc   :  { %p2881_p3 = scmp.ne.s32.totalorder %s46_s18, %s2880_s26  ;;  %p2885_p4 = scmp.lt.s32.totalorder %s46_s18, %s46_s18 }
   0xd   :  { %p2886_p5 = scmp.lt.s32.totalorder %s2884_s27, %s2880_s26 }
   0xf   :  { %p2887_p6 = por %p2886_p5, %p2885_p4 }
  0x11   :  { %p2888_p7 = pnand %p2887_p6, %p2881_p3 }
  0x13   :  { %2891 = shalt.err (!%p2888_p7)
}
  0x14   :  { %48 = dma.hbm_to_vmem [thread:$0]  %s3734_s4, 16, %s46_s18, [#allocation8]  }
  0x15   :  { %s3057_s30 = smov [#allocation10]   ;;  %s3058_s13 = smov [#allocation13]  }
  0x16   :  { %s66_s12 = sshll.u32 %s3057_s30, 4  ;;  %s89_s14 = sshll.u32 %s3058_s13, 4  ;;  %s67_s12 = int_to_ptr.vmem [resolvable:$true] %s66_s12  ;;  %s90_s14 = int_to_ptr.vmem [resolvable:$true] %s89_s14 }
  0x17   :  { %s2892_s17 = scalar_lea.hbm %s3736_s6, 2048 }
  0x18   :  { %p2893_p8 = scmp.ne.s32.totalorder %s3736_s6, %s2892_s17  ;;  %p2896_p9 = scmp.lt.u32.totalorder %s2892_s17, %s3736_s6 }
  0x1a   :  { %p2898_p10 = pnand %p2896_p9, %p2893_p8 }
  0x1c   :  { %2901 = shalt.err (!%p2898_p10)
}
  0x1d   :  { %s2902_s4 = scalar_lea.vmem %s67_s12, 2048  ;;  %p2907_p12 = scmp.lt.s32.totalorder %s67_s12, %s67_s12 }
  0x1e   :  { %p2903_p11 = scmp.ne.s32.totalorder %s67_s12, %s2902_s4  ;;  %p2908_p13 = scmp.lt.s32.totalorder %s2902_s4, %s2902_s4 }
  0x20   :  { %p2909_p0 = por %p2908_p13, %p2907_p12 }
  0x22   :  { %p2910_p1 = pnand %p2909_p0, %p2903_p11 }
  0x24   :  { %2913 = shalt.err (!%p2910_p1)
}
  0x25   :  { %s3059_s18 = smov 256   ;;  %s3060_s23 = smov 16  }
  0x26   :  { %72 = dma.hbm_to_vmem [thread:$0]  %s3736_s6, 2048, %s67_s12, [#allocation11], %s3059_s18, %s3059_s18, %s3060_s23  }
  0x27   :  { %s2914_s28 = scalar_lea.hbm %s3738_s8, 16 }
  0x28   :  { %p2915_p2 = scmp.ne.s32.totalorder %s3738_s8, %s2914_s28  ;;  %p2918_p3 = scmp.lt.u32.totalorder %s2914_s28, %s3738_s8 }
  0x2a   :  { %p2920_p4 = pnand %p2918_p3, %p2915_p2 }
  0x2c   :  { %2923 = shalt.err (!%p2920_p4)
}
  0x2d   :  { %s2924_s16 = scalar_lea.vmem %s90_s14, 16  ;;  %s2928_s17 = scalar_lea.vmem %s90_s14, 32 }
  0x2e   :  { %p2925_p5 = scmp.ne.s32.totalorder %s90_s14, %s2924_s16  ;;  %p2929_p6 = scmp.lt.s32.totalorder %s90_s14, %s90_s14 }
  0x2f   :  { %p2930_p7 = scmp.lt.s32.totalorder %s2928_s17, %s2924_s16 }
  0x31   :  { %p2931_p8 = por %p2930_p7, %p2929_p6 }
  0x33   :  { %p2932_p9 = pnand %p2931_p8, %p2925_p5 }
  0x35   :  { %2935 = shalt.err (!%p2932_p9)
}
  0x36   :  { %92 = dma.hbm_to_vmem [thread:$0]  %s3738_s8, 16, %s90_s14, [#allocation14]  }
  0x37   :  { %s3061_s19 = smov [#allocation4]   ;;  %s3062_s21 = smov [#allocation9]  }
  0x38   :  { %s28_s20 = sshll.u32 %s3061_s19, 4  ;;  %s54_s22 = sshll.u32 %s3062_s21, 4  ;;  %s29_s20 = int_to_ptr.vmem [resolvable:$true] %s28_s20  ;;  %s55_s22 = int_to_ptr.vmem [resolvable:$true] %s54_s22 }
  0x39   :  { %s2936_s25 = scalar_lea.hbm %s3731_s1, 1024 }
  0x3a   :  { %p2937_p10 = scmp.ne.s32.totalorder %s3731_s1, %s2936_s25  ;;  %p2940_p11 = scmp.lt.u32.totalorder %s2936_s25, %s3731_s1 }
  0x3c   :  { %p2942_p12 = pnand %p2940_p11, %p2937_p10 }
  0x3e   :  { %2945 = shalt.err (!%p2942_p12)
}
  0x3f   :  { %s2946_s8 = scalar_lea.vmem %s29_s20, 1024  ;;  %p2951_p0 = scmp.lt.s32.totalorder %s29_s20, %s29_s20 }
  0x40   :  { %p2947_p13 = scmp.ne.s32.totalorder %s29_s20, %s2946_s8  ;;  %p2952_p1 = scmp.lt.s32.totalorder %s2946_s8, %s2946_s8 }
  0x42   :  { %p2953_p2 = por %p2952_p1, %p2951_p0 }
  0x44   :  { %p2954_p3 = pnand %p2953_p2, %p2947_p13 }
  0x46   :  { %2957 = shalt.err (!%p2954_p3)
}
  0x47   :  { %34 = dma.hbm_to_vmem [thread:$0]  %s3731_s1, 1024, %s29_s20, [#allocation5], %s3059_s18, %s3059_s18, %s3060_s23  }
  0x48   :  { %s2958_s16 = scalar_lea.hbm %s3735_s5, 2048 }
  0x49   :  { %p2959_p4 = scmp.ne.s32.totalorder %s3735_s5, %s2958_s16  ;;  %p2962_p5 = scmp.lt.u32.totalorder %s2958_s16, %s3735_s5 }
  0x4b   :  { %p2964_p6 = pnand %p2962_p5, %p2959_p4 }
  0x4d   :  { %2967 = shalt.err (!%p2964_p6)
}
  0x4e   :  { %s2968_s21 = scalar_lea.vmem %s55_s22, 2048  ;;  %p2973_p8 = scmp.lt.s32.totalorder %s55_s22, %s55_s22 }
  0x4f   :  { %p2969_p7 = scmp.ne.s32.totalorder %s55_s22, %s2968_s21  ;;  %p2974_p9 = scmp.lt.s32.totalorder %s2968_s21, %s2968_s21 }
  0x51   :  { %p2975_p10 = por %p2974_p9, %p2973_p8 }
  0x53   :  { %p2976_p11 = pnand %p2975_p10, %p2969_p7 }
  0x55   :  { %2979 = shalt.err (!%p2976_p11)
}
  0x56   :  { %60 = dma.hbm_to_vmem [thread:$0]  %s3735_s5, 2048, %s55_s22, [#allocation8], %s3059_s18, %s3059_s18, %s3060_s23  }
  0x57   :  { %s3063_s4 = smov [#allocation12]   ;;  %s3064_s25 = smov [#allocation15]  }
  0x58   :  { %s79_s24 = sshll.u32 %s3063_s4, 4  ;;  %s101_s26 = sshll.u32 %s3064_s25, 4  ;;  %s80_s24 = int_to_ptr.vmem [resolvable:$true] %s79_s24  ;;  %s102_s26 = int_to_ptr.vmem [resolvable:$true] %s101_s26 }
  0x59   :  { %s2980_s29 = scalar_lea.hbm %s3737_s7, 32 }
  0x5a   :  { %p2981_p12 = scmp.ne.s32.totalorder %s3737_s7, %s2980_s29  ;;  %p2984_p13 = scmp.lt.u32.totalorder %s2980_s29, %s3737_s7 }
  0x5c   :  { %p2986_p0 = pnand %p2984_p13, %p2981_p12 }
  0x5e   :  { %2989 = shalt.err (!%p2986_p0)
}
  0x5f   :  { %s2990_s5 = scalar_lea.vmem %s80_s24, 32  ;;  %p2995_p2 = scmp.lt.s32.totalorder %s80_s24, %s80_s24 }
  0x60   :  { %p2991_p1 = scmp.ne.s32.totalorder %s80_s24, %s2990_s5  ;;  %p2996_p3 = scmp.lt.s32.totalorder %s2990_s5, %s2990_s5 }
  0x62   :  { %p2997_p4 = por %p2996_p3, %p2995_p2 }
  0x64   :  { %p2998_p5 = pnand %p2997_p4, %p2991_p1 }
  0x66   :  { %3001 = shalt.err (!%p2998_p5)
}
  0x67   :  { %82 = dma.hbm_to_vmem [thread:$0]  %s3737_s7, 32, %s80_s24, [#allocation11]  }
  0x68   :  { %s3002_s16 = scalar_lea.hbm %s3740_s10, 16 }
  0x69   :  { %p3003_p6 = scmp.ne.s32.totalorder %s3740_s10, %s3002_s16  ;;  %p3006_p7 = scmp.lt.u32.totalorder %s3002_s16, %s3740_s10 }
  0x6b   :  { %p3008_p8 = pnand %p3006_p7, %p3003_p6 }
  0x6d   :  { %3011 = shalt.err (!%p3008_p8)
}
  0x6e   :  { %s3012_s21 = scalar_lea.vmem %s102_s26, 16  ;;  %s3016_s1 = scalar_lea.vmem %s102_s26, 32 }
  0x6f   :  { %p3013_p9 = scmp.ne.s32.totalorder %s102_s26, %s3012_s21  ;;  %p3017_p10 = scmp.lt.s32.totalorder %s102_s26, %s102_s26 }
  0x70   :  { %p3018_p11 = scmp.lt.s32.totalorder %s3016_s1, %s3012_s21 }
  0x72   :  { %p3019_p12 = por %p3018_p11, %p3017_p10 }
  0x74   :  { %p3020_p13 = pnand %p3019_p12, %p3013_p9 }
  0x76   :  { %3023 = shalt.err (!%p3020_p13)
}
  0x77   :  { %104 = dma.hbm_to_vmem [thread:$0]  %s3740_s10, 16, %s102_s26, [#allocation14]  }
  0x78   :  { %3046 = dma.done.wait [#allocation5], 1024  }
  0x79   :  { %3047 = vsyncadd [#allocation5], 4294966272 }
  0x7a   :  { %3048 = dma.done.wait [#allocation8], 2064  }
  0x7b   :  { %3049 = vsyncadd [#allocation8], 4294965232 }
  0x7c   :  { %3050 = dma.done.wait [#allocation11], 2080  }
  0x7d   :  { %3051 = vsyncadd [#allocation11], 4294965216 }
  0x7e   :  { %3052 = dma.done.wait [#allocation14], 32  }
  0x7f   :  { %3053 = vsyncadd [#allocation14], 4294967264  ;;  %v3065_v0 = vmov 0.0   ;;  %v145_v1 = vld [vmem:[#allocation4 + $0x8] sm:$0xff]  ;;  %v147_v2 = vld [vmem:[#allocation4 + $0x18] sm:$0xff]  ;;  %vm164_vm0 = vcmask 261120   ;;  %v154_v39 = vlaneseq }
  0x80   :  { %235 = vmatprep.mubr.f32.mxu0 %v3065_v0  ;;  %416 = vmatprep.mubr.f32.mxu1 %v3065_v0  ;;  %v144_v3 = vld [vmem:[#allocation4] sm:$0xff]  ;;  %v2466_v4 = vpack.c.bf16 %v147_v2, %v145_v1  ;;  %v146_v5 = vld [vmem:[#allocation4 + $0x10] sm:$0xff]  ;;  %v149_v6 = vld [vmem:[#allocation4 + $0x28] sm:$0xff]  ;;  %s3066_s30 = smov 32   ;;  %s3068_s13 = smov 96   ;;  %vm258_vm1 = vcmask 785920  }
  0x81   :  { %v151_v7 = vld [vmem:[#allocation4 + $0x38] sm:$0xff]  ;;  %v2468_v8 = vpack.c.bf16 %v146_v5, %v144_v3  ;;  %v148_v10 = vld [vmem:[#allocation4 + $0x20] sm:$0xff]  ;;  %v150_v11 = vld [vmem:[#allocation4 + $0x30] sm:$0xff]  ;;  %v3329_v40 = vshrl.u32 %v154_v39, 7  ;;  %vm273_vm2 = vcmask 517376   ;;  %vm298_vm3 = vcmask 521476  }
  0x82   :  { %v2470_v9 = vpack.c.bf16 %v151_v7, %v149_v6  ;;  %2467 = vmatprep.subr.bf16.mxu0 %v2466_v4  ;;  %v129_v12 = vld [vmem:[%s3732_s2 + $0x8] sm:$0xff]  ;;  %v131_v13 = vld [vmem:[%s3732_s2 + $0x18] sm:$0xff]  ;;  %v2472_v14 = vpack.c.bf16 %v150_v11, %v148_v10  ;;  %v128_v16 = vld [vmem:[%s3732_s2] sm:$0xff]  ;;  %vm280_vm4 = vcmask 1042176   ;;  %vm300_vm5 = vcmask 1046276  }
  0x83   :  { %2469 = vmatpush1.bf16.msra.mxu0 %v2468_v8  ;;  %v3233_v15 = vpack.c.bf16 %v131_v13, %v129_v12  ;;  %v130_v17 = vld [vmem:[%s3732_s2 + $0x10] sm:$0xff]  ;;  %v133_v18 = vld [vmem:[%s3732_s2 + $0x28] sm:$0xff]  ;;  %v135_v20 = vld [vmem:[%s3732_s2 + $0x38] sm:$0xff]  ;;  %v156_v41 = vsub.s32 0, %v3329_v40  ;;  %v160_v43 = vsub.s32 1, %v3329_v40  ;;  %vm288_vm6 = vcmask 519426  }
  0x84   :  { %2471 = vmatprep.subr.bf16.mxu0 %v2470_v9  ;;  %v3244_v19 = vpack.c.bf16 %v130_v17, %v128_v16  ;;  %v132_v21 = vld [vmem:[%s3732_s2 + $0x20] sm:$0xff]  ;;  %v134_v22 = vld [vmem:[%s3732_s2 + $0x30] sm:$0xff]  ;;  %v3256_v23 = vpack.c.bf16 %v135_v20, %v133_v18  ;;  %v137_v24 = vld [vmem:[%s3732_s2 + $0x48] sm:$0xff]  ;;  %vm303_vm7 = vcmask 523526   ;;  %vm445_vm8 = vcmask 254976  }
  0x85   :  { %2475 = vmatprep.subr.bf16.mxu1 %v3233_v15  ;;  %v139_v25 = vld [vmem:[%s3732_s2 + $0x58] sm:$0xff]  ;;  %v3265_v26 = vpack.c.bf16 %v134_v22, %v132_v21  ;;  %v126_v27 = vld [vmem:[%s3730_s0] sm:$0xff]  ;;  %v138_v30 = vld [vmem:[%s3732_s2 + $0x50] sm:$0xff]  ;;  %vm348_vm9 = vcmask 523264   ;;  %vm294_vm10 = vcmask 1044226   ;;  %vm305_vm11 = vcmask 1048326  }
  0x86   :  { %2477 = vmatpush1.bf16.msra.mxu1 %v3244_v19  ;;  %v3271_v28 = vpack.c.bf16 %v139_v25, %v137_v24  ;;  %v136_v29 = vld [vmem:[%s3732_s2 + $0x40] sm:$0xff]  ;;  %v141_v31 = vld [vmem:[%s3732_s2 + $0x68] sm:$0xff]  ;;  %v143_v32 = vld [vmem:[%s3732_s2 + $0x78] sm:$0xff]  ;;  %vm556_vm12 = vcmask 257026   ;;  %vm668_vm13 = vcmask 259076   ;;  %vm780_vm14 = vcmask 261126  }
  0x87   :  { %2473 = vmatpush1.bf16.msra.mxu0 %v2472_v14  ;;  %2479 = vmatprep.subr.bf16.mxu1 %v3256_v23  ;;  %v3288_v33 = vpack.c.bf16 %v138_v30, %v136_v29  ;;  %v127_v34 = vld [vmem:[%s3730_s0 + $0x8] sm:$0xff]  ;;  %v3295_v35 = vpack.c.bf16 %v143_v32, %v141_v31  ;;  %v140_v36 = vld [vmem:[%s3732_s2 + $0x60] sm:$0xff]  ;;  %v142_v37 = vld [vmem:[%s3732_s2 + $0x70] sm:$0xff]  ;;  %vm3070_vm15 = vmmov 0  }
  0x88   :  { %2491 = vmatprep.subr.bf16.mxu0 %v3233_v15  ;;  %v3307_v38 = vpack.c.bf16 %v142_v37, %v140_v36  ;;  %v152_v42 = vld [vmem:[%s3733_s3] sm:$0x3]  ;;  %s3067_s3 = smov 64   ;;  %v3367_v5 = vld [vmem:[#allocation7] ss:$0 sm:$0xff] }
  0x89   :  { %v157_v44 = vrot.slane %v152_v42, %v156_v41  ;;  %v161_v45 = vrot.slane %v152_v42, %v160_v43 }
  0x8a   :  { %2400 = vmatmul.mubr.msk.f32.vlgmr.msra.gmra.mrb[0].mxu0 %vm164_vm0, %v126_v27  ;;  %2481 = vmatpush1.bf16.msra.mxu1 %v3265_v26 }
  0x8b   :  { %241 = vmatprep.mubr.f32.mxu0 %v3065_v0  ;;  %2483 = vmatprep.subr.bf16.mxu1 %v3271_v28 }
  0x8c   :  { %2493 = vmatpush1.bf16.msra.mxu0 %v3244_v19 }
  0x8d   :  { %2495 = vmatprep.subr.bf16.mxu0 %v3256_v23 }
  0x8e   :  { %2401 = vmatmul.mubr.msk.f32.gmra.mrb[2].mxu0 %vm164_vm0, %v127_v34  ;;  %2485 = vmatpush1.bf16.msra.mxu1 %v3288_v33 }
  0x8f   :  { %2487 = vmatprep.subr.bf16.mxu1 %v3295_v35  ;;  %517 = vmatprep.mubr.f32.mxu0 %v3065_v0 }
  0x90   :  { %2497 = vmatpush1.bf16.msra.mxu0 %v3265_v26 }
  0x91   :  { %2499 = vmatprep.subr.bf16.mxu0 %v3271_v28 }
  0x92   :  { %2489 = vmatpush1.bf16.msra.mxu1 %v3307_v38 }
  0x93   :  { %2507 = vmatprep.subr.bf16.mxu1 %v3233_v15 }
  0x94   :  { %2501 = vmatpush1.bf16.msra.mxu0 %v3288_v33 }
  0x95   :  { %417 = vmatmul.mubr.f32.vlgmr.msra.gmra.mrb[0].mxu1 %v3065_v0  ;;  %2503 = vmatprep.subr.bf16.mxu0 %v3295_v35 }
  0x96   :  { %2509 = vmatpush1.bf16.msra.mxu1 %v3244_v19  ;;  %629 = vmatprep.mubr.f32.mxu1 %v3065_v0 }
  0x97   :  { %2511 = vmatprep.subr.bf16.mxu1 %v3256_v23 }
  0x98   :  { %2505 = vmatpush1.bf16.msra.mxu0 %v3307_v38 }
  0x99   :  { %2523 = vmatprep.subr.bf16.mxu0 %v3233_v15 }
  0x9a   :  { %2513 = vmatpush1.bf16.msra.mxu1 %v3265_v26 }
  0x9b   :  { %2515 = vmatprep.subr.bf16.mxu1 %v3271_v28 }
  0x9e   :  { %2517 = vmatpush1.bf16.msra.mxu1 %v3288_v33 }
  0x9f   :  { %2519 = vmatprep.subr.bf16.mxu1 %v3295_v35 }
  0xa2   :  { %2521 = vmatpush1.bf16.msra.mxu1 %v3307_v38 }
  0xa3   :  { %2539 = vmatprep.subr.bf16.mxu1 %v3233_v15 }
 0x15d   :  { %v237_v46 = vpop.f32.mrb[0].mxu0 }
 0x15e   :  { %v3340_v47 = vadd.f32 %v237_v46, %v157_v44  ;;  %v239_v48 = vpop.f32.mrb[1].mxu0 }
 0x15f   :  { %v3342_v49 = vadd.f32 %v239_v48, %v161_v45 }
 0x160   :  { %248 = vst.msk [vmem:[#allocation2] sm:$0xff] %vm164_vm0, %v3340_v47  ;;  %252 = vrot.lane.b32.xlu0 %v3340_v47, %s3066_s30 }
 0x161   :  { %v243_v50 = vpop.f32.mrb[2].mxu0 }
 0x162   :  { %v3348_v51 = vadd.f32 %v243_v50, %v157_v44  ;;  %v245_v52 = vpop.f32.mrb[3].mxu0 }
 0x163   :  { %v246_v53 = vadd.f32 %v245_v52, %v161_v45 }
 0x164   :  { %249 = vst.msk [vmem:[#allocation2 + $0x10] sm:$0xff] %vm164_vm0, %v3348_v51  ;;  %v269_v54 = vrot.slane %v3348_v51, 6  ;;  %v284_v13 = vrot.slane %v3348_v51, 2 }
 0x165   :  { %v276_v55 = vrot.slane %v246_v53, 6  ;;  %v290_v61 = vrot.slane %v246_v53, 2 }
 0x166   :  { %270 = vrot.lane.b32.xlu0 %v269_v54, %s3067_s3 }
 0x167   :  { %277 = vrot.lane.b32.xlu1 %v276_v55, %s3068_s13 }
 0x168   :  { %v418_v56 = vpop.f32.mrb[0].mxu1 }
 0x169   :  { %v420_v57 = vpop.f32.mrb[1].mxu1 }
 0x16a   :  { %v430_v6 = vadd.f32 %v3367_v5, %v420_v57 }
 0x16b   :  { %261 = vrot.lane.b32.xlu1 %v3340_v47, %s3067_s3 }
 0x1d2   :  { %v253_v58 = vpop.permute.xlu0 %252 }
 0x1d3   :  { %259 = vst.msk [vmem:[#allocation2] sm:$0xff] %vm258_vm1, %v253_v58 }
 0x1d8   :  { %v271_v59 = vpop.permute.xlu0 %270 }
 0x1d9   :  { %274 = vst.msk [vmem:[#allocation2] sm:$0x3] %vm273_vm2, %v271_v59  ;;  %v278_v60 = vpop.permute.xlu1 %277 }
 0x1da   :  { %299 = vst.msk [vmem:[#allocation2] sm:$0x30] %vm298_vm3, %v271_v59 }
 0x1db   :  { %281 = vst.msk [vmem:[#allocation2] sm:$0x3] %vm280_vm4, %v278_v60 }
 0x1dc   :  { %301 = vst.msk [vmem:[#allocation2] sm:$0x30] %vm300_vm5, %v278_v60 }
 0x1dd   :  { %v262_v62 = vpop.permute.xlu1 %261 }
 0x1de   :  { %267 = vst.msk [vmem:[#allocation2 + $0x8] sm:$0xff] %vm164_vm0, %v262_v62 }
 0x1df   :  { %283 = vst.msk [vmem:[#allocation2 + $0x8] sm:$0x3] %vm273_vm2, %v276_v55 }
 0x1e0   :  { %297 = vst.msk [vmem:[#allocation2 + $0x8] sm:$0xc] %vm288_vm6, %v290_v61 }
 0x1e1   :  { %302 = vst.msk [vmem:[#allocation2 + $0x8] sm:$0x30] %vm298_vm3, %v276_v55 }
 0x1e2   :  { %307 = vst.msk [vmem:[#allocation2 + $0x8] sm:$0xc0] %vm303_vm7, %v290_v61  ;;  %v346_v63 = vld [vmem:[#allocation2] sm:$0x3] }
 0x1e3   :  { %v423_v1 = vadd.f32 %v418_v56, %v346_v63  ;;  %v559_v60 = vld [vmem:[#allocation2] sm:$0x30] }
 0x1e5   :  { %v2403_v2 = vmul.f32 -1.442695, %v423_v1 }
 0x1e6   :  { %v347_v9 = vld [vmem:[#allocation2 + $0x8] sm:$0x3] }
 0x1e7   :  { %2774 = vpow2.f32 %v2403_v2  ;;  %v449_v42 = vld [vmem:[#allocation2 + $0x8] sm:$0xc] }
 0x1f1   :  { %v2775_v3 = vpop.eup %2774 }
 0x1f2   :  { %v427_v4 = vadd.f32 1.0, %v2775_v3 }
 0x1f4   :  { %2776 = vrcp.f32 %v427_v4 }
 0x1fe   :  { %v2777_v7 = vpop.eup %2776 }
 0x1ff   :  { %v431_v8 = vmul.f32 %v2777_v7, %v430_v6 }
 0x201   :  { %v432_v10 = vadd.f32 %v431_v8, %v347_v9 }
 0x203   :  { %2778 = vtanh.f32 %v432_v10 }
 0x20d   :  { %v2779_v11 = vpop.eup %2778 }
 0x20e   :  { %v434_v12 = vsub.f32 0.0, %v2779_v11 }
 0x210   :  { %436 = vrot.lane.b32.xlu0 %v434_v12, %s3067_s3 }
 0x214   :  { %285 = vrot.lane.b32.xlu0 %v284_v13, %s3067_s3 }
 0x282   :  { %v437_v14 = vpop.permute.xlu0 %436 }
 0x283   :  { %v439_v16 = vmul.f32 %v2777_v7, %v437_v14  ;;  %v560_v7 = vld [vmem:[#allocation2 + $0x8] sm:$0x30] }
 0x285   :  { %441 = vrot.lane.b32.xlu1 %v439_v16, %s3067_s3 }
 0x286   :  { %v286_v17 = vpop.permute.xlu0 %285 }
 0x287   :  { %289 = vst.msk [vmem:[#allocation2] sm:$0xc] %vm288_vm6, %v286_v17 }
 0x288   :  { %304 = vst.msk [vmem:[#allocation2] sm:$0xc0] %vm303_vm7, %v286_v17 }
 0x289   :  { %291 = vrot.lane.b32.xlu1 %v290_v61, %s3068_s13 }
 0x2f7   :  { %v442_v18 = vpop.permute.xlu1 %441 }
 0x2f8   :  { %v444_v20 = vadd.f32 %v2779_v11, %v442_v18 }
 0x2fa   :  { %446 = vst.msk [vmem:[#allocation3] sm:$0x3] %vm445_vm8, %v444_v20  ;;  %2404 = vmatmul.mubr.msk.f32.vlgmr.msra.gmra.mrb[4].mxu0 %vm348_vm9, %v444_v20 }
 0x2fb   :  { %447 = vst.msk [vmem:[#allocation3 + $0xe] sm:$0x3] %vm273_vm2, %v444_v20  ;;  %v292_v21 = vpop.permute.xlu1 %291  ;;  %2525 = vmatpush1.bf16.msra.mxu0 %v3244_v19  ;;  %741 = vmatprep.mubr.f32.mxu0 %v3065_v0 }
 0x2fc   :  { %295 = vst.msk [vmem:[#allocation2] sm:$0xc] %vm294_vm10, %v292_v21  ;;  %2527 = vmatprep.subr.bf16.mxu0 %v3256_v23 }
 0x2fd   :  { %306 = vst.msk [vmem:[#allocation2] sm:$0xc0] %vm305_vm11, %v292_v21 }
 0x2ff   :  { %2529 = vmatpush1.bf16.msra.mxu0 %v3265_v26 }
 0x300   :  { %2531 = vmatprep.subr.bf16.mxu0 %v3271_v28 }
 0x303   :  { %2533 = vmatpush1.bf16.msra.mxu0 %v3288_v33  ;;  %v448_v27 = vld [vmem:[#allocation2] sm:$0xc] }
 0x304   :  { %2535 = vmatprep.subr.bf16.mxu0 %v3295_v35 }
 0x307   :  { %2537 = vmatpush1.bf16.msra.mxu0 %v3307_v38 }
 0x308   :  { %2555 = vmatprep.subr.bf16.mxu0 %v3233_v15 }
 0x3cd   :  { %v519_v22 = vpop.f32.mrb[4].mxu0 }
 0x3ce   :  { %v525_v24 = vrot.slane %v519_v22, 6  ;;  %v521_v25 = vpop.f32.mrb[5].mxu0 }
 0x3cf   :  { %v534_v34 = vadd.f32 %v3367_v5, %v521_v25 }
 0x3d0   :  { %v527_v29 = vadd.f32 %v525_v24, %v448_v27  ;;  %v671_v24 = vld [vmem:[#allocation2] sm:$0xc0] }
 0x3d1   :  { %v536_v36 = vrot.slane %v534_v34, 6 }
 0x3d2   :  { %v2405_v30 = vmul.f32 -1.442695, %v527_v29 }
 0x3d4   :  { %2780 = vpow2.f32 %v2405_v30 }
 0x3de   :  { %v2781_v31 = vpop.eup %2780 }
 0x3df   :  { %v531_v32 = vadd.f32 1.0, %v2781_v31 }
 0x3e1   :  { %2782 = vrcp.f32 %v531_v32 }
 0x3eb   :  { %v2783_v37 = vpop.eup %2782 }
 0x3ec   :  { %v538_v39 = vmul.f32 %v2783_v37, %v536_v36 }
 0x3ee   :  { %v539_v44 = vadd.f32 %v538_v39, %v449_v42 }
 0x3f0   :  { %2784 = vtanh.f32 %v539_v44 }
 0x3fa   :  { %v2785_v45 = vpop.eup %2784 }
 0x3fb   :  { %v542_v46 = vrot.slane %v2785_v45, 2 }
 0x3fd   :  { %v544_v48 = vsub.f32 %v444_v20, %v542_v46  ;;  %v314_v46 = vrot.slane %v3342_v49, 6 }
 0x3ff   :  { %v546_v50 = vrot.slane %v544_v48, 6 }
 0x401   :  { %547 = vrot.lane.b32.xlu0 %v546_v50, %s3067_s3 }
 0x473   :  { %v548_v52 = vpop.permute.xlu0 %547 }
 0x474   :  { %v550_v53 = vmul.f32 %v2783_v37, %v548_v52  ;;  %v672_v37 = vld [vmem:[#allocation2 + $0x8] sm:$0xc0] }
 0x476   :  { %552 = vrot.lane.b32.xlu1 %v550_v53, %s3067_s3  ;;  %v308_v53 = vrot.slane %v3340_v47, 6 }
 0x4e8   :  { %v553_v54 = vpop.permute.xlu1 %552 }
 0x4e9   :  { %v555_v55 = vadd.f32 %v2785_v45, %v553_v54 }
 0x4eb   :  { %557 = vst.msk [vmem:[#allocation3] sm:$0xc] %vm556_vm12, %v555_v55  ;;  %v562_v56 = vrot.slane %v555_v55, 2 }
 0x4ec   :  { %558 = vst.msk [vmem:[#allocation3 + $0xa] sm:$0xc] %vm288_vm6, %v555_v55 }
 0x4ed   :  { %2406 = vmatmul.mubr.msk.f32.vlgmr.msra.gmra.mrb[2].mxu1 %vm348_vm9, %v562_v56 }
 0x4ee   :  { %2541 = vmatpush1.bf16.msra.mxu1 %v3244_v19  ;;  %853 = vmatprep.mubr.f32.mxu1 %v3065_v0 }
 0x4ef   :  { %2543 = vmatprep.subr.bf16.mxu1 %v3256_v23 }
 0x4f2   :  { %2545 = vmatpush1.bf16.msra.mxu1 %v3265_v26 }
 0x4f3   :  { %2547 = vmatprep.subr.bf16.mxu1 %v3271_v28 }
 0x4f6   :  { %2549 = vmatpush1.bf16.msra.mxu1 %v3288_v33 }
 0x4f7   :  { %2551 = vmatprep.subr.bf16.mxu1 %v3295_v35 }
 0x4fa   :  { %2553 = vmatpush1.bf16.msra.mxu1 %v3307_v38 }
 0x4fb   :  { %2571 = vmatprep.subr.bf16.mxu1 %v3233_v15 }
 0x5c0   :  { %v631_v57 = vpop.f32.mrb[2].mxu1 }
 0x5c1   :  { %v637_v58 = vrot.slane %v631_v57, 4  ;;  %v633_v59 = vpop.f32.mrb[3].mxu1 }
 0x5c2   :  { %v646_v2 = vadd.f32 %v3367_v5, %v633_v59 }
 0x5c3   :  { %v639_v61 = vadd.f32 %v637_v58, %v559_v60 }
 0x5c4   :  { %v648_v3 = vrot.slane %v646_v2, 4 }
 0x5c5   :  { %v2407_v62 = vmul.f32 -1.442695, %v639_v61 }
 0x5c7   :  { %2786 = vpow2.f32 %v2407_v62 }
 0x5d1   :  { %v2787_v63 = vpop.eup %2786 }
 0x5d2   :  { %v643_v1 = vadd.f32 1.0, %v2787_v63 }
 0x5d4   :  { %2788 = vrcp.f32 %v643_v1 }
 0x5de   :  { %v2789_v4 = vpop.eup %2788 }
 0x5df   :  { %v650_v6 = vmul.f32 %v2789_v4, %v648_v3 }
 0x5e1   :  { %v651_v8 = vadd.f32 %v650_v6, %v560_v7 }
 0x5e3   :  { %2790 = vtanh.f32 %v651_v8 }
 0x5ed   :  { %v2791_v9 = vpop.eup %2790 }
 0x5ee   :  { %v654_v10 = vrot.slane %v2791_v9, 2 }
 0x5f0   :  { %v656_v11 = vsub.f32 %v555_v55, %v654_v10 }
 0x5f2   :  { %v658_v12 = vrot.slane %v656_v11, 6 }
 0x5f4   :  { %659 = vrot.lane.b32.xlu0 %v658_v12, %s3067_s3 }
 0x666   :  { %v660_v13 = vpop.permute.xlu0 %659 }
 0x667   :  { %v662_v14 = vmul.f32 %v2789_v4, %v660_v13  ;;  %v321_v13 = vrot.slane %v3340_v47, 2 }
 0x669   :  { %664 = vrot.lane.b32.xlu1 %v662_v14, %s3067_s3 }
 0x6db   :  { %v665_v16 = vpop.permute.xlu1 %664 }
 0x6dc   :  { %v667_v17 = vadd.f32 %v2791_v9, %v665_v16 }
 0x6de   :  { %669 = vst.msk [vmem:[#allocation3] sm:$0x30] %vm668_vm13, %v667_v17  ;;  %v674_v18 = vrot.slane %v667_v17, 4 }
 0x6df   :  { %670 = vst.msk [vmem:[#allocation3 + $0x6] sm:$0x30] %vm298_vm3, %v667_v17 }
 0x6e0   :  { %2408 = vmatmul.mubr.msk.f32.vlgmr.msra.gmra.mrb[6].mxu0 %vm348_vm9, %v674_v18 }
 0x6e1   :  { %2557 = vmatpush1.bf16.msra.mxu0 %v3244_v19  ;;  %957 = vmatprep.mubr.f32.mxu0 %v3065_v0 }
 0x6e2   :  { %2559 = vmatprep.subr.bf16.mxu0 %v3256_v23 }
 0x6e5   :  { %2561 = vmatpush1.bf16.msra.mxu0 %v3265_v26 }
 0x6e6   :  { %2563 = vmatprep.subr.bf16.mxu0 %v3271_v28 }
 0x6e9   :  { %2565 = vmatpush1.bf16.msra.mxu0 %v3288_v33 }
 0x6ea   :  { %2567 = vmatprep.subr.bf16.mxu0 %v3295_v35 }
 0x6ed   :  { %2569 = vmatpush1.bf16.msra.mxu0 %v3307_v38 }
 0x6ee   :  { %2587 = vmatprep.subr.bf16.mxu0 %v3233_v15 }
 0x7b3   :  { %v743_v20 = vpop.f32.mrb[6].mxu0 }
 0x7b4   :  { %v749_v21 = vrot.slane %v743_v20, 2  ;;  %v745_v22 = vpop.f32.mrb[7].mxu0 }
 0x7b5   :  { %v758_v31 = vadd.f32 %v3367_v5, %v745_v22 }
 0x7b6   :  { %v751_v25 = vadd.f32 %v749_v21, %v671_v24 }
 0x7b7   :  { %v760_v32 = vrot.slane %v758_v31, 2 }
 0x7b8   :  { %v2409_v27 = vmul.f32 -1.442695, %v751_v25 }
 0x7ba   :  { %2792 = vpow2.f32 %v2409_v27 }
 0x7c4   :  { %v2793_v29 = vpop.eup %2792 }
 0x7c5   :  { %v755_v30 = vadd.f32 1.0, %v2793_v29 }
 0x7c7   :  { %2794 = vrcp.f32 %v755_v30 }
 0x7d1   :  { %v2795_v34 = vpop.eup %2794 }
 0x7d2   :  { %v762_v36 = vmul.f32 %v2795_v34, %v760_v32 }
 0x7d4   :  { %v763_v39 = vadd.f32 %v762_v36, %v672_v37 }
 0x7d6   :  { %2796 = vtanh.f32 %v763_v39 }
 0x7e0   :  { %v2797_v42 = vpop.eup %2796 }
 0x7e1   :  { %v766_v15 = vrot.slane %v2797_v42, 2 }
 0x7e3   :  { %v768_v44 = vsub.f32 %v667_v17, %v766_v15 }
 0x7e5   :  { %v770_v45 = vrot.slane %v768_v44, 6 }
 0x7e7   :  { %771 = vrot.lane.b32.xlu0 %v770_v45, %s3067_s3 }
 0x7eb   :  { %254 = vrot.lane.b32.xlu0 %v3348_v51, %s3066_s30 }
 0x7ef   :  { %315 = vrot.lane.b32.xlu0 %v314_v46, %s3068_s13 }
 0x859   :  { %v772_v48 = vpop.permute.xlu0 %771 }
 0x85a   :  { %v774_v50 = vmul.f32 %v2795_v34, %v772_v48 }
 0x85c   :  { %776 = vrot.lane.b32.xlu1 %v774_v50, %s3067_s3 }
 0x85d   :  { %v255_v52 = vpop.permute.xlu0 %254 }
 0x85e   :  { %260 = vst.msk [vmem:[#allocation2 + $0x10] sm:$0xff] %vm258_vm1, %v255_v52 }
 0x860   :  { %309 = vrot.lane.b32.xlu1 %v308_v53, %s3067_s3 }
 0x861   :  { %v316_v58 = vpop.permute.xlu0 %315 }
 0x864   :  { %263 = vrot.lane.b32.xlu1 %v3348_v51, %s3067_s3  ;;  %v326_v51 = vrot.slane %v3342_v49, 2 }
 0x8ce   :  { %v777_v54 = vpop.permute.xlu1 %776 }
 0x8cf   :  { %v779_v55 = vadd.f32 %v2797_v42, %v777_v54 }
 0x8d1   :  { %781 = vst.msk [vmem:[#allocation3] sm:$0xc0] %vm780_vm14, %v779_v55  ;;  %v786_v56 = vrot.slane %v779_v55, 6 }
 0x8d2   :  { %782 = vst.msk [vmem:[#allocation3 + $0x2] sm:$0xc0] %vm303_vm7, %v779_v55  ;;  %v310_v57 = vpop.permute.xlu1 %309 }
 0x8d3   :  { %312 = vst.msk [vmem:[#allocation2 + $0x10] sm:$0x3] %vm273_vm2, %v310_v57  ;;  %2410 = vmatmul.mubr.msk.f32.vlgmr.msra.gmra.mrb[4].mxu1 %vm348_vm9, %v786_v56 }
 0x8d4   :  { %333 = vst.msk [vmem:[#allocation2 + $0x10] sm:$0x30] %vm298_vm3, %v310_v57  ;;  %2573 = vmatpush1.bf16.msra.mxu1 %v3244_v19  ;;  %1068 = vmatprep.mubr.f32.mxu1 %v3065_v0 }
 0x8d5   :  { %318 = vst.msk [vmem:[#allocation2 + $0x10] sm:$0x3] %vm280_vm4, %v316_v58  ;;  %2575 = vmatprep.subr.bf16.mxu1 %v3256_v23 }
 0x8d6   :  { %334 = vst.msk [vmem:[#allocation2 + $0x10] sm:$0x30] %vm300_vm5, %v316_v58  ;;  %v264_v59 = vpop.permute.xlu1 %263 }
 0x8d7   :  { %268 = vst.msk [vmem:[#allocation2 + $0x18] sm:$0xff] %vm164_vm0, %v264_v59 }
 0x8d8   :  { %320 = vst.msk [vmem:[#allocation2 + $0x18] sm:$0x3] %vm273_vm2, %v314_v46  ;;  %2577 = vmatpush1.bf16.msra.mxu1 %v3265_v26 }
 0x8d9   :  { %332 = vst.msk [vmem:[#allocation2 + $0x18] sm:$0xc] %vm288_vm6, %v326_v51  ;;  %2579 = vmatprep.subr.bf16.mxu1 %v3271_v28 }
 0x8da   :  { %335 = vst.msk [vmem:[#allocation2 + $0x18] sm:$0x30] %vm298_vm3, %v314_v46 }
 0x8db   :  { %338 = vst.msk [vmem:[#allocation2 + $0x18] sm:$0xc0] %vm303_vm7, %v326_v51 }
 0x8dc   :  { %2581 = vmatpush1.bf16.msra.mxu1 %v3288_v33  ;;  %v783_v49 = vld [vmem:[#allocation2 + $0x10] sm:$0x3] }
 0x8dd   :  { %2583 = vmatprep.subr.bf16.mxu1 %v3295_v35  ;;  %v998_v50 = vld [vmem:[#allocation2 + $0x10] sm:$0x30] }
 0x8df   :  { %v784_v7 = vld [vmem:[#allocation2 + $0x18] sm:$0x3] }
 0x8e0   :  { %2585 = vmatpush1.bf16.msra.mxu1 %v3307_v38 }
 0x8e1   :  { %v999_v59 = vld [vmem:[#allocation2 + $0x18] sm:$0x30] }
 0x9a6   :  { %v855_v60 = vpop.f32.mrb[4].mxu1 }
 0x9a7   :  { %v860_v61 = vadd.f32 %v855_v60, %v783_v49  ;;  %v857_v62 = vpop.f32.mrb[5].mxu1 }
 0x9a8   :  { %v867_v3 = vadd.f32 %v3367_v5, %v857_v62 }
 0x9a9   :  { %v2411_v63 = vmul.f32 -1.442695, %v860_v61 }
 0x9ab   :  { %2798 = vpow2.f32 %v2411_v63 }
 0x9b5   :  { %v2799_v1 = vpop.eup %2798 }
 0x9b6   :  { %v864_v2 = vadd.f32 1.0, %v2799_v1 }
 0x9b8   :  { %2800 = vrcp.f32 %v864_v2 }
 0x9c2   :  { %v2801_v4 = vpop.eup %2800 }
 0x9c3   :  { %v868_v6 = vmul.f32 %v2801_v4, %v867_v3 }
 0x9c5   :  { %v869_v8 = vadd.f32 %v868_v6, %v784_v7 }
 0x9c7   :  { %2802 = vtanh.f32 %v869_v8 }
 0x9d1   :  { %v2803_v9 = vpop.eup %2802 }
 0x9d2   :  { %v872_v10 = vrot.slane %v2803_v9, 2 }
 0x9d4   :  { %v874_v11 = vsub.f32 %v779_v55, %v872_v10 }
 0x9d6   :  { %v876_v12 = vrot.slane %v874_v11, 6 }
 0x9d8   :  { %877 = vrot.lane.b32.xlu0 %v876_v12, %s3067_s3 }
 0x9dc   :  { %322 = vrot.lane.b32.xlu0 %v321_v13, %s3067_s3 }
 0xa4a   :  { %v878_v14 = vpop.permute.xlu0 %877 }
 0xa4b   :  { %v880_v16 = vmul.f32 %v2801_v4, %v878_v14 }
 0xa4d   :  { %882 = vrot.lane.b32.xlu1 %v880_v16, %s3067_s3 }
 0xa4e   :  { %v323_v17 = vpop.permute.xlu0 %322 }
 0xa4f   :  { %325 = vst.msk [vmem:[#allocation2 + $0x10] sm:$0xc] %vm288_vm6, %v323_v17 }
 0xa50   :  { %336 = vst.msk [vmem:[#allocation2 + $0x10] sm:$0xc0] %vm303_vm7, %v323_v17 }
 0xa51   :  { %327 = vrot.lane.b32.xlu1 %v326_v51, %s3068_s13 }
 0xabf   :  { %v883_v18 = vpop.permute.xlu1 %882 }
 0xac0   :  { %v885_v20 = vadd.f32 %v2803_v9, %v883_v18 }
 0xac2   :  { %886 = vst.msk [vmem:[#allocation3 + $0x8] sm:$0x3] %vm445_vm8, %v885_v20  ;;  %2412 = vmatmul.mubr.msk.f32.vlgmr.msra.gmra.mrb[8].mxu0 %vm348_vm9, %v885_v20 }
 0xac3   :  { %887 = vst.msk [vmem:[#allocation3 + $0x6] sm:$0x3] %vm273_vm2, %v885_v20  ;;  %v328_v47 = vpop.permute.xlu1 %327  ;;  %2589 = vmatpush1.bf16.msra.mxu0 %v3244_v19  ;;  %1179 = vmatprep.mubr.f32.mxu0 %v3065_v0 }
 0xac4   :  { %330 = vst.msk [vmem:[#allocation2 + $0x10] sm:$0xc] %vm294_vm10, %v328_v47  ;;  %2591 = vmatprep.subr.bf16.mxu0 %v3256_v23 }
 0xac5   :  { %337 = vst.msk [vmem:[#allocation2 + $0x10] sm:$0xc0] %vm305_vm11, %v328_v47  ;;  %v1110_v47 = vld [vmem:[#allocation2 + $0x18] sm:$0xc0] }
 0xac7   :  { %2593 = vmatpush1.bf16.msra.mxu0 %v3265_v26 }
 0xac8   :  { %2595 = vmatprep.subr.bf16.mxu0 %v3271_v28 }
 0xacb   :  { %2597 = vmatpush1.bf16.msra.mxu0 %v3288_v33  ;;  %v888_v24 = vld [vmem:[#allocation2 + $0x10] sm:$0xc]  ;;  %v889_v33 = vld [vmem:[#allocation2 + $0x18] sm:$0xc] }
 0xacc   :  { %2599 = vmatprep.subr.bf16.mxu0 %v3295_v35  ;;  %v1109_v10 = vld [vmem:[#allocation2 + $0x10] sm:$0xc0] }
 0xacf   :  { %2601 = vmatpush1.bf16.msra.mxu0 %v3307_v38 }
 0xb95   :  { %v959_v21 = vpop.f32.mrb[8].mxu0 }
 0xb96   :  { %v965_v19 = vrot.slane %v959_v21, 6  ;;  %v961_v22 = vpop.f32.mrb[9].mxu0 }
 0xb97   :  { %v974_v23 = vadd.f32 %v3367_v5, %v961_v22  ;;  %v1241_v22 = vld [vmem:[#allocation9 + $0x18] sm:$0xff] }
 0xb98   :  { %v967_v25 = vadd.f32 %v965_v19, %v888_v24  ;;  %v1239_v19 = vld [vmem:[#allocation9 + $0x8] sm:$0xff]  ;;  %v1238_v24 = vld [vmem:[#allocation9] sm:$0xff] }
 0xb99   :  { %v976_v26 = vrot.slane %v974_v23, 6 }
 0xb9a   :  { %v2413_v27 = vmul.f32 -1.442695, %v967_v25  ;;  %v2602_v25 = vpack.c.bf16 %v1241_v22, %v1239_v19 }
 0xb9c   :  { %2804 = vpow2.f32 %v2413_v27  ;;  %v1240_v27 = vld [vmem:[#allocation9 + $0x10] sm:$0xff]  ;;  %2603 = vmatprep.subr.bf16.mxu1 %v2602_v25 }
 0xb9d   :  { %v2604_v23 = vpack.c.bf16 %v1240_v27, %v1238_v24 }
 0xba6   :  { %v2805_v29 = vpop.eup %2804 }
 0xba7   :  { %v971_v30 = vadd.f32 1.0, %v2805_v29  ;;  %v1243_v29 = vld [vmem:[#allocation9 + $0x28] sm:$0xff] }
 0xba9   :  { %2806 = vrcp.f32 %v971_v30  ;;  %v1245_v30 = vld [vmem:[#allocation9 + $0x38] sm:$0xff] }
 0xbb3   :  { %v2807_v28 = vpop.eup %2806 }
 0xbb4   :  { %v978_v31 = vmul.f32 %v2807_v28, %v976_v26  ;;  %v2606_v26 = vpack.c.bf16 %v1245_v30, %v1243_v29 }
 0xbb6   :  { %v979_v32 = vadd.f32 %v978_v31, %v889_v33  ;;  %v1244_v31 = vld [vmem:[#allocation9 + $0x30] sm:$0xff] }
 0xbb8   :  { %2808 = vtanh.f32 %v979_v32 }
 0xbc2   :  { %v2809_v35 = vpop.eup %2808 }
 0xbc3   :  { %v982_v38 = vrot.slane %v2809_v35, 2 }
 0xbc5   :  { %v984_v34 = vsub.f32 %v885_v20, %v982_v38 }
 0xbc7   :  { %v986_v36 = vrot.slane %v984_v34, 6  ;;  %v1247_v34 = vld [vmem:[#allocation9 + $0x48] sm:$0xff] }
 0xbc9   :  { %987 = vrot.lane.b32.xlu0 %v986_v36, %s3067_s3  ;;  %v1249_v36 = vld [vmem:[#allocation9 + $0x58] sm:$0xff] }
 0xc3b   :  { %v988_v37 = vpop.permute.xlu0 %987 }
 0xc3c   :  { %v990_v39 = vmul.f32 %v2807_v28, %v988_v37  ;;  %v1242_v28 = vld [vmem:[#allocation9 + $0x20] sm:$0xff]  ;;  %v2610_v37 = vpack.c.bf16 %v1249_v36, %v1247_v34 }
 0xc3e   :  { %992 = vrot.lane.b32.xlu1 %v990_v39, %s3067_s3  ;;  %v1246_v39 = vld [vmem:[#allocation9 + $0x40] sm:$0xff] }
 0xcb0   :  { %v993_v42 = vpop.permute.xlu1 %992 }
 0xcb1   :  { %v995_v15 = vadd.f32 %v2809_v35, %v993_v42  ;;  %v1248_v42 = vld [vmem:[#allocation9 + $0x50] sm:$0xff] }
 0xcb3   :  { %996 = vst.msk [vmem:[#allocation3 + $0x8] sm:$0xc] %vm556_vm12, %v995_v15  ;;  %v1001_v44 = vrot.slane %v995_v15, 2 }
 0xcb4   :  { %997 = vst.msk [vmem:[#allocation3 + $0x2] sm:$0xc] %vm288_vm6, %v995_v15 }
 0xcb5   :  { %2414 = vmatmul.mubr.msk.f32.vlgmr.msra.gmra.mrb[6].mxu1 %vm348_vm9, %v1001_v44  ;;  %v1251_v44 = vld [vmem:[#allocation9 + $0x68] sm:$0xff] }
 0xcb6   :  { %1336 = vmatprep.mubr.f32.mxu1 %v3065_v0  ;;  %2605 = vmatpush1.bf16.msra.mxu1 %v2604_v23 }
 0xcb7   :  { %2607 = vmatprep.subr.bf16.mxu1 %v2606_v26 }
 0xd88   :  { %v1070_v45 = vpop.f32.mrb[6].mxu1 }
 0xd89   :  { %v1076_v46 = vrot.slane %v1070_v45, 4  ;;  %v1072_v48 = vpop.f32.mrb[7].mxu1  ;;  %v1253_v45 = vld [vmem:[#allocation9 + $0x78] sm:$0xff] }
 0xd8a   :  { %v1085_v56 = vadd.f32 %v3367_v5, %v1072_v48  ;;  %v2614_v48 = vpack.c.bf16 %v1253_v45, %v1251_v44 }
 0xd8b   :  { %v1078_v52 = vadd.f32 %v1076_v46, %v998_v50  ;;  %v1250_v46 = vld [vmem:[#allocation9 + $0x60] sm:$0xff]  ;;  %v1252_v50 = vld [vmem:[#allocation9 + $0x70] sm:$0xff] }
 0xd8c   :  { %v1087_v57 = vrot.slane %v1085_v56, 4  ;;  %v1225_v56 = vld [vmem:[#allocation10 + $0x18] sm:$0xff] }
 0xd8d   :  { %v2415_v53 = vmul.f32 -1.442695, %v1078_v52  ;;  %v2616_v52 = vpack.c.bf16 %v1252_v50, %v1250_v46 }
 0xd8f   :  { %2810 = vpow2.f32 %v2415_v53 }
 0xd99   :  { %v2811_v54 = vpop.eup %2810 }
 0xd9a   :  { %v1082_v55 = vadd.f32 1.0, %v2811_v54 }
 0xd9c   :  { %2812 = vrcp.f32 %v1082_v55  ;;  %v1223_v55 = vld [vmem:[#allocation10 + $0x8] sm:$0xff] }
 0xda6   :  { %v2813_v58 = vpop.eup %2812 }
 0xda7   :  { %v1089_v51 = vmul.f32 %v2813_v58, %v1087_v57  ;;  %v1222_v57 = vld [vmem:[#allocation10] sm:$0xff] }
 0xda9   :  { %v1090_v49 = vadd.f32 %v1089_v51, %v999_v59  ;;  %v1224_v51 = vld [vmem:[#allocation10 + $0x10] sm:$0xff]  ;;  %v1227_v59 = vld [vmem:[#allocation10 + $0x28] sm:$0xff] }
 0xdab   :  { %2814 = vtanh.f32 %v1090_v49  ;;  %v1229_v49 = vld [vmem:[#allocation10 + $0x38] sm:$0xff] }
 0xdb5   :  { %v2815_v60 = vpop.eup %2814 }
 0xdb6   :  { %v1093_v61 = vrot.slane %v2815_v60, 2 }
 0xdb8   :  { %v1095_v62 = vsub.f32 %v995_v15, %v1093_v61  ;;  %v2612_v15 = vpack.c.bf16 %v1248_v42, %v1246_v39  ;;  %v3499_v61 = vpack.c.bf16 %v1229_v49, %v1227_v59  ;;  %v3577_v42 = vld [vmem:[#allocation13] ss:$0 sm:$0xff] }
 0xdba   :  { %v1097_v63 = vrot.slane %v1095_v62, 6  ;;  %v1226_v62 = vld [vmem:[#allocation10 + $0x20] sm:$0xff] }
 0xdbc   :  { %1098 = vrot.lane.b32.xlu0 %v1097_v63, %s3067_s3  ;;  %v1228_v63 = vld [vmem:[#allocation10 + $0x30] sm:$0xff] }
 0xe2e   :  { %v1099_v1 = vpop.permute.xlu0 %1098 }
 0xe2f   :  { %v1101_v2 = vmul.f32 %v2813_v58, %v1099_v1  ;;  %v3495_v58 = vpack.c.bf16 %v1225_v56, %v1223_v55  ;;  %v1231_v1 = vld [vmem:[#allocation10 + $0x48] sm:$0xff] }
 0xe31   :  { %1103 = vrot.lane.b32.xlu1 %v1101_v2, %s3067_s3  ;;  %2619 = vmatprep.subr.bf16.mxu0 %v3495_v58  ;;  %v1233_v2 = vld [vmem:[#allocation10 + $0x58] sm:$0xff] }
 0xea3   :  { %v1104_v3 = vpop.permute.xlu1 %1103 }
 0xea4   :  { %v1106_v4 = vadd.f32 %v2815_v60, %v1104_v3  ;;  %v3497_v60 = vpack.c.bf16 %v1224_v51, %v1222_v57  ;;  %v3504_v3 = vpack.c.bf16 %v1228_v63, %v1226_v62 }
 0xea6   :  { %1107 = vst.msk [vmem:[#allocation3 + $0x8] sm:$0x30] %vm668_vm13, %v1106_v4  ;;  %v1112_v6 = vrot.slane %v1106_v4, 4 }
 0xea7   :  { %1108 = vst.msk [vmem:[#allocation3 - $0x2] sm:$0x30] %vm298_vm3, %v1106_v4 }
 0xea8   :  { %2416 = vmatmul.mubr.msk.f32.vlgmr.msra.gmra.mrb[10].mxu0 %vm348_vm9, %v1112_v6  ;;  %v1230_v6 = vld [vmem:[#allocation10 + $0x40] sm:$0xff] }
 0xea9   :  { %1504 = vmatprep.mubr.f32.mxu0 %v3065_v0  ;;  %2621 = vmatpush1.bf16.msra.mxu0 %v3497_v60 }
 0xeaa   :  { %2623 = vmatprep.subr.bf16.mxu0 %v3499_v61 }
 0xead   :  { %2625 = vmatpush1.bf16.msra.mxu0 %v3504_v3 }
 0xf7b   :  { %v1181_v7 = vpop.f32.mrb[10].mxu0 }
 0xf7c   :  { %v1187_v8 = vrot.slane %v1181_v7, 2  ;;  %v1183_v9 = vpop.f32.mrb[11].mxu0  ;;  %v1232_v7 = vld [vmem:[#allocation10 + $0x50] sm:$0xff] }
 0xf7d   :  { %v1196_v16 = vadd.f32 %v3367_v5, %v1183_v9  ;;  %v2608_v5 = vpack.c.bf16 %v1244_v31, %v1242_v28  ;;  %v1237_v9 = vld [vmem:[#allocation10 + $0x78] sm:$0xff] }
 0xf7e   :  { %v1189_v11 = vadd.f32 %v1187_v8, %v1109_v10  ;;  %v1235_v8 = vld [vmem:[#allocation10 + $0x68] sm:$0xff]  ;;  %v3510_v10 = vpack.c.bf16 %v1232_v7, %v1230_v6 }
 0xf7f   :  { %v1198_v17 = vrot.slane %v1196_v16, 2  ;;  %2609 = vmatpush1.bf16.msra.mxu1 %v2608_v5 }
 0xf80   :  { %v2417_v12 = vmul.f32 -1.442695, %v1189_v11  ;;  %2611 = vmatprep.subr.bf16.mxu1 %v2610_v37  ;;  %v3513_v11 = vpack.c.bf16 %v1237_v9, %v1235_v8 }
 0xf82   :  { %2816 = vpow2.f32 %v2417_v12  ;;  %v1234_v12 = vld [vmem:[#allocation10 + $0x60] sm:$0xff] }
 0xf83   :  { %2613 = vmatpush1.bf16.msra.mxu1 %v2612_v15 }
 0xf84   :  { %2615 = vmatprep.subr.bf16.mxu1 %v2614_v48 }
 0xf87   :  { %2617 = vmatpush1.bf16.msra.mxu1 %v2616_v52 }
 0xf88   :  { %2635 = vmatprep.subr.bf16.mxu1 %v3495_v58 }
 0xf8c   :  { %v2817_v13 = vpop.eup %2816 }
 0xf8d   :  { %v1193_v14 = vadd.f32 1.0, %v2817_v13  ;;  %v1236_v13 = vld [vmem:[#allocation10 + $0x70] sm:$0xff] }
 0xf8f   :  { %2818 = vrcp.f32 %v1193_v14  ;;  %v3516_v14 = vpack.c.bf16 %v1236_v13, %v1234_v12 }
 0xf99   :  { %v2819_v18 = vpop.eup %2818 }
 0xf9a   :  { %v1200_v20 = vmul.f32 %v2819_v18, %v1198_v17 }
 0xf9c   :  { %v1201_v21 = vadd.f32 %v1200_v20, %v1110_v47  ;;  %v1254_v47 = vld [vmem:[#allocation12] sm:$0x3] }
 0xf9d   :  { %v1263_v19 = vrot.slane %v1254_v47, %v160_v43 }
 0xf9e   :  { %2820 = vtanh.f32 %v1201_v21  ;;  %v1259_v21 = vrot.slane %v1254_v47, %v156_v41 }
 0xfa8   :  { %v3490_v33 = vpop.eup %2820 }
 0xfa9   :  { %v1204_v32 = vrot.slane %v3490_v33, 2 }
 0xfab   :  { %v1206_v35 = vsub.f32 %v1106_v4, %v1204_v32  ;;  %v3507_v4 = vpack.c.bf16 %v1233_v2, %v1231_v1 }
 0xfad   :  { %v1208_v38 = vrot.slane %v1206_v35, 6  ;;  %2627 = vmatprep.subr.bf16.mxu0 %v3507_v4 }
 0xfae   :  { %2629 = vmatpush1.bf16.msra.mxu0 %v3510_v10 }
 0xfaf   :  { %1209 = vrot.lane.b32.xlu0 %v1208_v38, %s3067_s3  ;;  %2631 = vmatprep.subr.bf16.mxu0 %v3513_v11 }
 0xfb2   :  { %2633 = vmatpush1.bf16.msra.mxu0 %v3516_v14 }
 0xfb3   :  { %2651 = vmatprep.subr.bf16.mxu0 %v3495_v58 }
 0xfb5   :  { %1505 = vmatmul.mubr.f32.vlgmr.msra.gmra.mrb[12].mxu0 %v3065_v0 }
 0xfb6   :  { %2653 = vmatpush1.bf16.msra.mxu0 %v3497_v60  ;;  %1711 = vmatprep.mubr.f32.mxu0 %v3065_v0 }
 0xfb7   :  { %2655 = vmatprep.subr.bf16.mxu0 %v3499_v61 }
 0xfba   :  { %2657 = vmatpush1.bf16.msra.mxu0 %v3504_v3 }
 0xfbb   :  { %2659 = vmatprep.subr.bf16.mxu0 %v3507_v4 }
 0xfbe   :  { %2661 = vmatpush1.bf16.msra.mxu0 %v3510_v10 }
 0xfbf   :  { %2663 = vmatprep.subr.bf16.mxu0 %v3513_v11 }
 0xfc2   :  { %2665 = vmatpush1.bf16.msra.mxu0 %v3516_v14 }
 0xfc3   :  { %2683 = vmatprep.subr.bf16.mxu0 %v3495_v58 }
0x1021   :  { %v1210_v53 = vpop.permute.xlu0 %1209 }
0x1022   :  { %v1212_v54 = vmul.f32 %v2819_v18, %v1210_v53 }
0x1024   :  { %1214 = vrot.lane.b32.xlu1 %v1212_v54, %s3067_s3 }
0x1088   :  { %v1506_v30 = vpop.f32.mrb[12].mxu0 }
0x1089   :  { %v1508_v26 = vpop.f32.mrb[13].mxu0 }
0x108a   :  { %v1518_v15 = vadd.f32 %v3577_v42, %v1508_v26 }
0x1096   :  { %v1215_v16 = vpop.permute.xlu1 %1214 }
0x1097   :  { %v1217_v17 = vadd.f32 %v3490_v33, %v1215_v16 }
0x1099   :  { %1218 = vst.msk [vmem:[#allocation3 + $0x8] sm:$0xc0] %vm780_vm14, %v1217_v17 }
0x109a   :  { %1219 = vst.msk [vmem:[#allocation3 - $0x6] sm:$0xc0] %vm303_vm7, %v1217_v17 }
0x10a0   :  { %v1221_v20 = vld [vmem:[#allocation3 + $0x8] sm:$0xff] }
0x10a1   :  { %v1220_v18 = vld [vmem:[#allocation3] sm:$0xff] }
0x10a2   :  { %2418 = vmatmul.mubr.msk.f32.vlgmr.msra.gmra.mrb[8].mxu1 %vm348_vm9, %v1220_v18 }
0x10a3   :  { %1342 = vmatprep.mubr.f32.mxu1 %v3065_v0  ;;  %2637 = vmatpush1.bf16.msra.mxu1 %v3497_v60 }
0x10a4   :  { %2639 = vmatprep.subr.bf16.mxu1 %v3499_v61 }
0x10a6   :  { %2419 = vmatmul.mubr.msk.f32.gmra.mrb[10].mxu1 %vm348_vm9, %v1221_v20 }
0x10a7   :  { %2641 = vmatpush1.bf16.msra.mxu1 %v3504_v3  ;;  %1602 = vmatprep.mubr.f32.mxu1 %v3065_v0 }
0x10a8   :  { %2643 = vmatprep.subr.bf16.mxu1 %v3507_v4 }
0x10ab   :  { %2645 = vmatpush1.bf16.msra.mxu1 %v3510_v10 }
0x10ac   :  { %2647 = vmatprep.subr.bf16.mxu1 %v3513_v11 }
0x10af   :  { %2649 = vmatpush1.bf16.msra.mxu1 %v3516_v14 }
0x10b0   :  { %2667 = vmatprep.subr.bf16.mxu1 %v3495_v58 }
0x1175   :  { %v1338_v22 = vpop.f32.mrb[8].mxu1 }
0x1176   :  { %v3550_v24 = vadd.f32 %v1338_v22, %v1259_v21  ;;  %v1340_v25 = vpop.f32.mrb[9].mxu1 }
0x1177   :  { %v3552_v27 = vadd.f32 %v1340_v25, %v1263_v19 }
0x1178   :  { %1349 = vst.msk [vmem:[#allocation2] sm:$0xff] %vm164_vm0, %v3550_v24  ;;  %1353 = vrot.lane.b32.xlu0 %v3550_v24, %s3066_s30 }
0x1179   :  { %v1344_v29 = vpop.f32.mrb[10].mxu1 }
0x117a   :  { %v3558_v23 = vadd.f32 %v1344_v29, %v1259_v21  ;;  %v1346_v41 = vpop.f32.mrb[11].mxu1 }
0x117b   :  { %v1347_v40 = vadd.f32 %v1346_v41, %v1263_v19 }
0x117c   :  { %1350 = vst.msk [vmem:[#allocation2 + $0x10] sm:$0xff] %vm164_vm0, %v3558_v23  ;;  %v1369_v43 = vrot.slane %v3558_v23, 6  ;;  %v1382_v53 = vrot.slane %v3558_v23, 2 }
0x117d   :  { %v1375_v28 = vrot.slane %v1347_v40, 6  ;;  %v1387_v32 = vrot.slane %v1347_v40, 2 }
0x117e   :  { %1370 = vrot.lane.b32.xlu1 %v1369_v43, %s3067_s3 }
0x117f   :  { %1376 = vrot.lane.b32.xlu0 %v1375_v28, %s3068_s13 }
0x1182   :  { %1361 = vrot.lane.b32.xlu1 %v3550_v24, %s3067_s3 }
0x11ea   :  { %v1354_v31 = vpop.permute.xlu0 %1353 }
0x11eb   :  { %1359 = vst.msk [vmem:[#allocation2] sm:$0xff] %vm258_vm1, %v1354_v31 }
0x11f0   :  { %v1371_v33 = vpop.permute.xlu1 %1370 }
0x11f1   :  { %1373 = vst.msk [vmem:[#allocation2] sm:$0x3] %vm273_vm2, %v1371_v33  ;;  %v1377_v5 = vpop.permute.xlu0 %1376 }
0x11f2   :  { %1394 = vst.msk [vmem:[#allocation2] sm:$0x30] %vm298_vm3, %v1371_v33 }
0x11f3   :  { %1379 = vst.msk [vmem:[#allocation2] sm:$0x3] %vm280_vm4, %v1377_v5 }
0x11f4   :  { %1395 = vst.msk [vmem:[#allocation2] sm:$0x30] %vm300_vm5, %v1377_v5  ;;  %v1362_v35 = vpop.permute.xlu1 %1361 }
0x11f5   :  { %1367 = vst.msk [vmem:[#allocation2 + $0x8] sm:$0xff] %vm164_vm0, %v1362_v35 }
0x11f6   :  { %1381 = vst.msk [vmem:[#allocation2 + $0x8] sm:$0x3] %vm273_vm2, %v1375_v28 }
0x11f7   :  { %1393 = vst.msk [vmem:[#allocation2 + $0x8] sm:$0xc] %vm288_vm6, %v1387_v32 }
0x11f8   :  { %1396 = vst.msk [vmem:[#allocation2 + $0x8] sm:$0x30] %vm298_vm3, %v1375_v28 }
0x11f9   :  { %1399 = vst.msk [vmem:[#allocation2 + $0x8] sm:$0xc0] %vm303_vm7, %v1387_v32 }
0x11fa   :  { %v1438_v38 = vld [vmem:[#allocation2] sm:$0x3] }
0x11fb   :  { %v1511_v34 = vadd.f32 %v1506_v30, %v1438_v38  ;;  %v1641_v28 = vld [vmem:[#allocation2] sm:$0x30] }
0x11fd   :  { %v2421_v36 = vmul.f32 -1.442695, %v1511_v34  ;;  %v1439_v46 = vld [vmem:[#allocation2 + $0x8] sm:$0x3] }
0x11fe   :  { %v1534_v17 = vld [vmem:[#allocation2 + $0x8] sm:$0xc] }
0x11ff   :  { %2822 = vpow2.f32 %v2421_v36 }
0x1209   :  { %v2823_v37 = vpop.eup %2822 }
0x120a   :  { %v1515_v39 = vadd.f32 1.0, %v2823_v37  ;;  %v1642_v37 = vld [vmem:[#allocation2 + $0x8] sm:$0x30] }
0x120c   :  { %2824 = vrcp.f32 %v1515_v39 }
0x1216   :  { %v2825_v44 = vpop.eup %2824 }
0x1217   :  { %v1519_v45 = vmul.f32 %v2825_v44, %v1518_v15 }
0x1219   :  { %v1520_v48 = vadd.f32 %v1519_v45, %v1439_v46 }
0x121b   :  { %2826 = vtanh.f32 %v1520_v48 }
0x1225   :  { %v2827_v50 = vpop.eup %2826 }
0x1226   :  { %v1522_v52 = vsub.f32 0.0, %v2827_v50 }
0x1228   :  { %1524 = vrot.lane.b32.xlu0 %v1522_v52, %s3067_s3 }
0x122c   :  { %1383 = vrot.lane.b32.xlu0 %v1382_v53, %s3067_s3 }
0x129a   :  { %v1525_v54 = vpop.permute.xlu0 %1524 }
0x129b   :  { %v1527_v55 = vmul.f32 %v2825_v44, %v1525_v54 }
0x129d   :  { %1529 = vrot.lane.b32.xlu1 %v1527_v55, %s3067_s3 }
0x129e   :  { %v1384_v56 = vpop.permute.xlu0 %1383 }
0x129f   :  { %1386 = vst.msk [vmem:[#allocation2] sm:$0xc] %vm288_vm6, %v1384_v56 }
0x12a0   :  { %1397 = vst.msk [vmem:[#allocation2] sm:$0xc0] %vm303_vm7, %v1384_v56 }
0x12a1   :  { %1388 = vrot.lane.b32.xlu1 %v1387_v32, %s3068_s13 }
0x130f   :  { %v1530_v57 = vpop.permute.xlu1 %1529 }
0x1310   :  { %v3587_v51 = vadd.f32 %v2827_v50, %v1530_v57 }
0x1312   :  { %2422 = vmatmul.mubr.msk.f32.vlgmr.msra.gmra.mrb[12].mxu1 %vm348_vm9, %v3587_v51 }
0x1313   :  { %v1389_v59 = vpop.permute.xlu1 %1388  ;;  %2669 = vmatpush1.bf16.msra.mxu1 %v3497_v60  ;;  %1820 = vmatprep.mubr.f32.mxu1 %v3065_v0 }
0x1314   :  { %1391 = vst.msk [vmem:[#allocation2] sm:$0xc] %vm294_vm10, %v1389_v59  ;;  %2671 = vmatprep.subr.bf16.mxu1 %v3499_v61 }
0x1315   :  { %1398 = vst.msk [vmem:[#allocation2] sm:$0xc0] %vm305_vm11, %v1389_v59 }
0x1317   :  { %2673 = vmatpush1.bf16.msra.mxu1 %v3504_v3 }
0x1318   :  { %2675 = vmatprep.subr.bf16.mxu1 %v3507_v4 }
0x131b   :  { %2677 = vmatpush1.bf16.msra.mxu1 %v3510_v10  ;;  %v1533_v1 = vld [vmem:[#allocation2] sm:$0xc] }
0x131c   :  { %2679 = vmatprep.subr.bf16.mxu1 %v3513_v11  ;;  %v1750_v59 = vld [vmem:[#allocation2] sm:$0xc0] }
0x131f   :  { %2681 = vmatpush1.bf16.msra.mxu1 %v3516_v14 }
0x1320   :  { %2699 = vmatprep.subr.bf16.mxu1 %v3495_v58 }
0x13e5   :  { %v1604_v49 = vpop.f32.mrb[12].mxu1 }
0x13e6   :  { %v1610_v62 = vrot.slane %v1604_v49, 6  ;;  %v1606_v63 = vpop.f32.mrb[13].mxu1 }
0x13e7   :  { %v1619_v9 = vadd.f32 %v3577_v42, %v1606_v63 }
0x13e8   :  { %v1612_v2 = vadd.f32 %v1610_v62, %v1533_v1 }
0x13e9   :  { %v1621_v12 = vrot.slane %v1619_v9, 6  ;;  %v1751_v9 = vld [vmem:[#allocation2 + $0x8] sm:$0xc0] }
0x13ea   :  { %v2423_v6 = vmul.f32 -1.442695, %v1612_v2 }
0x13ec   :  { %2828 = vpow2.f32 %v2423_v6 }
0x13f6   :  { %v2829_v7 = vpop.eup %2828 }
0x13f7   :  { %v1616_v8 = vadd.f32 1.0, %v2829_v7 }
0x13f9   :  { %2830 = vrcp.f32 %v1616_v8 }
0x1403   :  { %v2831_v13 = vpop.eup %2830 }
0x1404   :  { %v1623_v16 = vmul.f32 %v2831_v13, %v1621_v12 }
0x1406   :  { %v1624_v18 = vadd.f32 %v1623_v16, %v1534_v17 }
0x1408   :  { %2832 = vtanh.f32 %v1624_v18  ;;  %v1406_v18 = vrot.slane %v3552_v27, 6 }
0x1412   :  { %v2833_v20 = vpop.eup %2832 }
0x1413   :  { %v1627_v47 = vrot.slane %v2833_v20, 2 }
0x1415   :  { %v1629_v21 = vsub.f32 %v3587_v51, %v1627_v47 }
0x1417   :  { %v1631_v19 = vrot.slane %v1629_v21, 6 }
0x1419   :  { %1632 = vrot.lane.b32.xlu0 %v1631_v19, %s3067_s3  ;;  %v1400_v19 = vrot.slane %v3550_v24, 6 }
0x148b   :  { %v1633_v22 = vpop.permute.xlu0 %1632 }
0x148c   :  { %v1635_v25 = vmul.f32 %v2831_v13, %v1633_v22 }
0x148e   :  { %1637 = vrot.lane.b32.xlu1 %v1635_v25, %s3067_s3 }
0x1500   :  { %v1638_v29 = vpop.permute.xlu1 %1637 }
0x1501   :  { %v1640_v30 = vadd.f32 %v2833_v20, %v1638_v29 }
0x1503   :  { %v1644_v41 = vrot.slane %v1640_v30, 2 }
0x1505   :  { %2424 = vmatmul.mubr.msk.f32.vlgmr.msra.gmra.mrb[14].mxu0 %vm348_vm9, %v1644_v41 }
0x1506   :  { %2685 = vmatpush1.bf16.msra.mxu0 %v3497_v60  ;;  %1929 = vmatprep.mubr.f32.mxu0 %v3065_v0 }
0x1507   :  { %2687 = vmatprep.subr.bf16.mxu0 %v3499_v61 }
0x150a   :  { %2689 = vmatpush1.bf16.msra.mxu0 %v3504_v3 }
0x150b   :  { %2691 = vmatprep.subr.bf16.mxu0 %v3507_v4 }
0x150e   :  { %2693 = vmatpush1.bf16.msra.mxu0 %v3510_v10 }
0x150f   :  { %2695 = vmatprep.subr.bf16.mxu0 %v3513_v11 }
0x1512   :  { %2697 = vmatpush1.bf16.msra.mxu0 %v3516_v14 }
0x1513   :  { %2715 = vmatprep.subr.bf16.mxu0 %v3495_v58 }
0x15d8   :  { %v1713_v26 = vpop.f32.mrb[14].mxu0 }
0x15d9   :  { %v1719_v40 = vrot.slane %v1713_v26, 4  ;;  %v1715_v43 = vpop.f32.mrb[15].mxu0 }
0x15da   :  { %v1728_v35 = vadd.f32 %v3577_v42, %v1715_v43 }
0x15db   :  { %v1721_v31 = vadd.f32 %v1719_v40, %v1641_v28 }
0x15dc   :  { %v1730_v38 = vrot.slane %v1728_v35, 4 }
0x15dd   :  { %v2425_v33 = vmul.f32 -1.442695, %v1721_v31 }
0x15df   :  { %2834 = vpow2.f32 %v2425_v33 }
0x15e9   :  { %v2835_v5 = vpop.eup %2834 }
0x15ea   :  { %v1725_v32 = vadd.f32 1.0, %v2835_v5 }
0x15ec   :  { %2836 = vrcp.f32 %v1725_v32 }
0x15f6   :  { %v2837_v34 = vpop.eup %2836 }
0x15f7   :  { %v1732_v36 = vmul.f32 %v2837_v34, %v1730_v38 }
0x15f9   :  { %v1733_v39 = vadd.f32 %v1732_v36, %v1642_v37 }
0x15fb   :  { %2838 = vtanh.f32 %v1733_v39 }
0x1605   :  { %v2839_v15 = vpop.eup %2838 }
0x1606   :  { %v1736_v44 = vrot.slane %v2839_v15, 2 }
0x1608   :  { %v1738_v45 = vsub.f32 %v1640_v30, %v1736_v44 }
0x160a   :  { %v1740_v46 = vrot.slane %v1738_v45, 6  ;;  %v1413_v45 = vrot.slane %v3550_v24, 2 }
0x160c   :  { %1741 = vrot.lane.b32.xlu0 %v1740_v46, %s3067_s3 }
0x167e   :  { %v1742_v48 = vpop.permute.xlu0 %1741 }
0x167f   :  { %v1744_v50 = vmul.f32 %v2837_v34, %v1742_v48 }
0x1681   :  { %1746 = vrot.lane.b32.xlu1 %v1744_v50, %s3067_s3 }
0x16f3   :  { %v1747_v52 = vpop.permute.xlu1 %1746 }
0x16f4   :  { %v1749_v53 = vadd.f32 %v2839_v15, %v1747_v52 }
0x16f6   :  { %v1753_v54 = vrot.slane %v1749_v53, 4 }
0x16f8   :  { %2426 = vmatmul.mubr.msk.f32.vlgmr.msra.gmra.mrb[14].mxu1 %vm348_vm9, %v1753_v54 }
0x16f9   :  { %2701 = vmatpush1.bf16.msra.mxu1 %v3497_v60  ;;  %2031 = vmatprep.mubr.f32.mxu1 %v3065_v0 }
0x16fa   :  { %2703 = vmatprep.subr.bf16.mxu1 %v3499_v61 }
0x16fd   :  { %2705 = vmatpush1.bf16.msra.mxu1 %v3504_v3 }
0x16fe   :  { %2707 = vmatprep.subr.bf16.mxu1 %v3507_v4 }
0x1701   :  { %2709 = vmatpush1.bf16.msra.mxu1 %v3510_v10 }
0x1702   :  { %2711 = vmatprep.subr.bf16.mxu1 %v3513_v11 }
0x1705   :  { %2713 = vmatpush1.bf16.msra.mxu1 %v3516_v14 }
0x1706   :  { %2731 = vmatprep.subr.bf16.mxu1 %v3495_v58 }
0x17cb   :  { %v1822_v55 = vpop.f32.mrb[14].mxu1 }
0x17cc   :  { %v1828_v56 = vrot.slane %v1822_v55, 2  ;;  %v1824_v57 = vpop.f32.mrb[15].mxu1 }
0x17cd   :  { %v1837_v2 = vadd.f32 %v3577_v42, %v1824_v57 }
0x17ce   :  { %v1830_v49 = vadd.f32 %v1828_v56, %v1750_v59 }
0x17cf   :  { %v1839_v6 = vrot.slane %v1837_v2, 2 }
0x17d0   :  { %v2427_v62 = vmul.f32 -1.442695, %v1830_v49 }
0x17d2   :  { %2840 = vpow2.f32 %v2427_v62 }
0x17dc   :  { %v2841_v63 = vpop.eup %2840 }
0x17dd   :  { %v1834_v1 = vadd.f32 1.0, %v2841_v63 }
0x17df   :  { %2842 = vrcp.f32 %v1834_v1 }
0x17e9   :  { %v2843_v7 = vpop.eup %2842 }
0x17ea   :  { %v1841_v8 = vmul.f32 %v2843_v7, %v1839_v6 }
0x17ec   :  { %v1842_v12 = vadd.f32 %v1841_v8, %v1751_v9 }
0x17ee   :  { %2844 = vtanh.f32 %v1842_v12 }
0x17f8   :  { %v2845_v13 = vpop.eup %2844 }
0x17f9   :  { %v1845_v58 = vrot.slane %v2845_v13, 2 }
0x17fb   :  { %v1847_v16 = vsub.f32 %v1749_v53, %v1845_v58 }
0x17fd   :  { %v1849_v17 = vrot.slane %v1847_v16, 6 }
0x17ff   :  { %1850 = vrot.lane.b32.xlu0 %v1849_v17, %s3067_s3 }
0x1803   :  { %1355 = vrot.lane.b32.xlu0 %v3558_v23, %s3066_s30 }
0x1807   :  { %1407 = vrot.lane.b32.xlu0 %v1406_v18, %s3068_s13 }
0x1871   :  { %v1851_v20 = vpop.permute.xlu0 %1850 }
0x1872   :  { %v1853_v47 = vmul.f32 %v2843_v7, %v1851_v20 }
0x1874   :  { %1855 = vrot.lane.b32.xlu1 %v1853_v47, %s3067_s3 }
0x1875   :  { %v1356_v21 = vpop.permute.xlu0 %1355 }
0x1876   :  { %1360 = vst.msk [vmem:[#allocation2 + $0x10] sm:$0xff] %vm258_vm1, %v1356_v21  ;;  %vm2380_vm1 = vcmask 123904  }
0x1878   :  { %1401 = vrot.lane.b32.xlu1 %v1400_v19, %s3067_s3 }
0x1879   :  { %v1408_v41 = vpop.permute.xlu0 %1407 }
0x187c   :  { %1363 = vrot.lane.b32.xlu1 %v3558_v23, %s3067_s3  ;;  %v1418_v23 = vrot.slane %v3552_v27, 2 }
0x18e6   :  { %v1856_v22 = vpop.permute.xlu1 %1855 }
0x18e7   :  { %v1858_v25 = vadd.f32 %v2845_v13, %v1856_v22 }
0x18e9   :  { %v1862_v29 = vrot.slane %v1858_v25, 6 }
0x18ea   :  { %v1402_v30 = vpop.permute.xlu1 %1401 }
0x18eb   :  { %1404 = vst.msk [vmem:[#allocation2 + $0x10] sm:$0x3] %vm273_vm2, %v1402_v30  ;;  %2428 = vmatmul.mubr.msk.f32.vlgmr.msra.gmra.mrb[16].mxu0 %vm348_vm9, %v1862_v29 }
0x18ec   :  { %1425 = vst.msk [vmem:[#allocation2 + $0x10] sm:$0x30] %vm298_vm3, %v1402_v30  ;;  %2717 = vmatpush1.bf16.msra.mxu0 %v3497_v60  ;;  %2140 = vmatprep.mubr.f32.mxu0 %v3065_v0 }
0x18ed   :  { %1410 = vst.msk [vmem:[#allocation2 + $0x10] sm:$0x3] %vm280_vm4, %v1408_v41  ;;  %2719 = vmatprep.subr.bf16.mxu0 %v3499_v61 }
0x18ee   :  { %1426 = vst.msk [vmem:[#allocation2 + $0x10] sm:$0x30] %vm300_vm5, %v1408_v41  ;;  %v1364_v26 = vpop.permute.xlu1 %1363 }
0x18ef   :  { %1368 = vst.msk [vmem:[#allocation2 + $0x18] sm:$0xff] %vm164_vm0, %v1364_v26 }
0x18f0   :  { %1412 = vst.msk [vmem:[#allocation2 + $0x18] sm:$0x3] %vm273_vm2, %v1406_v18  ;;  %2721 = vmatpush1.bf16.msra.mxu0 %v3504_v3 }
0x18f1   :  { %1424 = vst.msk [vmem:[#allocation2 + $0x18] sm:$0xc] %vm288_vm6, %v1418_v23  ;;  %2723 = vmatprep.subr.bf16.mxu0 %v3507_v4 }
0x18f2   :  { %1427 = vst.msk [vmem:[#allocation2 + $0x18] sm:$0x30] %vm298_vm3, %v1406_v18 }
0x18f3   :  { %1430 = vst.msk [vmem:[#allocation2 + $0x18] sm:$0xc0] %vm303_vm7, %v1418_v23 }
0x18f4   :  { %2725 = vmatpush1.bf16.msra.mxu0 %v3510_v10  ;;  %v1859_v27 = vld [vmem:[#allocation2 + $0x10] sm:$0x3] }
0x18f5   :  { %2727 = vmatprep.subr.bf16.mxu0 %v3513_v11  ;;  %v2070_v18 = vld [vmem:[#allocation2 + $0x10] sm:$0x30] }
0x18f7   :  { %v1860_v34 = vld [vmem:[#allocation2 + $0x18] sm:$0x3] }
0x18f8   :  { %2729 = vmatpush1.bf16.msra.mxu0 %v3516_v14 }
0x18f9   :  { %v2071_v41 = vld [vmem:[#allocation2 + $0x18] sm:$0x30] }
0x19be   :  { %v1931_v40 = vpop.f32.mrb[16].mxu0 }
0x19bf   :  { %v1936_v43 = vadd.f32 %v1931_v40, %v1859_v27  ;;  %v1933_v28 = vpop.f32.mrb[17].mxu0 }
0x19c0   :  { %v1943_v32 = vadd.f32 %v3577_v42, %v1933_v28 }
0x19c1   :  { %v2429_v31 = vmul.f32 -1.442695, %v1936_v43 }
0x19c3   :  { %2846 = vpow2.f32 %v2429_v31 }
0x19cd   :  { %v2847_v33 = vpop.eup %2846 }
0x19ce   :  { %v1940_v5 = vadd.f32 1.0, %v2847_v33 }
0x19d0   :  { %2848 = vrcp.f32 %v1940_v5 }
0x19da   :  { %v2849_v35 = vpop.eup %2848 }
0x19db   :  { %v1944_v38 = vmul.f32 %v2849_v35, %v1943_v32 }
0x19dd   :  { %v1945_v36 = vadd.f32 %v1944_v38, %v1860_v34 }
0x19df   :  { %2850 = vtanh.f32 %v1945_v36 }
0x19e9   :  { %v2851_v37 = vpop.eup %2850 }
0x19ea   :  { %v1948_v39 = vrot.slane %v2851_v37, 2 }
0x19ec   :  { %v1950_v15 = vsub.f32 %v1858_v25, %v1948_v39 }
0x19ee   :  { %v1952_v44 = vrot.slane %v1950_v15, 6 }
0x19f0   :  { %1953 = vrot.lane.b32.xlu0 %v1952_v44, %s3067_s3 }
0x19f4   :  { %1414 = vrot.lane.b32.xlu0 %v1413_v45, %s3067_s3 }
0x1a62   :  { %v1954_v46 = vpop.permute.xlu0 %1953 }
0x1a63   :  { %v1956_v48 = vmul.f32 %v2849_v35, %v1954_v46 }
0x1a65   :  { %1958 = vrot.lane.b32.xlu1 %v1956_v48, %s3067_s3 }
0x1a66   :  { %v1415_v50 = vpop.permute.xlu0 %1414 }
0x1a67   :  { %1417 = vst.msk [vmem:[#allocation2 + $0x10] sm:$0xc] %vm288_vm6, %v1415_v50 }
0x1a68   :  { %1428 = vst.msk [vmem:[#allocation2 + $0x10] sm:$0xc0] %vm303_vm7, %v1415_v50 }
0x1a69   :  { %1419 = vrot.lane.b32.xlu1 %v1418_v23, %s3068_s13 }
0x1ad7   :  { %v1959_v52 = vpop.permute.xlu1 %1958 }
0x1ad8   :  { %v1961_v53 = vadd.f32 %v2851_v37, %v1959_v52  ;;  %v2180_v52 = vld [vmem:[#allocation2 + $0x18] sm:$0xc0] }
0x1ada   :  { %2430 = vmatmul.mubr.msk.f32.vlgmr.msra.gmra.mrb[16].mxu1 %vm348_vm9, %v1961_v53 }
0x1adb   :  { %v1420_v54 = vpop.permute.xlu1 %1419  ;;  %2733 = vmatpush1.bf16.msra.mxu1 %v3497_v60  ;;  %2249 = vmatprep.mubr.f32.mxu1 %v3065_v0 }
0x1adc   :  { %1422 = vst.msk [vmem:[#allocation2 + $0x10] sm:$0xc] %vm294_vm10, %v1420_v54  ;;  %2735 = vmatprep.subr.bf16.mxu1 %v3499_v61 }
0x1add   :  { %1429 = vst.msk [vmem:[#allocation2 + $0x10] sm:$0xc0] %vm305_vm11, %v1420_v54  ;;  %v2291_v54 = vld [vmem:[%s3739_s9] sm:$0xff] }
0x1adf   :  { %2737 = vmatpush1.bf16.msra.mxu1 %v3504_v3 }
0x1ae0   :  { %2739 = vmatprep.subr.bf16.mxu1 %v3507_v4 }
0x1ae3   :  { %2741 = vmatpush1.bf16.msra.mxu1 %v3510_v10  ;;  %v1962_v56 = vld [vmem:[#allocation2 + $0x10] sm:$0xc]  ;;  %v1963_v10 = vld [vmem:[#allocation2 + $0x18] sm:$0xc] }
0x1ae4   :  { %2743 = vmatprep.subr.bf16.mxu1 %v3513_v11  ;;  %v2179_v36 = vld [vmem:[#allocation2 + $0x10] sm:$0xc0] }
0x1ae7   :  { %2745 = vmatpush1.bf16.msra.mxu1 %v3516_v14 }
0x1bad   :  { %v2033_v24 = vpop.f32.mrb[16].mxu1 }
0x1bae   :  { %v2039_v60 = vrot.slane %v2033_v24, 6  ;;  %v2035_v55 = vpop.f32.mrb[17].mxu1  ;;  %v2292_v24 = vld [vmem:[%s3739_s9 + $0x8] sm:$0xff] }
0x1baf   :  { %v2048_v61 = vadd.f32 %v3577_v42, %v2035_v55  ;;  %v3069_v55 = vmov 0.0|0.0  }
0x1bb0   :  { %v2041_v57 = vadd.f32 %v2039_v60, %v1962_v56  ;;  %v2293_v60 = vld [vmem:[%s3739_s9 + $0x10] sm:$0xff]  ;;  %2746 = vmatprep.subr.bf16.mxu0 %v3069_v55  ;;  %v2294_v56 = vld [vmem:[%s3739_s9 + $0x18] sm:$0xff] }
0x1bb1   :  { %v2050_v3 = vrot.slane %v2048_v61, 6 }
0x1bb2   :  { %v2431_v59 = vmul.f32 -1.442695, %v2041_v57  ;;  %v2750_v57 = vpack.c.bf16 %v2294_v56, %v2293_v60 }
0x1bb4   :  { %2852 = vpow2.f32 %v2431_v59 }
0x1bbe   :  { %v2853_v49 = vpop.eup %2852 }
0x1bbf   :  { %v2045_v62 = vadd.f32 1.0, %v2853_v49  ;;  %v2295_v49 = vld [vmem:[%s3739_s9 + $0x20] sm:$0xff] }
0x1bc1   :  { %2854 = vrcp.f32 %v2045_v62  ;;  %v2296_v62 = vld [vmem:[%s3739_s9 + $0x28] sm:$0xff] }
0x1bcb   :  { %v2855_v4 = vpop.eup %2854 }
0x1bcc   :  { %v2052_v63 = vmul.f32 %v2855_v4, %v2050_v3 }
0x1bce   :  { %v2053_v1 = vadd.f32 %v2052_v63, %v1963_v10  ;;  %v2297_v10 = vld [vmem:[%s3739_s9 + $0x30] sm:$0xff] }
0x1bd0   :  { %2856 = vtanh.f32 %v2053_v1  ;;  %v2298_v1 = vld [vmem:[%s3739_s9 + $0x38] sm:$0xff]  ;;  %s3071_s9 = smov [#allocation16]  }
0x1bd1   :  { %s2388_s24 = sshll.u32 %s3071_s9, 4  ;;  %s2389_s24 = int_to_ptr.vmem [resolvable:$true] %s2388_s24 }
0x1bd2   :  { %s3024_s25 = scalar_lea.vmem %s2389_s24, 32  ;;  %p3029_p1 = scmp.lt.s32.totalorder %s2389_s24, %s2389_s24 }
0x1bd3   :  { %p3025_p0 = scmp.ne.s32.totalorder %s2389_s24, %s3024_s25  ;;  %p3030_p2 = scmp.lt.s32.totalorder %s3024_s25, %s3024_s25 }
0x1bd5   :  { %p3031_p3 = por %p3030_p2, %p3029_p1 }
0x1bd7   :  { %p3032_p4 = pnand %p3031_p3, %p3025_p0 }
0x1bda   :  { %v2857_v11 = vpop.eup %2856 }
0x1bdb   :  { %v2056_v14 = vrot.slane %v2857_v11, 2 }
0x1bdd   :  { %v2058_v2 = vsub.f32 %v1961_v53, %v2056_v14 }
0x1bdf   :  { %v2060_v6 = vrot.slane %v2058_v2, 6 }
0x1be1   :  { %2061 = vrot.lane.b32.xlu0 %v2060_v6, %s3067_s3 }
0x1c53   :  { %v2062_v7 = vpop.permute.xlu0 %2061 }
0x1c54   :  { %v2064_v8 = vmul.f32 %v2855_v4, %v2062_v7  ;;  %v2753_v4 = vpack.c.bf16 %v2296_v62, %v2295_v49  ;;  %v2288_v7 = vrot.slane %v3587_v51, 2 }
0x1c56   :  { %2066 = vrot.lane.b32.xlu1 %v2064_v8, %s3067_s3 }
0x1cc8   :  { %v2067_v9 = vpop.permute.xlu1 %2066 }
0x1cc9   :  { %v2069_v12 = vadd.f32 %v2857_v11, %v2067_v9  ;;  %v2756_v11 = vpack.c.bf16 %v2298_v1, %v2297_v10 }
0x1ccb   :  { %v2073_v13 = vrot.slane %v2069_v12, 2 }
0x1ccd   :  { %2432 = vmatmul.mubr.msk.f32.vlgmr.msra.gmra.mrb[18].mxu0 %vm348_vm9, %v2073_v13  ;;  %v2436_v13 = vld [vmem:[#allocation15] ss:$0 sm:$0xff] }
0x1cce   :  { %2463 = vmatprep.mubr.msk.f32.mxu0 %vm3070_vm15, %v3065_v0 }
0x1da0   :  { %v2142_v58 = vpop.f32.mrb[18].mxu0 }
0x1da1   :  { %v2148_v16 = vrot.slane %v2142_v58, 4  ;;  %v2144_v17 = vpop.f32.mrb[19].mxu0 }
0x1da2   :  { %v2157_v22 = vadd.f32 %v3577_v42, %v2144_v17 }
0x1da3   :  { %v2150_v20 = vadd.f32 %v2148_v16, %v2070_v18 }
0x1da4   :  { %v2159_v25 = vrot.slane %v2157_v22, 4 }
0x1da5   :  { %v2433_v47 = vmul.f32 -1.442695, %v2150_v20 }
0x1da7   :  { %2858 = vpow2.f32 %v2433_v47 }
0x1db1   :  { %v2859_v21 = vpop.eup %2858 }
0x1db2   :  { %v2154_v19 = vadd.f32 1.0, %v2859_v21 }
0x1db4   :  { %2860 = vrcp.f32 %v2154_v19 }
0x1dbe   :  { %v2861_v29 = vpop.eup %2860 }
0x1dbf   :  { %v2161_v30 = vmul.f32 %v2861_v29, %v2159_v25 }
0x1dc1   :  { %v2162_v23 = vadd.f32 %v2161_v30, %v2071_v41 }
0x1dc3   :  { %2862 = vtanh.f32 %v2162_v23 }
0x1dcd   :  { %v2863_v26 = vpop.eup %2862 }
0x1dce   :  { %v2165_v27 = vrot.slane %v2863_v26, 2 }
0x1dd0   :  { %v2167_v40 = vsub.f32 %v2069_v12, %v2165_v27 }
0x1dd2   :  { %v2169_v43 = vrot.slane %v2167_v40, 6 }
0x1dd4   :  { %2170 = vrot.lane.b32.xlu0 %v2169_v43, %s3067_s3 }
0x1e46   :  { %v2171_v28 = vpop.permute.xlu0 %2170 }
0x1e47   :  { %v2173_v31 = vmul.f32 %v2861_v29, %v2171_v28 }
0x1e49   :  { %2175 = vrot.lane.b32.xlu1 %v2173_v31, %s3067_s3 }
0x1ebb   :  { %v2176_v33 = vpop.permute.xlu1 %2175 }
0x1ebc   :  { %v2178_v5 = vadd.f32 %v2863_v26, %v2176_v33 }
0x1ebe   :  { %v2182_v32 = vrot.slane %v2178_v5, 4 }
0x1ec0   :  { %2434 = vmatmul.mubr.msk.f32.vlgmr.msra.gmra.mrb[18].mxu1 %vm348_vm9, %v2182_v32 }
0x1f93   :  { %v2251_v35 = vpop.f32.mrb[18].mxu1 }
0x1f94   :  { %v2257_v38 = vrot.slane %v2251_v35, 2  ;;  %v2253_v34 = vpop.f32.mrb[19].mxu1 }
0x1f95   :  { %v2266_v45 = vadd.f32 %v3577_v42, %v2253_v34  ;;  %v2747_v42 = vpack.c.bf16 %v2292_v24, %v2291_v54 }
0x1f96   :  { %v2259_v37 = vadd.f32 %v2257_v38, %v2179_v36 }
0x1f97   :  { %v2268_v46 = vrot.slane %v2266_v45, 2  ;;  %2748 = vmatpush3.bf16.msra.mxu0 %v2747_v42 }
0x1f98   :  { %v2435_v39 = vmul.f32 -1.442695, %v2259_v37  ;;  %2749 = vmatprep.subr.bf16.mxu0 %v3069_v55 }
0x1f9a   :  { %2864 = vpow2.f32 %v2435_v39 }
0x1f9b   :  { %2751 = vmatpush3.bf16.msra.mxu0 %v2750_v57 }
0x1f9c   :  { %2752 = vmatprep.subr.bf16.mxu0 %v3069_v55 }
0x1f9f   :  { %2754 = vmatpush3.bf16.msra.mxu0 %v2753_v4 }
0x1fa0   :  { %2755 = vmatprep.subr.bf16.mxu0 %v3069_v55 }
0x1fa3   :  { %2757 = vmatpush3.bf16.msra.mxu0 %v2756_v11 }
0x1fa4   :  { %v2865_v15 = vpop.eup %2864 }
0x1fa5   :  { %v2263_v44 = vadd.f32 1.0, %v2865_v15 }
0x1fa7   :  { %2866 = vrcp.f32 %v2263_v44 }
0x1fb1   :  { %v2867_v48 = vpop.eup %2866 }
0x1fb2   :  { %v2270_v50 = vmul.f32 %v2867_v48, %v2268_v46 }
0x1fb4   :  { %v2271_v53 = vadd.f32 %v2270_v50, %v2180_v52 }
0x1fb6   :  { %2868 = vtanh.f32 %v2271_v53 }
0x1fc0   :  { %v2869_v59 = vpop.eup %2868 }
0x1fc1   :  { %v2274_v61 = vrot.slane %v2869_v59, 2 }
0x1fc3   :  { %v2276_v3 = vsub.f32 %v2178_v5, %v2274_v61 }
0x1fc5   :  { %v2278_v63 = vrot.slane %v2276_v3, 6 }
0x1fc7   :  { %2279 = vrot.lane.b32.xlu0 %v2278_v63, %s3067_s3 }
0x2039   :  { %v2280_v14 = vpop.permute.xlu0 %2279 }
0x203a   :  { %v2282_v2 = vmul.f32 %v2867_v48, %v2280_v14 }
0x203c   :  { %2284 = vrot.lane.b32.xlu1 %v2282_v2, %s3067_s3 }
0x20ae   :  { %v2285_v6 = vpop.permute.xlu1 %2284 }
0x20af   :  { %v2287_v8 = vadd.f32 %v2869_v59, %v2285_v6 }
0x20b1   :  { %v2290_v9 = vsel %vm164_vm0, %v2287_v8, %v2288_v7 }
0x20b2   :  { %v2307_v12 = vrot.slane %v2290_v9, 6 }
0x20b4   :  { %2464 = vmatmul.mubr.msk.f32.vlgmr.msra.gmra.mrb[20].mxu0 %vm348_vm9, %v2307_v12 }
0x2187   :  { %v2376_v58 = vpop.f32.mrb[20].mxu0 }
0x2188   :  { %v2377_v16 = vadd.f32 %v2436_v13, %v2376_v58  ;;  %v2465_v0 = vpop.f32.mrb[21].mxu0 }
0x218a   :  { %2381 = vst.msk [vmem:[#allocation16] sm:$0x3] %vm2380_vm1, %v2377_v16 }
0x218b   :  { %3035 = shalt.err (!%p3032_p4)
}
0x218c   :  { %s3036_s28 = scalar_lea.hbm %s3741_s11, 32 }
0x218d   :  { %p3037_p5 = scmp.ne.s32.totalorder %s3741_s11, %s3036_s28  ;;  %p3040_p6 = scmp.lt.u32.totalorder %s3036_s28, %s3741_s11 }
0x218f   :  { %p3042_p7 = pnand %p3040_p6, %p3037_p5 }
0x2191   :  { %3045 = shalt.err (!%p3042_p7)
}
0x2192   :  { %2391 = dma.vmem_to_hbm [thread:$0]  %s2389_s24, 32, %s3741_s11, [#allocation6]  }
0x2193   :  { %3054 = dma.done.wait [#allocation6], 32  }
0x2194   :  { %3055 = vsyncadd [#allocation6], 4294967264 }
0x2195   :  { %2395 = vsyncpa [#allocation5], 1 }
0x2196   :  { %2396 = vsyncpa [#allocation8], 1 }
0x2197   :  { %2397 = vsyncpa [#allocation11], 1 }
0x2198   :  { %2398 = vsyncpa [#allocation14], 1 }
0x2199   :  { %2399 = vsyncpa [#allocation6], 1 }

</bundles_post_ra>
